<compile_context>
chip_gen: v7x
topology: tpu7x:2x2x1
jax: 0.10.0
libtpu: 0.0.40
codegen_flags: <defaults>
</compile_context>

<pallas_src>
import functools

import jax
import jax.numpy as jnp
from jax.experimental import pallas as pl
from jax.experimental.pallas import tpu as pltpu

BN_EPS = 1e-5
TM = 256                            # rows per matmul tile (mult. of 8); safe on v5e/v6e/v7x
TC = 128                            # output-channel tile (lane-dense)
VMEM_LIMIT_MM = 48 * 1024 * 1024    # matmul pass (headroom on v7x's 64 MiB VMEM)
VMEM_LIMIT_EW = 32 * 1024 * 1024    # elementwise pass (small blocks)


def _round_up(v, m):
    return ((v + m - 1) // m) * m


def _pad2(a, rows, cols):
    r, c = a.shape
    if r == rows and c == cols:
        return a
    return jnp.pad(a, ((0, rows - r), (0, cols - c)))


# ---------------------------------------------------------------------------
# Pass 1: matmul (MXU, bf16 in / f32 acc) + per-channel partial sum / sum-sq
# ---------------------------------------------------------------------------
def _matmul_stats_kernel(*refs, n_ops):
    x_refs = refs[:n_ops]
    w_refs = refs[n_ops:2 * n_ops]
    y_ref, psum_ref, psq_ref = refs[2 * n_ops:]

    y = jnp.dot(x_refs[0][...], w_refs[0][...], preferred_element_type=jnp.float32)
    for j in range(1, n_ops):
        y = y + jnp.dot(x_refs[j][...], w_refs[j][...],
                        preferred_element_type=jnp.float32)
    y_ref[...] = y

    # Sublane-group partial stats: fold TM rows down to 8 with pure VPU adds
    # (native (8,128) tiling, no cross-lane/XLU work); the 8*n_mi -> 1 final
    # reduce happens in the wrapper on a tiny array.
    yr = y.reshape(y.shape[0] // 8, 8, y.shape[1])
    psum_ref[...] = jnp.sum(yr, axis=0)
    psq_ref[...] = jnp.sum(yr * yr, axis=0)


def _matmul_stats(xs, ws, c_out):
    """y = sum_j xs[j] @ ws[j] on the MXU (bf16 in, f32 acc) + channel stats.

    xs[j]: (rows, k_j) activations (zero-padded rows/cols are fine).
    ws[j]: (k_true_j, c_out) f32 weight matrices.
    Returns y (M_p, C_p) f32 and per-channel sum / sum-of-squares (1, C_p) f32.
    """
    m = xs[0].shape[0]
    m_p = _round_up(m, TM)
    c_p = _round_up(c_out, TC)
    xs_p, ws_p = [], []
    for x, w in zip(xs, ws):
        k_p = _round_up(x.shape[1], TC)        # lane-dense, full MXU depth
        xs_p.append(_pad2(x.astype(jnp.bfloat16), m_p, k_p))
        ws_p.append(_pad2(w, k_p, c_p).astype(jnp.bfloat16))

    n_mi, n_ci = m_p // TM, c_p // TC
    grid = (n_mi, n_ci)        # channel axis innermost: x tile resident across it

    in_specs = (
        [pl.BlockSpec((TM, xp.shape[1]), lambda mi, ci: (mi, 0)) for xp in xs_p]
        + [pl.BlockSpec((wp.shape[0], TC), lambda mi, ci: (0, ci)) for wp in ws_p])

    y, psum, psq = pl.pallas_call(
        functools.partial(_matmul_stats_kernel, n_ops=len(xs_p)),
        out_shape=(
            jax.ShapeDtypeStruct((m_p, c_p), jnp.float32),
            jax.ShapeDtypeStruct((8 * n_mi, c_p), jnp.float32),
            jax.ShapeDtypeStruct((8 * n_mi, c_p), jnp.float32),
        ),
        grid_spec=pltpu.PrefetchScalarGridSpec(
            num_scalar_prefetch=0,
            grid=grid,
            in_specs=in_specs,
            out_specs=(
                pl.BlockSpec((TM, TC), lambda mi, ci: (mi, ci)),
                pl.BlockSpec((8, TC), lambda mi, ci: (mi, ci)),
                pl.BlockSpec((8, TC), lambda mi, ci: (mi, ci)),
            ),
        ),
        compiler_params=pltpu.CompilerParams(
            dimension_semantics=("parallel", "parallel"),
            vmem_limit_bytes=VMEM_LIMIT_MM),
    )(*xs_p, *ws_p)

    s = jnp.sum(psum, axis=0, keepdims=True)
    sq = jnp.sum(psq, axis=0, keepdims=True)
    return y, s, sq


# ---------------------------------------------------------------------------
# Pass 2: y*scale + shift (folded BN), activation, optional residual, bf16 out
# ---------------------------------------------------------------------------
def _bn_act_kernel(*refs, act, has_res, need_mask, m_true, tile_rows):
    if has_res:
        y_ref, scale_ref, shift_ref, res_ref, out_ref = refs
    else:
        y_ref, scale_ref, shift_ref, out_ref = refs
        res_ref = None

    z = y_ref[...] * scale_ref[...] + shift_ref[...]
    if act == "hardswish":
        z = z * jnp.clip(z + 3.0, 0.0, 6.0) * (1.0 / 6.0)
    elif act == "leaky_relu":
        z = jnp.where(z >= 0.0, z, 0.1 * z)
    if res_ref is not None:
        z = z + res_ref[...].astype(jnp.float32)
    if need_mask:
        # Keep padded M rows exactly zero so downstream BN stats stay correct.
        rows = pl.program_id(0) * tile_rows + jax.lax.broadcasted_iota(
            jnp.int32, z.shape, 0)
        z = jnp.where(rows < m_true, z, 0.0)
    out_ref[...] = z.astype(out_ref.dtype)


def _bn_scale_shift(s, sq, gamma, beta, m_true):
    """Fold batch-statistics BN into per-channel scale/shift (tiny JAX math)."""
    c_p = s.shape[1]
    g = _pad2(gamma.astype(jnp.float32).reshape(1, -1), 1, c_p)
    b = _pad2(beta.astype(jnp.float32).reshape(1, -1), 1, c_p)
    inv_m = 1.0 / float(m_true)
    mean = s * inv_m
    var = jnp.maximum(sq * inv_m - mean * mean, 0.0)   # clamp f32 cancellation
    scale = g * jax.lax.rsqrt(var + BN_EPS)
    shift = b - mean * scale
    return scale, shift


def _bn_act(y_p, scale, shift, m_true, act, residual=None, out_dtype=jnp.bfloat16):
    m_p, c_p = y_p.shape
    tile_rows = 512 if m_p % 512 == 0 else TM
    args = [y_p, scale, shift]
    in_specs = [
        pl.BlockSpec((tile_rows, c_p), lambda mi: (mi, 0)),
        pl.BlockSpec((1, c_p), lambda mi: (0, 0)),
        pl.BlockSpec((1, c_p), lambda mi: (0, 0)),
    ]
    has_res = residual is not None
    if has_res:
        args.append(residual)
        in_specs.append(pl.BlockSpec((tile_rows, c_p), lambda mi: (mi, 0)))

    out = pl.pallas_call(
        functools.partial(_bn_act_kernel, act=act, has_res=has_res,
                          need_mask=(m_p != m_true), m_true=m_true,
                          tile_rows=tile_rows),
        out_shape=jax.ShapeDtypeStruct((m_p, c_p), out_dtype),
        grid_spec=pltpu.PrefetchScalarGridSpec(
            num_scalar_prefetch=0,
            grid=(m_p // tile_rows,),
            in_specs=in_specs,
            out_specs=pl.BlockSpec((tile_rows, c_p), lambda mi: (mi, 0)),
        ),
        compiler_params=pltpu.CompilerParams(
            dimension_semantics=("parallel",),
            vmem_limit_bytes=VMEM_LIMIT_EW),
    )(*args)
    return out


# ---------------------------------------------------------------------------
# Layer helpers (wrapper-side layout plumbing; heavy work stays in Pallas)
# ---------------------------------------------------------------------------
def _weight_to_mat(weight):
    """(Cout, Cin, kh, kw) -> (kh*kw*Cin, Cout), matching _im2col_3x3 ordering."""
    c_out, c_in, kh, kw = weight.shape
    return weight.astype(jnp.float32).transpose(2, 3, 1, 0).reshape(
        kh * kw * c_in, c_out)


def _im2col_3x3(x_mc, n, h, w):
    """(M, C) bf16 NHWC-flattened activation -> (M, 9*C) bf16 patches.

    TODO(synk): implicit im2col (9-tap K-accumulation grid axis / manual DMA)
    would avoid materializing the patches tensor entirely."""
    c = x_mc.shape[1]
    x = x_mc.reshape(n, h, w, c)
    xp = jnp.pad(x, ((0, 0), (1, 1), (1, 1), (0, 0)))
    cols = [xp[:, i:i + h, j:j + w, :] for i in range(3) for j in range(3)]
    return jnp.concatenate(cols, axis=-1).reshape(n * h * w, 9 * c)


def _conv_bn_act(xs, weights, gamma, beta, m_true, act, residual=None,
                 out_dtype=jnp.bfloat16):
    """Conv2d(bias=False, stride 1) + BatchNorm2d(batch stats) + activation."""
    c_out = weights[0].shape[0]
    y, s, sq = _matmul_stats(xs, [_weight_to_mat(w) for w in weights], c_out)
    scale, shift = _bn_scale_shift(s, sq, gamma, beta, m_true)
    return _bn_act(y, scale, shift, m_true, act, residual, out_dtype)


@jax.jit
def bottleneckcsp_forward(x, params):
    n, c_in, h, w = x.shape
    m = n * h * w
    p = params
    c_ = p["conv2_w"].shape[0]
    c_out = p["conv4_w"].shape[0]

    # One-time layout: NCHW f32 -> NHWC-flattened bf16, zero-padded (M_p, C_p).
    # Activations stay in this padded bf16 layout across all layers.
    x_mc = x.astype(jnp.bfloat16).transpose(0, 2, 3, 1).reshape(m, c_in)
    x_pad = _pad2(x_mc, _round_up(m, TM), _round_up(c_in, TC))

    # conv1: 1x1 Conv -> BN -> Hardswish
    y = _conv_bn_act([x_pad], [p["conv1_w"]], p["conv1_g"], p["conv1_b"], m,
                     "hardswish")

    # Bottleneck blocks: 1x1 then 3x3; residual add fused into the 2nd BN pass
    for blk in p["bneck"]:
        t = _conv_bn_act([y], [blk["cv1_w"]], blk["cv1_g"], blk["cv1_b"], m,
                         "hardswish")
        patches = _im2col_3x3(t[:m, :c_], n, h, w)        # bf16 patches
        y = _conv_bn_act([patches], [blk["cv2_w"]], blk["cv2_g"], blk["cv2_b"],
                         m, "hardswish", residual=y)

    # conv2 / conv3 are plain 1x1 convs; BL's BatchNorm is per-channel so its
    # stats split cleanly across the two concat halves -> apply BL (BN +
    # LeakyReLU 0.1) per half with the matching gamma/beta slice.
    y2m, s2, q2 = _matmul_stats([y], [_weight_to_mat(p["conv2_w"])], c_)
    sc2, sh2 = _bn_scale_shift(s2, q2, p["bl_g"][:c_], p["bl_b"][:c_], m)
    y2 = _bn_act(y2m, sc2, sh2, m, "leaky_relu")

    y3m, s3, q3 = _matmul_stats([x_pad], [_weight_to_mat(p["conv3_w"])], c_)
    sc3, sh3 = _bn_scale_shift(s3, q3, p["bl_g"][c_:], p["bl_b"][c_:], m)
    y3 = _bn_act(y3m, sc3, sh3, m, "leaky_relu")

    # conv4 on the implicit concat: split its weight along K and accumulate
    # y2 @ W4a + y3 @ W4b inside one matmul kernel (concat never materialized).
    out = _conv_bn_act([y2, y3],
                       [p["conv4_w"][:, :c_], p["conv4_w"][:, c_:]],
                       p["conv4_g"], p["conv4_b"], m, "hardswish",
                       out_dtype=jnp.float32)

    return out[:m, :c_out].reshape(n, h, w, c_out).transpose(0, 3, 1, 2)


# ---------------------------------------------------------------------------
# Pure-JAX reference. use_bf16=True mirrors the kernel's precision choices
# (bf16 MXU inputs and bf16 inter-layer activation storage).
# ---------------------------------------------------------------------------
def _ref_conv2d(x, w, pad, use_bf16):
    if use_bf16:
        x = x.astype(jnp.bfloat16)
        w = w.astype(jnp.bfloat16)
    return jax.lax.conv_general_dilated(
        x, w, window_strides=(1, 1), padding=[(pad, pad), (pad, pad)],
        dimension_numbers=("NCHW", "OIHW", "NCHW"),
        preferred_element_type=jnp.float32)


def _ref_bn(y, g, b):
    mean = y.mean(axis=(0, 2, 3), keepdims=True)
    var = ((y - mean) ** 2).mean(axis=(0, 2, 3), keepdims=True)
    yh = (y - mean) * jax.lax.rsqrt(var + BN_EPS)
    return yh * g[None, :, None, None] + b[None, :, None, None]


def _hswish(z):
    return z * jnp.clip(z + 3.0, 0.0, 6.0) * (1.0 / 6.0)


def _lrelu(z):
    return jnp.where(z >= 0.0, z, 0.1 * z)


def _reference(x, p, use_bf16):
    x = x.astype(jnp.float32)
    cast = ((lambda a: a.astype(jnp.bfloat16).astype(jnp.float32))
            if use_bf16 else (lambda a: a))

    def conv_block(inp, w, g, b, pad=0):
        return _hswish(_ref_bn(_ref_conv2d(inp, w, pad, use_bf16), g, b))

    y = cast(conv_block(x, p["conv1_w"], p["conv1_g"], p["conv1_b"]))
    for blk in p["bneck"]:
        t = cast(conv_block(y, blk["cv1_w"], blk["cv1_g"], blk["cv1_b"]))
        y = cast(conv_block(t, blk["cv2_w"], blk["cv2_g"], blk["cv2_b"], pad=1) + y)
    y2 = _ref_conv2d(y, p["conv2_w"], 0, use_bf16)
    y3 = _ref_conv2d(x, p["conv3_w"], 0, use_bf16)
    cat = jnp.concatenate([y2, y3], axis=1)
    z = cast(_lrelu(_ref_bn(cat, p["bl_g"], p["bl_b"])))
    return conv_block(z, p["conv4_w"], p["conv4_g"], p["conv4_b"])


if __name__ == "__main__":
    # Bottleneckcsp(c_in=4, c_out=8, n=3, depth_multiple=0.33, e=0.5)
    #   -> c_ = int(4 * 0.5) = 2, n_blocks = max(round(3 * 0.33), 1) = 1
    n_batch, c_in, h, w = 2, 4, 16, 16
    c_out, n_repeat, depth_multiple, e = 8, 3, 0.33, 0.5
    c_ = int(c_in * e)
    n_blocks = max(round(n_repeat * depth_multiple), 1)

    key = jax.random.PRNGKey(0)
    keys = iter(jax.random.split(key, 64))

    def nrm(shape, scale=1.0):
        return scale * jax.random.normal(next(keys), shape, dtype=jnp.float32)

    params = {
        "conv1_w": nrm((c_, c_in, 1, 1), 0.3),
        "conv1_g": 1.0 + nrm((c_,), 0.1),
        "conv1_b": nrm((c_,), 0.1),
        "conv2_w": nrm((c_, c_, 1, 1), 0.3),
        "conv3_w": nrm((c_, c_in, 1, 1), 0.3),
        "bl_g": 1.0 + nrm((2 * c_,), 0.1),
        "bl_b": nrm((2 * c_,), 0.1),
        "conv4_w": nrm((c_out, 2 * c_, 1, 1), 0.3),
        "conv4_g": 1.0 + nrm((c_out,), 0.1),
        "conv4_b": nrm((c_out,), 0.1),
        "bneck": [],
    }
    for _ in range(n_blocks):
        params["bneck"].append({
            "cv1_w": nrm((c_, c_, 1, 1), 0.3),
            "cv1_g": 1.0 + nrm((c_,), 0.1),
            "cv1_b": nrm((c_,), 0.1),
            "cv2_w": nrm((c_, c_, 3, 3), 0.2),
            "cv2_g": 1.0 + nrm((c_,), 0.1),
            "cv2_b": nrm((c_,), 0.1),
        })

    x = jax.random.normal(next(keys), (n_batch, c_in, h, w), dtype=jnp.float32)

    out = bottleneckcsp_forward(x, params)
    jax.block_until_ready(out)

    assert out.shape == (n_batch, c_out, h, w), out.shape

    # Tight check against a reference with matching bf16 precision choices.
    ref_bf16 = _reference(x, params, use_bf16=True)
    assert jnp.allclose(out, ref_bf16, atol=5e-3, rtol=5e-3), \
        float(jnp.abs(out - ref_bf16).max())

    # Loose check against the exact f32 module semantics (bf16 MXU inputs and
    # bf16 inter-layer activation storage are the only intentional deviations).
    ref_f32 = _reference(x, params, use_bf16=False)
    assert jnp.allclose(out, ref_f32, atol=1e-1, rtol=1e-1), \
        float(jnp.abs(out - ref_f32).max())

    print("KERNEL_OK")
</pallas_src>

<mosaic_0001>
module attributes {stable_mosaic.version = 11 : i64} {
  func.func @_matmul_stats_kernel(%arg0: i32, %arg1: i32, %arg2: memref<256x128xbf16, #tpu.memory_space<vmem>>, %arg3: memref<128x128xbf16, #tpu.memory_space<vmem>>, %arg4: memref<256x128xf32, #tpu.memory_space<vmem>>, %arg5: memref<8x128xf32, #tpu.memory_space<vmem>>, %arg6: memref<8x128xf32, #tpu.memory_space<vmem>>) attributes {dimension_semantics = [#tpu.dimension_semantics<parallel>, #tpu.dimension_semantics<parallel>], iteration_bounds = array<i64: 2, 1>, scalar_prefetch = 0 : i64, scratch_operands = 0 : i64, tpu.core_type = #tpu.core_type<tc>, window_params = [{transform_indices = @transform_0, window_bounds = array<i64: 256, 128>}, {transform_indices = @transform_1, window_bounds = array<i64: 128, 128>}, {transform_indices = @transform_2, window_bounds = array<i64: 256, 128>}, {transform_indices = @transform_3, window_bounds = array<i64: 8, 128>}, {transform_indices = @transform_4, window_bounds = array<i64: 8, 128>}]} {
    %c0 = arith.constant 0 : index
    %c0_0 = arith.constant 0 : index
    %0 = vector.load %arg2[%c0, %c0_0] : memref<256x128xbf16, #tpu.memory_space<vmem>>, vector<256x128xbf16>
    %c0_1 = arith.constant 0 : index
    %c0_2 = arith.constant 0 : index
    %1 = vector.load %arg3[%c0_1, %c0_2] : memref<128x128xbf16, #tpu.memory_space<vmem>>, vector<128x128xbf16>
    %cst = arith.constant dense<0.000000e+00> : vector<256x128xf32>
    %2 = tpu.matmul %0, %1, %cst {dimension_numbers = #tpu.dot_dimension_numbers<[1], [0], [0], [1], [0, 0, 1, 1], [], []>} : vector<256x128xbf16>, vector<128x128xbf16>, vector<256x128xf32> -> vector<256x128xf32>
    %c0_3 = arith.constant 0 : index
    %c0_4 = arith.constant 0 : index
    %3 = vector.load %arg4[%c0_3, %c0_4] : memref<256x128xf32, #tpu.memory_space<vmem>>, vector<256x128xf32>
    tpu.vector_store %arg4[%c0_3, %c0_4], %2 {strides = array<i32>} : memref<256x128xf32, #tpu.memory_space<vmem>>, vector<256x128xf32>,
    %4 = vector.shape_cast %2 : vector<256x128xf32> to vector<32x8x128xf32>
    %cst_5 = arith.constant dense<0.000000e+00> : vector<8x128xf32>
    %5 = vector.multi_reduction <add>, %4, %cst_5 [0] : vector<32x8x128xf32> to vector<8x128xf32>
    %c0_6 = arith.constant 0 : index
    %c0_7 = arith.constant 0 : index
    %6 = vector.load %arg5[%c0_6, %c0_7] : memref<8x128xf32, #tpu.memory_space<vmem>>, vector<8x128xf32>
    tpu.vector_store %arg5[%c0_6, %c0_7], %5 {strides = array<i32>} : memref<8x128xf32, #tpu.memory_space<vmem>>, vector<8x128xf32>,
    %7 = arith.mulf %4, %4 : vector<32x8x128xf32>
    %cst_8 = arith.constant dense<0.000000e+00> : vector<8x128xf32>
    %8 = vector.multi_reduction <add>, %7, %cst_8 [0] : vector<32x8x128xf32> to vector<8x128xf32>
    %c0_9 = arith.constant 0 : index
    %c0_10 = arith.constant 0 : index
    %9 = vector.load %arg6[%c0_9, %c0_10] : memref<8x128xf32, #tpu.memory_space<vmem>>, vector<8x128xf32>
    tpu.vector_store %arg6[%c0_9, %c0_10], %8 {strides = array<i32>} : memref<8x128xf32, #tpu.memory_space<vmem>>, vector<8x128xf32>,
    return
  }
  func.func @transform_0(%arg0: i32, %arg1: i32) -> (i32, i32) {
    %c0_i32 = arith.constant 0 : i32
    %c0_i32_0 = arith.constant 0 : i32
    return %arg0, %c0_i32 : i32, i32
  }
  func.func @transform_1(%arg0: i32, %arg1: i32) -> (i32, i32) {
    %c0_i32 = arith.constant 0 : i32
    %c0_i32_0 = arith.constant 0 : i32
    return %c0_i32, %arg1 : i32, i32
  }
  func.func @transform_2(%arg0: i32, %arg1: i32) -> (i32, i32) {
    %c0_i32 = arith.constant 0 : i32
    return %arg0, %arg1 : i32, i32
  }
  func.func @transform_3(%arg0: i32, %arg1: i32) -> (i32, i32) {
    %c0_i32 = arith.constant 0 : i32
    return %arg0, %arg1 : i32, i32
  }
  func.func @transform_4(%arg0: i32, %arg1: i32) -> (i32, i32) {
    %c0_i32 = arith.constant 0 : i32
    return %arg0, %arg1 : i32, i32
  }
}

module attributes {stable_mosaic.version = 11 : i64} {
  func.func @_bn_act_kernel(%arg0: i32, %arg1: memref<512x128xf32, #tpu.memory_space<vmem>>, %arg2: memref<1x128xf32, #tpu.memory_space<vmem>>, %arg3: memref<1x128xf32, #tpu.memory_space<vmem>>, %arg4: memref<512x128xbf16, #tpu.memory_space<vmem>>) attributes {dimension_semantics = [#tpu.dimension_semantics<parallel>], iteration_bounds = array<i64: 1>, scalar_prefetch = 0 : i64, scratch_operands = 0 : i64, tpu.core_type = #tpu.core_type<tc>, window_params = [{transform_indices = @transform_0, window_bounds = array<i64: 512, 128>}, {pipeline_mode = #tpu.pipeline_mode<synchronous>, transform_indices = @transform_1, window_bounds = array<i64: 1, 128>}, {pipeline_mode = #tpu.pipeline_mode<synchronous>, transform_indices = @transform_2, window_bounds = array<i64: 1, 128>}, {transform_indices = @transform_3, window_bounds = array<i64: 512, 128>}]} {
    %c0 = arith.constant 0 : index
    %c0_0 = arith.constant 0 : index
    %0 = vector.load %arg1[%c0, %c0_0] : memref<512x128xf32, #tpu.memory_space<vmem>>, vector<512x128xf32>
    %c0_1 = arith.constant 0 : index
    %c0_2 = arith.constant 0 : index
    %1 = vector.load %arg2[%c0_1, %c0_2] : memref<1x128xf32, #tpu.memory_space<vmem>>, vector<1x128xf32>
    %2 = vector.broadcast %1 : vector<1x128xf32> to vector<512x128xf32>
    %3 = arith.mulf %0, %2 : vector<512x128xf32>
    %c0_3 = arith.constant 0 : index
    %c0_4 = arith.constant 0 : index
    %4 = vector.load %arg3[%c0_3, %c0_4] : memref<1x128xf32, #tpu.memory_space<vmem>>, vector<1x128xf32>
    %5 = vector.broadcast %4 : vector<1x128xf32> to vector<512x128xf32>
    %6 = arith.addf %3, %5 : vector<512x128xf32>
    %cst = arith.constant 3.000000e+00 : f32
    %7 = vector.broadcast %cst : f32 to vector<512x128xf32>
    %8 = arith.addf %6, %7 : vector<512x128xf32>
    %cst_5 = arith.constant 0.000000e+00 : f32
    %cst_6 = arith.constant 6.000000e+00 : f32
    %9 = vector.broadcast %cst_5 : f32 to vector<512x128xf32>
    %10 = arith.maximumf %9, %8 : vector<512x128xf32>
    %11 = vector.broadcast %cst_6 : f32 to vector<512x128xf32>
    %12 = arith.minimumf %11, %10 : vector<512x128xf32>
    %13 = arith.mulf %6, %12 : vector<512x128xf32>
    %cst_7 = arith.constant 0.166666672 : f32
    %14 = vector.broadcast %cst_7 : f32 to vector<512x128xf32>
    %15 = arith.mulf %13, %14 : vector<512x128xf32>
    %16 = arith.truncf %15 : vector<512x128xf32> to vector<512x128xbf16>
    %c0_8 = arith.constant 0 : index
    %c0_9 = arith.constant 0 : index
    %17 = vector.load %arg4[%c0_8, %c0_9] : memref<512x128xbf16, #tpu.memory_space<vmem>>, vector<512x128xbf16>
    tpu.vector_store %arg4[%c0_8, %c0_9], %16 {strides = array<i32>} : memref<512x128xbf16, #tpu.memory_space<vmem>>, vector<512x128xbf16>,
    return
  }
  func.func @transform_0(%arg0: i32) -> (i32, i32) {
    %c0_i32 = arith.constant 0 : i32
    %c0_i32_0 = arith.constant 0 : i32
    return %arg0, %c0_i32 : i32, i32
  }
  func.func @transform_1(%arg0: i32) -> (i32, i32) {
    %c0_i32 = arith.constant 0 : i32
    %c0_i32_0 = arith.constant 0 : i32
    %c0_i32_1 = arith.constant 0 : i32
    return %c0_i32, %c0_i32_0 : i32, i32
  }
  func.func @transform_2(%arg0: i32) -> (i32, i32) {
    %c0_i32 = arith.constant 0 : i32
    %c0_i32_0 = arith.constant 0 : i32
    %c0_i32_1 = arith.constant 0 : i32
    return %c0_i32, %c0_i32_0 : i32, i32
  }
  func.func @transform_3(%arg0: i32) -> (i32, i32) {
    %c0_i32 = arith.constant 0 : i32
    %c0_i32_0 = arith.constant 0 : i32
    return %arg0, %c0_i32 : i32, i32
  }
}

module attributes {stable_mosaic.version = 11 : i64} {
  func.func @_bn_act_kernel(%arg0: i32, %arg1: memref<512x128xf32, #tpu.memory_space<vmem>>, %arg2: memref<1x128xf32, #tpu.memory_space<vmem>>, %arg3: memref<1x128xf32, #tpu.memory_space<vmem>>, %arg4: memref<512x128xbf16, #tpu.memory_space<vmem>>, %arg5: memref<512x128xbf16, #tpu.memory_space<vmem>>) attributes {dimension_semantics = [#tpu.dimension_semantics<parallel>], iteration_bounds = array<i64: 1>, scalar_prefetch = 0 : i64, scratch_operands = 0 : i64, tpu.core_type = #tpu.core_type<tc>, window_params = [{transform_indices = @transform_0, window_bounds = array<i64: 512, 128>}, {pipeline_mode = #tpu.pipeline_mode<synchronous>, transform_indices = @transform_1, window_bounds = array<i64: 1, 128>}, {pipeline_mode = #tpu.pipeline_mode<synchronous>, transform_indices = @transform_2, window_bounds = array<i64: 1, 128>}, {transform_indices = @transform_3, window_bounds = array<i64: 512, 128>}, {transform_indices = @transform_4, window_bounds = array<i64: 512, 128>}]} {
    %c0 = arith.constant 0 : index
    %c0_0 = arith.constant 0 : index
    %0 = vector.load %arg1[%c0, %c0_0] : memref<512x128xf32, #tpu.memory_space<vmem>>, vector<512x128xf32>
    %c0_1 = arith.constant 0 : index
    %c0_2 = arith.constant 0 : index
    %1 = vector.load %arg2[%c0_1, %c0_2] : memref<1x128xf32, #tpu.memory_space<vmem>>, vector<1x128xf32>
    %2 = vector.broadcast %1 : vector<1x128xf32> to vector<512x128xf32>
    %3 = arith.mulf %0, %2 : vector<512x128xf32>
    %c0_3 = arith.constant 0 : index
    %c0_4 = arith.constant 0 : index
    %4 = vector.load %arg3[%c0_3, %c0_4] : memref<1x128xf32, #tpu.memory_space<vmem>>, vector<1x128xf32>
    %5 = vector.broadcast %4 : vector<1x128xf32> to vector<512x128xf32>
    %6 = arith.addf %3, %5 : vector<512x128xf32>
    %cst = arith.constant 3.000000e+00 : f32
    %7 = vector.broadcast %cst : f32 to vector<512x128xf32>
    %8 = arith.addf %6, %7 : vector<512x128xf32>
    %cst_5 = arith.constant 0.000000e+00 : f32
    %cst_6 = arith.constant 6.000000e+00 : f32
    %9 = vector.broadcast %cst_5 : f32 to vector<512x128xf32>
    %10 = arith.maximumf %9, %8 : vector<512x128xf32>
    %11 = vector.broadcast %cst_6 : f32 to vector<512x128xf32>
    %12 = arith.minimumf %11, %10 : vector<512x128xf32>
    %13 = arith.mulf %6, %12 : vector<512x128xf32>
    %cst_7 = arith.constant 0.166666672 : f32
    %14 = vector.broadcast %cst_7 : f32 to vector<512x128xf32>
    %15 = arith.mulf %13, %14 : vector<512x128xf32>
    %c0_8 = arith.constant 0 : index
    %c0_9 = arith.constant 0 : index
    %16 = vector.load %arg4[%c0_8, %c0_9] : memref<512x128xbf16, #tpu.memory_space<vmem>>, vector<512x128xbf16>
    %17 = arith.extf %16 : vector<512x128xbf16> to vector<512x128xf32>
    %18 = arith.addf %15, %17 : vector<512x128xf32>
    %19 = arith.truncf %18 : vector<512x128xf32> to vector<512x128xbf16>
    %c0_10 = arith.constant 0 : index
    %c0_11 = arith.constant 0 : index
    %20 = vector.load %arg5[%c0_10, %c0_11] : memref<512x128xbf16, #tpu.memory_space<vmem>>, vector<512x128xbf16>
    tpu.vector_store %arg5[%c0_10, %c0_11], %19 {strides = array<i32>} : memref<512x128xbf16, #tpu.memory_space<vmem>>, vector<512x128xbf16>,
    return
  }
  func.func @transform_0(%arg0: i32) -> (i32, i32) {
    %c0_i32 = arith.constant 0 : i32
    %c0_i32_0 = arith.constant 0 : i32
    return %arg0, %c0_i32 : i32, i32
  }
  func.func @transform_1(%arg0: i32) -> (i32, i32) {
    %c0_i32 = arith.constant 0 : i32
    %c0_i32_0 = arith.constant 0 : i32
    %c0_i32_1 = arith.constant 0 : i32
    return %c0_i32, %c0_i32_0 : i32, i32
  }
  func.func @transform_2(%arg0: i32) -> (i32, i32) {
    %c0_i32 = arith.constant 0 : i32
    %c0_i32_0 = arith.constant 0 : i32
    %c0_i32_1 = arith.constant 0 : i32
    return %c0_i32, %c0_i32_0 : i32, i32
  }
  func.func @transform_3(%arg0: i32) -> (i32, i32) {
    %c0_i32 = arith.constant 0 : i32
    %c0_i32_0 = arith.constant 0 : i32
    return %arg0, %c0_i32 : i32, i32
  }
  func.func @transform_4(%arg0: i32) -> (i32, i32) {
    %c0_i32 = arith.constant 0 : i32
    %c0_i32_0 = arith.constant 0 : i32
    return %arg0, %c0_i32 : i32, i32
  }
}

module attributes {stable_mosaic.version = 11 : i64} {
  func.func @_bn_act_kernel(%arg0: i32, %arg1: memref<512x128xf32, #tpu.memory_space<vmem>>, %arg2: memref<1x128xf32, #tpu.memory_space<vmem>>, %arg3: memref<1x128xf32, #tpu.memory_space<vmem>>, %arg4: memref<512x128xbf16, #tpu.memory_space<vmem>>) attributes {dimension_semantics = [#tpu.dimension_semantics<parallel>], iteration_bounds = array<i64: 1>, scalar_prefetch = 0 : i64, scratch_operands = 0 : i64, tpu.core_type = #tpu.core_type<tc>, window_params = [{transform_indices = @transform_0, window_bounds = array<i64: 512, 128>}, {pipeline_mode = #tpu.pipeline_mode<synchronous>, transform_indices = @transform_1, window_bounds = array<i64: 1, 128>}, {pipeline_mode = #tpu.pipeline_mode<synchronous>, transform_indices = @transform_2, window_bounds = array<i64: 1, 128>}, {transform_indices = @transform_3, window_bounds = array<i64: 512, 128>}]} {
    %c0 = arith.constant 0 : index
    %c0_0 = arith.constant 0 : index
    %0 = vector.load %arg1[%c0, %c0_0] : memref<512x128xf32, #tpu.memory_space<vmem>>, vector<512x128xf32>
    %c0_1 = arith.constant 0 : index
    %c0_2 = arith.constant 0 : index
    %1 = vector.load %arg2[%c0_1, %c0_2] : memref<1x128xf32, #tpu.memory_space<vmem>>, vector<1x128xf32>
    %2 = vector.broadcast %1 : vector<1x128xf32> to vector<512x128xf32>
    %3 = arith.mulf %0, %2 : vector<512x128xf32>
    %c0_3 = arith.constant 0 : index
    %c0_4 = arith.constant 0 : index
    %4 = vector.load %arg3[%c0_3, %c0_4] : memref<1x128xf32, #tpu.memory_space<vmem>>, vector<1x128xf32>
    %5 = vector.broadcast %4 : vector<1x128xf32> to vector<512x128xf32>
    %6 = arith.addf %3, %5 : vector<512x128xf32>
    %cst = arith.constant 0.000000e+00 : f32
    %7 = vector.broadcast %cst : f32 to vector<512x128xf32>
    %8 = arith.cmpf oge, %6, %7 : vector<512x128xf32>
    %cst_5 = arith.constant 1.000000e-01 : f32
    %9 = vector.broadcast %cst_5 : f32 to vector<512x128xf32>
    %10 = arith.mulf %9, %6 : vector<512x128xf32>
    %11 = arith.select %8, %6, %10 : vector<512x128xi1>, vector<512x128xf32>
    %12 = arith.truncf %11 : vector<512x128xf32> to vector<512x128xbf16>
    %c0_6 = arith.constant 0 : index
    %c0_7 = arith.constant 0 : index
    %13 = vector.load %arg4[%c0_6, %c0_7] : memref<512x128xbf16, #tpu.memory_space<vmem>>, vector<512x128xbf16>
    tpu.vector_store %arg4[%c0_6, %c0_7], %12 {strides = array<i32>} : memref<512x128xbf16, #tpu.memory_space<vmem>>, vector<512x128xbf16>,
    return
  }
  func.func @transform_0(%arg0: i32) -> (i32, i32) {
    %c0_i32 = arith.constant 0 : i32
    %c0_i32_0 = arith.constant 0 : i32
    return %arg0, %c0_i32 : i32, i32
  }
  func.func @transform_1(%arg0: i32) -> (i32, i32) {
    %c0_i32 = arith.constant 0 : i32
    %c0_i32_0 = arith.constant 0 : i32
    %c0_i32_1 = arith.constant 0 : i32
    return %c0_i32, %c0_i32_0 : i32, i32
  }
  func.func @transform_2(%arg0: i32) -> (i32, i32) {
    %c0_i32 = arith.constant 0 : i32
    %c0_i32_0 = arith.constant 0 : i32
    %c0_i32_1 = arith.constant 0 : i32
    return %c0_i32, %c0_i32_0 : i32, i32
  }
  func.func @transform_3(%arg0: i32) -> (i32, i32) {
    %c0_i32 = arith.constant 0 : i32
    %c0_i32_0 = arith.constant 0 : i32
    return %arg0, %c0_i32 : i32, i32
  }
}

module attributes {stable_mosaic.version = 11 : i64} {
  func.func @_matmul_stats_kernel(%arg0: i32, %arg1: i32, %arg2: memref<256x128xbf16, #tpu.memory_space<vmem>>, %arg3: memref<256x128xbf16, #tpu.memory_space<vmem>>, %arg4: memref<128x128xbf16, #tpu.memory_space<vmem>>, %arg5: memref<128x128xbf16, #tpu.memory_space<vmem>>, %arg6: memref<256x128xf32, #tpu.memory_space<vmem>>, %arg7: memref<8x128xf32, #tpu.memory_space<vmem>>, %arg8: memref<8x128xf32, #tpu.memory_space<vmem>>) attributes {dimension_semantics = [#tpu.dimension_semantics<parallel>, #tpu.dimension_semantics<parallel>], iteration_bounds = array<i64: 2, 1>, scalar_prefetch = 0 : i64, scratch_operands = 0 : i64, tpu.core_type = #tpu.core_type<tc>, window_params = [{transform_indices = @transform_0, window_bounds = array<i64: 256, 128>}, {transform_indices = @transform_1, window_bounds = array<i64: 256, 128>}, {transform_indices = @transform_2, window_bounds = array<i64: 128, 128>}, {transform_indices = @transform_3, window_bounds = array<i64: 128, 128>}, {transform_indices = @transform_4, window_bounds = array<i64: 256, 128>}, {transform_indices = @transform_5, window_bounds = array<i64: 8, 128>}, {transform_indices = @transform_6, window_bounds = array<i64: 8, 128>}]} {
    %c0 = arith.constant 0 : index
    %c0_0 = arith.constant 0 : index
    %0 = vector.load %arg2[%c0, %c0_0] : memref<256x128xbf16, #tpu.memory_space<vmem>>, vector<256x128xbf16>
    %c0_1 = arith.constant 0 : index
    %c0_2 = arith.constant 0 : index
    %1 = vector.load %arg4[%c0_1, %c0_2] : memref<128x128xbf16, #tpu.memory_space<vmem>>, vector<128x128xbf16>
    %cst = arith.constant dense<0.000000e+00> : vector<256x128xf32>
    %2 = tpu.matmul %0, %1, %cst {dimension_numbers = #tpu.dot_dimension_numbers<[1], [0], [0], [1], [0, 0, 1, 1], [], []>} : vector<256x128xbf16>, vector<128x128xbf16>, vector<256x128xf32> -> vector<256x128xf32>
    %c0_3 = arith.constant 0 : index
    %c0_4 = arith.constant 0 : index
    %3 = vector.load %arg3[%c0_3, %c0_4] : memref<256x128xbf16, #tpu.memory_space<vmem>>, vector<256x128xbf16>
    %c0_5 = arith.constant 0 : index
    %c0_6 = arith.constant 0 : index
    %4 = vector.load %arg5[%c0_5, %c0_6] : memref<128x128xbf16, #tpu.memory_space<vmem>>, vector<128x128xbf16>
    %cst_7 = arith.constant dense<0.000000e+00> : vector<256x128xf32>
    %5 = tpu.matmul %3, %4, %cst_7 {dimension_numbers = #tpu.dot_dimension_numbers<[1], [0], [0], [1], [0, 0, 1, 1], [], []>} : vector<256x128xbf16>, vector<128x128xbf16>, vector<256x128xf32> -> vector<256x128xf32>
    %6 = arith.addf %2, %5 : vector<256x128xf32>
    %c0_8 = arith.constant 0 : index
    %c0_9 = arith.constant 0 : index
    %7 = vector.load %arg6[%c0_8, %c0_9] : memref<256x128xf32, #tpu.memory_space<vmem>>, vector<256x128xf32>
    tpu.vector_store %arg6[%c0_8, %c0_9], %6 {strides = array<i32>} : memref<256x128xf32, #tpu.memory_space<vmem>>, vector<256x128xf32>,
    %8 = vector.shape_cast %6 : vector<256x128xf32> to vector<32x8x128xf32>
    %cst_10 = arith.constant dense<0.000000e+00> : vector<8x128xf32>
    %9 = vector.multi_reduction <add>, %8, %cst_10 [0] : vector<32x8x128xf32> to vector<8x128xf32>
    %c0_11 = arith.constant 0 : index
    %c0_12 = arith.constant 0 : index
    %10 = vector.load %arg7[%c0_11, %c0_12] : memref<8x128xf32, #tpu.memory_space<vmem>>, vector<8x128xf32>
    tpu.vector_store %arg7[%c0_11, %c0_12], %9 {strides = array<i32>} : memref<8x128xf32, #tpu.memory_space<vmem>>, vector<8x128xf32>,
    %11 = arith.mulf %8, %8 : vector<32x8x128xf32>
    %cst_13 = arith.constant dense<0.000000e+00> : vector<8x128xf32>
    %12 = vector.multi_reduction <add>, %11, %cst_13 [0] : vector<32x8x128xf32> to vector<8x128xf32>
    %c0_14 = arith.constant 0 : index
    %c0_15 = arith.constant 0 : index
    %13 = vector.load %arg8[%c0_14, %c0_15] : memref<8x128xf32, #tpu.memory_space<vmem>>, vector<8x128xf32>
    tpu.vector_store %arg8[%c0_14, %c0_15], %12 {strides = array<i32>} : memref<8x128xf32, #tpu.memory_space<vmem>>, vector<8x128xf32>,
    return
  }
  func.func @transform_0(%arg0: i32, %arg1: i32) -> (i32, i32) {
    %c0_i32 = arith.constant 0 : i32
    %c0_i32_0 = arith.constant 0 : i32
    return %arg0, %c0_i32 : i32, i32
  }
  func.func @transform_1(%arg0: i32, %arg1: i32) -> (i32, i32) {
    %c0_i32 = arith.constant 0 : i32
    %c0_i32_0 = arith.constant 0 : i32
    return %arg0, %c0_i32 : i32, i32
  }
  func.func @transform_2(%arg0: i32, %arg1: i32) -> (i32, i32) {
    %c0_i32 = arith.constant 0 : i32
    %c0_i32_0 = arith.constant 0 : i32
    return %c0_i32, %arg1 : i32, i32
  }
  func.func @transform_3(%arg0: i32, %arg1: i32) -> (i32, i32) {
    %c0_i32 = arith.constant 0 : i32
    %c0_i32_0 = arith.constant 0 : i32
    return %c0_i32, %arg1 : i32, i32
  }
  func.func @transform_4(%arg0: i32, %arg1: i32) -> (i32, i32) {
    %c0_i32 = arith.constant 0 : i32
    return %arg0, %arg1 : i32, i32
  }
  func.func @transform_5(%arg0: i32, %arg1: i32) -> (i32, i32) {
    %c0_i32 = arith.constant 0 : i32
    return %arg0, %arg1 : i32, i32
  }
  func.func @transform_6(%arg0: i32, %arg1: i32) -> (i32, i32) {
    %c0_i32 = arith.constant 0 : i32
    return %arg0, %arg1 : i32, i32
  }
}

module attributes {stable_mosaic.version = 11 : i64} {
  func.func @_bn_act_kernel(%arg0: i32, %arg1: memref<512x128xf32, #tpu.memory_space<vmem>>, %arg2: memref<1x128xf32, #tpu.memory_space<vmem>>, %arg3: memref<1x128xf32, #tpu.memory_space<vmem>>, %arg4: memref<512x128xf32, #tpu.memory_space<vmem>>) attributes {dimension_semantics = [#tpu.dimension_semantics<parallel>], iteration_bounds = array<i64: 1>, scalar_prefetch = 0 : i64, scratch_operands = 0 : i64, tpu.core_type = #tpu.core_type<tc>, window_params = [{transform_indices = @transform_0, window_bounds = array<i64: 512, 128>}, {pipeline_mode = #tpu.pipeline_mode<synchronous>, transform_indices = @transform_1, window_bounds = array<i64: 1, 128>}, {pipeline_mode = #tpu.pipeline_mode<synchronous>, transform_indices = @transform_2, window_bounds = array<i64: 1, 128>}, {transform_indices = @transform_3, window_bounds = array<i64: 512, 128>}]} {
    %c0 = arith.constant 0 : index
    %c0_0 = arith.constant 0 : index
    %0 = vector.load %arg1[%c0, %c0_0] : memref<512x128xf32, #tpu.memory_space<vmem>>, vector<512x128xf32>
    %c0_1 = arith.constant 0 : index
    %c0_2 = arith.constant 0 : index
    %1 = vector.load %arg2[%c0_1, %c0_2] : memref<1x128xf32, #tpu.memory_space<vmem>>, vector<1x128xf32>
    %2 = vector.broadcast %1 : vector<1x128xf32> to vector<512x128xf32>
    %3 = arith.mulf %0, %2 : vector<512x128xf32>
    %c0_3 = arith.constant 0 : index
    %c0_4 = arith.constant 0 : index
    %4 = vector.load %arg3[%c0_3, %c0_4] : memref<1x128xf32, #tpu.memory_space<vmem>>, vector<1x128xf32>
    %5 = vector.broadcast %4 : vector<1x128xf32> to vector<512x128xf32>
    %6 = arith.addf %3, %5 : vector<512x128xf32>
    %cst = arith.constant 3.000000e+00 : f32
    %7 = vector.broadcast %cst : f32 to vector<512x128xf32>
    %8 = arith.addf %6, %7 : vector<512x128xf32>
    %cst_5 = arith.constant 0.000000e+00 : f32
    %cst_6 = arith.constant 6.000000e+00 : f32
    %9 = vector.broadcast %cst_5 : f32 to vector<512x128xf32>
    %10 = arith.maximumf %9, %8 : vector<512x128xf32>
    %11 = vector.broadcast %cst_6 : f32 to vector<512x128xf32>
    %12 = arith.minimumf %11, %10 : vector<512x128xf32>
    %13 = arith.mulf %6, %12 : vector<512x128xf32>
    %cst_7 = arith.constant 0.166666672 : f32
    %14 = vector.broadcast %cst_7 : f32 to vector<512x128xf32>
    %15 = arith.mulf %13, %14 : vector<512x128xf32>
    %c0_8 = arith.constant 0 : index
    %c0_9 = arith.constant 0 : index
    %16 = vector.load %arg4[%c0_8, %c0_9] : memref<512x128xf32, #tpu.memory_space<vmem>>, vector<512x128xf32>
    tpu.vector_store %arg4[%c0_8, %c0_9], %15 {strides = array<i32>} : memref<512x128xf32, #tpu.memory_space<vmem>>, vector<512x128xf32>,
    return
  }
  func.func @transform_0(%arg0: i32) -> (i32, i32) {
    %c0_i32 = arith.constant 0 : i32
    %c0_i32_0 = arith.constant 0 : i32
    return %arg0, %c0_i32 : i32, i32
  }
  func.func @transform_1(%arg0: i32) -> (i32, i32) {
    %c0_i32 = arith.constant 0 : i32
    %c0_i32_0 = arith.constant 0 : i32
    %c0_i32_1 = arith.constant 0 : i32
    return %c0_i32, %c0_i32_0 : i32, i32
  }
  func.func @transform_2(%arg0: i32) -> (i32, i32) {
    %c0_i32 = arith.constant 0 : i32
    %c0_i32_0 = arith.constant 0 : i32
    %c0_i32_1 = arith.constant 0 : i32
    return %c0_i32, %c0_i32_0 : i32, i32
  }
  func.func @transform_3(%arg0: i32) -> (i32, i32) {
    %c0_i32 = arith.constant 0 : i32
    %c0_i32_0 = arith.constant 0 : i32
    return %arg0, %c0_i32 : i32, i32
  }
}

</mosaic_0001>

<bundles_post_ra>
// kernel: bottleneckcsp_forward.12
= control target key start
LH: loop header
LB: loop body
LE: loop exit
PB: predicated region body
PF: predicated region fallthrough
CT: control target
= control target key end

     0   :  { %s1152_s15 = smov 0   ;;  %s1154_s16 = smov 0   ;;  %s1360_s0 = inlined_call_operand.vmem [shape: bf16[512,128], index: 0, kind: input, shape index: {}]   ;;  %s1361_s1 = inlined_call_operand.vmem [shape: bf16[128,128], index: 1, kind: input, shape index: {}]   ;;  %s1362_s2 = inlined_call_operand.vmem [shape: f32[512,128], index: 2, kind: output, shape index: {0}]   ;;  %s1363_s3 = inlined_call_operand.vmem [shape: f32[16,128], index: 3, kind: output, shape index: {1}]   ;;  %s1364_s4 = inlined_call_operand.vmem [shape: f32[16,128], index: 4, kind: output, shape index: {2}]  }
   0x1   :  { %s1156_s17 = smov 0  }
   0x2 LB: > { %s27_s18 = sadd.s32 1, %s1121_s16  ;;  %p934_p0 = scmp.ge.s32.totalorder %s1125_s17, 1  ;;  %s1125_s17 = sphi %s1156_s17, %s15_s17   ;;  %s1121_s16 = sphi %s1154_s16, %s1366_s16   ;;  %s1117_s15 = sphi %s1152_s15, %s1365_s15  }
   0x3   : > { %p29_p1 = scmp.ge.s32.totalorder %s27_s18, 2  ;;  %p195_p2 = scmp.lt.s32.totalorder %s1125_s17, 3 }
   0x5   : > { %s1368_s18 = smov (%p29_p1, %s27_s18), 0  ;;  %p196_p3 = pnand %p934_p0, %p195_p2 }
   0x6   : > { %v1079_v0 = vld [vmem:[%s1361_s1] sm:$0xff] (!%p196_p3)   ;;  %s935_s21 = sshll.u32 (!%p196_p3), %s1117_s15, 5  ;;  %v1080_v1 = vld [vmem:[%s1361_s1 + $0x8] sm:$0xff] (!%p196_p3)   ;;  %v1081_v2 = vld [vmem:[%s1361_s1 + $0x10] sm:$0xff] (!%p196_p3)   ;;  %p261_p5 = scmp.lt.s32.totalorder (!%p196_p3), %s1117_s15, 1 }
   0x7   : > { %199 = sbr.rel (%p196_p3) target bundleno = 319 (0x13f), region = 28  ;;  %p243_p4 = scmp.lt.s32.totalorder (!%p196_p3), %s935_s21, 63  ;;  %991 = vmatprep.subr.bf16.mxu0 (!%p196_p3), %v1079_v0  ;;  %1039 = vmatprep.subr.bf16.mxu1 (!%p196_p3), %v1079_v0  ;;  %v1082_v3 = vld [vmem:[%s1361_s1 + $0x18] sm:$0xff] (!%p196_p3)   ;;  %v1083_v5 = vld [vmem:[%s1361_s1 + $0x20] sm:$0xff] (!%p196_p3)   ;;  %v1084_v6 = vld [vmem:[%s1361_s1 + $0x28] sm:$0xff] (!%p196_p3)  }
   0x8   : > { %992 = vmatpush3.bf16.msra.mxu0 (!%p196_p3), %v1079_v0  ;;  %1047 = vmatpush3.bf16.msra.mxu1 (!%p196_p3), %v1079_v0  ;;  %v1085_v8 = vld [vmem:[%s1361_s1 + $0x30] sm:$0xff] (!%p196_p3)   ;;  %v1086_v9 = vld [vmem:[%s1361_s1 + $0x38] sm:$0xff] (!%p196_p3)  }
   0x9   : > { %993 = vmatprep.subr.bf16.mxu0 (!%p196_p3), %v1080_v1  ;;  %1040 = vmatprep.subr.bf16.mxu1 (!%p196_p3), %v1080_v1 }
   0xc   : > { %994 = vmatpush3.bf16.msra.mxu0 (!%p196_p3), %v1080_v1  ;;  %1048 = vmatpush3.bf16.msra.mxu1 (!%p196_p3), %v1080_v1 }
   0xd   : > { %995 = vmatprep.subr.bf16.mxu0 (!%p196_p3), %v1081_v2  ;;  %1041 = vmatprep.subr.bf16.mxu1 (!%p196_p3), %v1081_v2 }
   0xe   : > { %s1370_s21 = smov (!%p243_p4, %s935_s21), 63  ;;  %s1372_s15 = smov (!%p261_p5, %s1117_s15), 1 }
   0xf   : > { %s936_s26 = sshll.u32 %s1370_s21, 2  ;;  %s938_s14 = sshll.u32 %s1370_s21, 3 }
  0x10   : > { %s1188_s29 = scalar_lea.vmem %s1360_s0, %s936_s26  ;;  %996 = vmatpush3.bf16.msra.mxu0 %v1081_v2  ;;  %1049 = vmatpush3.bf16.msra.mxu1 %v1081_v2  ;;  %s1225_s22 = scalar_lea.vmem %s1362_s2, %s938_s14 }
  0x11   : > { %v1087_v4 = vld [vmem:[%s1188_s29] sm:$0xff]   ;;  %997 = vmatprep.subr.bf16.mxu0 %v1082_v3  ;;  %1042 = vmatprep.subr.bf16.mxu1 %v1082_v3  ;;  %v1088_v10 = vld [vmem:[%s1188_s29 + $0x8] sm:$0xff]   ;;  %v1089_v12 = vld [vmem:[%s1188_s29 + $0x10] sm:$0xff]   ;;  %s939_s21 = sshll.u32 %s1372_s15, 3 }
  0x12   : > { %1007 = vmatprep.mubr.bf16.mxu0 %v1087_v4  ;;  %v1095_v7 = vld [vmem:[%s1188_s29 + $0x40] sm:$0xff]   ;;  %v1096_v11 = vld [vmem:[%s1188_s29 + $0x48] sm:$0xff]   ;;  %v1097_v13 = vld [vmem:[%s1188_s29 + $0x50] sm:$0xff]   ;;  %s267_s25 = scalar_lea.vmem %s1363_s3, %s939_s21  ;;  %s274_s27 = scalar_lea.vmem %s1364_s4, %s939_s21 }
  0x13   : > { %1023 = vmatprep.mubr.bf16.mxu1 %v1095_v7  ;;  %v1090_v14 = vld [vmem:[%s1188_s29 + $0x18] sm:$0xff]   ;;  %v1091_v16 = vld [vmem:[%s1188_s29 + $0x20] sm:$0xff]   ;;  %v1092_v18 = vld [vmem:[%s1188_s29 + $0x28] sm:$0xff]  }
  0x14   : > { %998 = vmatpush3.bf16.msra.mxu0 %v1082_v3  ;;  %1050 = vmatpush3.bf16.msra.mxu1 %v1082_v3  ;;  %v1098_v15 = vld [vmem:[%s1188_s29 + $0x58] sm:$0xff]   ;;  %v1099_v17 = vld [vmem:[%s1188_s29 + $0x60] sm:$0xff]   ;;  %v1100_v19 = vld [vmem:[%s1188_s29 + $0x68] sm:$0xff]  }
  0x15   : > { %999 = vmatprep.subr.bf16.mxu0 %v1083_v5  ;;  %1043 = vmatprep.subr.bf16.mxu1 %v1083_v5  ;;  %v1093_v20 = vld [vmem:[%s1188_s29 + $0x30] sm:$0xff]   ;;  %v1094_v22 = vld [vmem:[%s1188_s29 + $0x38] sm:$0xff]  }
  0x16   : > { %v1101_v21 = vld [vmem:[%s1188_s29 + $0x70] sm:$0xff]   ;;  %v1102_v23 = vld [vmem:[%s1188_s29 + $0x78] sm:$0xff]  }
  0x18   : > { %1000 = vmatpush3.bf16.msra.mxu0 %v1083_v5  ;;  %1051 = vmatpush3.bf16.msra.mxu1 %v1083_v5 }
  0x19   : > { %1001 = vmatprep.subr.bf16.mxu0 %v1084_v6  ;;  %1044 = vmatprep.subr.bf16.mxu1 %v1084_v6 }
  0x1c   : > { %1002 = vmatpush3.bf16.msra.mxu0 %v1084_v6  ;;  %1052 = vmatpush3.bf16.msra.mxu1 %v1084_v6 }
  0x1d   : > { %1003 = vmatprep.subr.bf16.mxu0 %v1085_v8  ;;  %1045 = vmatprep.subr.bf16.mxu1 %v1085_v8 }
  0x20   : > { %1004 = vmatpush3.bf16.msra.mxu0 %v1085_v8  ;;  %1053 = vmatpush3.bf16.msra.mxu1 %v1085_v8 }
  0x21   : > { %1005 = vmatprep.subr.bf16.mxu0 %v1086_v9  ;;  %1046 = vmatprep.subr.bf16.mxu1 %v1086_v9 }
  0x24   : > { %1006 = vmatpush3.bf16.msra.mxu0 %v1086_v9  ;;  %1054 = vmatpush3.bf16.msra.mxu1 %v1086_v9 }
  0x27   : > { %1008 = vmatmul.mubr.bf16.vlgmr.msra.gmra.mrb[0].mxu0 %v1088_v10  ;;  %1024 = vmatmul.mubr.bf16.vlgmr.msra.gmra.mrb[0].mxu1 %v1096_v11 }
  0x28   : > { %1011 = vmatprep.mubr.bf16.mxu0 %v1089_v12  ;;  %1027 = vmatprep.mubr.bf16.mxu1 %v1097_v13 }
  0x2f   : > { %1012 = vmatmul.mubr.bf16.gmra.mrb[4].mxu0 %v1090_v14  ;;  %1028 = vmatmul.mubr.bf16.gmra.mrb[4].mxu1 %v1098_v15 }
  0x30   : > { %1015 = vmatprep.mubr.bf16.mxu0 %v1091_v16  ;;  %1031 = vmatprep.mubr.bf16.mxu1 %v1099_v17 }
  0x37   : > { %1016 = vmatmul.mubr.bf16.gmra.mrb[8].mxu0 %v1092_v18  ;;  %1032 = vmatmul.mubr.bf16.gmra.mrb[8].mxu1 %v1100_v19 }
  0x38   : > { %1019 = vmatprep.mubr.bf16.mxu0 %v1093_v20  ;;  %1035 = vmatprep.mubr.bf16.mxu1 %v1101_v21 }
  0x3f   : > { %1020 = vmatmul.mubr.bf16.gmra.mrb[12].mxu0 %v1094_v22  ;;  %1036 = vmatmul.mubr.bf16.gmra.mrb[12].mxu1 %v1102_v23 }
  0xfa   : > { %v1009_v24 = vpop.f32.mrb[0].mxu0  ;;  %v1227_v25 = vpop.f32.mrb[0].mxu1 }
  0xfb   : > { %631 = vst [vmem:[%s1225_s22 + $0x10] sm:$0xff] %v1009_v24  ;;  %v502_v26 = vpop.f32.mrb[1].mxu0  ;;  %647 = vst [vmem:[%s1225_s22 + $0x90] sm:$0xff] %v1227_v25  ;;  %v1232_v27 = vpop.f32.mrb[1].mxu1  ;;  %v695_v35 = vmul.f32 %v1009_v24, %v1009_v24 }
  0xfc   : > { %629 = vst [vmem:[%s1225_s22] sm:$0xff] %v502_v26  ;;  %v1010_v28 = vpop.f32.mrb[2].mxu0  ;;  %645 = vst [vmem:[%s1225_s22 + $0x80] sm:$0xff] %v1232_v27  ;;  %v1237_v29 = vpop.f32.mrb[2].mxu1  ;;  %v693_v32 = vmul.f32 %v502_v26, %v502_v26 }
  0xfd   : > { %632 = vst [vmem:[%s1225_s22 + $0x18] sm:$0xff] %v1010_v28  ;;  %v505_v30 = vpop.f32.mrb[3].mxu0  ;;  %648 = vst [vmem:[%s1225_s22 + $0x98] sm:$0xff] %v1237_v29  ;;  %v1242_v31 = vpop.f32.mrb[3].mxu1  ;;  %v696_v38 = vmul.f32 %v1010_v28, %v1010_v28 }
  0xfe   : > { %630 = vst [vmem:[%s1225_s22 + $0x8] sm:$0xff] %v505_v30  ;;  %v661_v33 = vadd.f32 %v505_v30, %v502_v26  ;;  %v694_v34 = vmul.f32 %v505_v30, %v505_v30  ;;  %646 = vst [vmem:[%s1225_s22 + $0x88] sm:$0xff] %v1242_v31 }
 0x100   : > { %v662_v36 = vadd.f32 %v1009_v24, %v661_v33  ;;  %v725_v37 = vadd.f32 %v694_v34, %v693_v32 }
 0x102   : > { %v726_v39 = vadd.f32 %v725_v37, %v695_v35  ;;  %v1013_v40 = vpop.f32.mrb[4].mxu0  ;;  %v663_v41 = vadd.f32 %v1010_v28, %v662_v36  ;;  %v1247_v42 = vpop.f32.mrb[4].mxu1 }
 0x103   : > { %635 = vst [vmem:[%s1225_s22 + $0x30] sm:$0xff] %v1013_v40  ;;  %v518_v43 = vpop.f32.mrb[5].mxu0  ;;  %651 = vst [vmem:[%s1225_s22 + $0xb0] sm:$0xff] %v1247_v42  ;;  %v1252_v44 = vpop.f32.mrb[5].mxu1  ;;  %v699_v55 = vmul.f32 %v1013_v40, %v1013_v40 }
 0x104   : > { %633 = vst [vmem:[%s1225_s22 + $0x20] sm:$0xff] %v518_v43  ;;  %v664_v45 = vadd.f32 %v663_v41, %v518_v43  ;;  %v697_v46 = vmul.f32 %v518_v43, %v518_v43  ;;  %v727_v47 = vadd.f32 %v726_v39, %v696_v38  ;;  %v1014_v48 = vpop.f32.mrb[6].mxu0  ;;  %649 = vst [vmem:[%s1225_s22 + $0xa0] sm:$0xff] %v1252_v44  ;;  %v1257_v49 = vpop.f32.mrb[6].mxu1 }
 0x105   : > { %636 = vst [vmem:[%s1225_s22 + $0x38] sm:$0xff] %v1014_v48  ;;  %v521_v50 = vpop.f32.mrb[7].mxu0  ;;  %652 = vst [vmem:[%s1225_s22 + $0xb8] sm:$0xff] %v1257_v49  ;;  %v1262_v51 = vpop.f32.mrb[7].mxu1  ;;  %v700_v58 = vmul.f32 %v1014_v48, %v1014_v48  ;;  %v709_v41 = vmul.f32 %v1232_v27, %v1232_v27 }
 0x106   : > { %v728_v52 = vadd.f32 %v727_v47, %v697_v46  ;;  %634 = vst [vmem:[%s1225_s22 + $0x28] sm:$0xff] %v521_v50  ;;  %v665_v53 = vadd.f32 %v664_v45, %v521_v50  ;;  %v698_v54 = vmul.f32 %v521_v50, %v521_v50  ;;  %650 = vst [vmem:[%s1225_s22 + $0xa8] sm:$0xff] %v1262_v51 }
 0x107   : > { %v711_v50 = vmul.f32 %v1227_v25, %v1227_v25 }
 0x108   : > { %v666_v56 = vadd.f32 %v1013_v40, %v665_v53  ;;  %v729_v57 = vadd.f32 %v728_v52, %v698_v54  ;;  %v712_v54 = vmul.f32 %v1237_v29, %v1237_v29 }
 0x10a   : > { %v730_v59 = vadd.f32 %v729_v57, %v699_v55  ;;  %v1017_v60 = vpop.f32.mrb[8].mxu0  ;;  %v667_v61 = vadd.f32 %v1014_v48, %v666_v56  ;;  %v1267_v62 = vpop.f32.mrb[8].mxu1  ;;  %v710_v48 = vmul.f32 %v1242_v31, %v1242_v31 }
 0x10b   : > { %639 = vst [vmem:[%s1225_s22 + $0x50] sm:$0xff] %v1017_v60  ;;  %v534_v63 = vpop.f32.mrb[9].mxu0  ;;  %655 = vst [vmem:[%s1225_s22 + $0xd0] sm:$0xff] %v1267_v62  ;;  %v1272_v0 = vpop.f32.mrb[9].mxu1  ;;  %v703_v11 = vmul.f32 %v1017_v60, %v1017_v60 }
 0x10c   : > { %637 = vst [vmem:[%s1225_s22 + $0x40] sm:$0xff] %v534_v63  ;;  %v668_v1 = vadd.f32 %v667_v61, %v534_v63  ;;  %v701_v2 = vmul.f32 %v534_v63, %v534_v63  ;;  %v731_v3 = vadd.f32 %v730_v59, %v700_v58  ;;  %v1018_v4 = vpop.f32.mrb[10].mxu0  ;;  %653 = vst [vmem:[%s1225_s22 + $0xc0] sm:$0xff] %v1272_v0  ;;  %v1277_v5 = vpop.f32.mrb[10].mxu1 }
 0x10d   : > { %640 = vst [vmem:[%s1225_s22 + $0x58] sm:$0xff] %v1018_v4  ;;  %v537_v6 = vpop.f32.mrb[11].mxu0  ;;  %656 = vst [vmem:[%s1225_s22 + $0xd8] sm:$0xff] %v1277_v5  ;;  %v1282_v7 = vpop.f32.mrb[11].mxu1  ;;  %v704_v14 = vmul.f32 %v1018_v4, %v1018_v4 }
 0x10e   : > { %v732_v8 = vadd.f32 %v731_v3, %v701_v2  ;;  %638 = vst [vmem:[%s1225_s22 + $0x48] sm:$0xff] %v537_v6  ;;  %v669_v9 = vadd.f32 %v668_v1, %v537_v6  ;;  %v702_v10 = vmul.f32 %v537_v6, %v537_v6  ;;  %654 = vst [vmem:[%s1225_s22 + $0xc8] sm:$0xff] %v1282_v7 }
 0x10f   : > { %v717_v2 = vmul.f32 %v1272_v0, %v1272_v0 }
 0x110   : > { %v670_v12 = vadd.f32 %v1017_v60, %v669_v9  ;;  %v733_v13 = vadd.f32 %v732_v8, %v702_v10  ;;  %v715_v60 = vmul.f32 %v1247_v42, %v1247_v42  ;;  %v719_v8 = vmul.f32 %v1267_v62, %v1267_v62 }
 0x112   : > { %v734_v15 = vadd.f32 %v733_v13, %v703_v11  ;;  %v1021_v16 = vpop.f32.mrb[12].mxu0  ;;  %v671_v17 = vadd.f32 %v1018_v4, %v670_v12  ;;  %v1287_v18 = vpop.f32.mrb[12].mxu1 }
 0x113   : > { %643 = vst [vmem:[%s1225_s22 + $0x70] sm:$0xff] %v1021_v16  ;;  %v550_v19 = vpop.f32.mrb[13].mxu0  ;;  %659 = vst [vmem:[%s1225_s22 + $0xf0] sm:$0xff] %v1287_v18  ;;  %v614_v20 = vpop.f32.mrb[13].mxu1  ;;  %v707_v35 = vmul.f32 %v1021_v16, %v1021_v16 }
 0x114   : > { %641 = vst [vmem:[%s1225_s22 + $0x60] sm:$0xff] %v550_v19  ;;  %v672_v21 = vadd.f32 %v671_v17, %v550_v19  ;;  %v705_v22 = vmul.f32 %v550_v19, %v550_v19  ;;  %v735_v23 = vadd.f32 %v734_v15, %v704_v14  ;;  %v1022_v24 = vpop.f32.mrb[14].mxu0  ;;  %657 = vst [vmem:[%s1225_s22 + $0xe0] sm:$0xff] %v614_v20  ;;  %v1294_v26 = vpop.f32.mrb[14].mxu1 }
 0x115   : > { %644 = vst [vmem:[%s1225_s22 + $0x78] sm:$0xff] %v1022_v24  ;;  %v553_v28 = vpop.f32.mrb[15].mxu0  ;;  %660 = vst [vmem:[%s1225_s22 + $0xf8] sm:$0xff] %v1294_v26  ;;  %v617_v30 = vpop.f32.mrb[15].mxu1  ;;  %v708_v38 = vmul.f32 %v1022_v24, %v1022_v24  ;;  %v721_v12 = vmul.f32 %v614_v20, %v614_v20  ;;  %v723_v17 = vmul.f32 %v1287_v18, %v1287_v18 }
 0x116   : > { %v736_v32 = vadd.f32 %v735_v23, %v705_v22  ;;  %642 = vst [vmem:[%s1225_s22 + $0x68] sm:$0xff] %v553_v28  ;;  %v673_v33 = vadd.f32 %v672_v21, %v553_v28  ;;  %v706_v34 = vmul.f32 %v553_v28, %v553_v28  ;;  %658 = vst [vmem:[%s1225_s22 + $0xe8] sm:$0xff] %v617_v30 }
 0x118   : > { %v674_v36 = vadd.f32 %v1021_v16, %v673_v33  ;;  %v737_v37 = vadd.f32 %v736_v32, %v706_v34  ;;  %v722_v16 = vmul.f32 %v617_v30, %v617_v30 }
 0x11a   : > { %v738_v39 = vadd.f32 %v737_v37, %v707_v35  ;;  %v675_v40 = vadd.f32 %v1022_v24, %v674_v36 }
 0x11c   : > { %v676_v43 = vadd.f32 %v675_v40, %v1232_v27  ;;  %v739_v45 = vadd.f32 %v738_v39, %v708_v38  ;;  %v713_v27 = vmul.f32 %v1252_v44, %v1252_v44 }
 0x11e   : > { %v740_v46 = vadd.f32 %v739_v45, %v709_v41  ;;  %v677_v47 = vadd.f32 %v676_v43, %v1242_v31 }
 0x120   : > { %v678_v52 = vadd.f32 %v1227_v25, %v677_v47  ;;  %v741_v53 = vadd.f32 %v740_v46, %v710_v48  ;;  %v714_v25 = vmul.f32 %v1262_v51, %v1262_v51 }
 0x122   : > { %v742_v55 = vadd.f32 %v741_v53, %v711_v50  ;;  %v679_v56 = vadd.f32 %v1237_v29, %v678_v52  ;;  %v716_v29 = vmul.f32 %v1257_v49, %v1257_v49 }
 0x124   : > { %v680_v57 = vadd.f32 %v679_v56, %v1252_v44  ;;  %v743_v58 = vadd.f32 %v742_v55, %v712_v54 }
 0x126   : > { %v744_v31 = vadd.f32 %v743_v58, %v713_v27  ;;  %v681_v59 = vadd.f32 %v680_v57, %v1262_v51 }
 0x128   : > { %v682_v61 = vadd.f32 %v1247_v42, %v681_v59  ;;  %v745_v63 = vadd.f32 %v744_v31, %v714_v25  ;;  %v718_v42 = vmul.f32 %v1282_v7, %v1282_v7 }
 0x12a   : > { %v746_v1 = vadd.f32 %v745_v63, %v715_v60  ;;  %v683_v44 = vadd.f32 %v1257_v49, %v682_v61  ;;  %v720_v49 = vmul.f32 %v1277_v5, %v1277_v5 }
 0x12c   : > { %v684_v3 = vadd.f32 %v683_v44, %v1272_v0  ;;  %v747_v4 = vadd.f32 %v746_v1, %v716_v29 }
 0x12e   : > { %v748_v51 = vadd.f32 %v747_v4, %v717_v2  ;;  %v685_v6 = vadd.f32 %v684_v3, %v1282_v7 }
 0x130   : > { %v686_v9 = vadd.f32 %v1267_v62, %v685_v6  ;;  %v749_v10 = vadd.f32 %v748_v51, %v718_v42 }
 0x132   : > { %v750_v11 = vadd.f32 %v749_v10, %v719_v8  ;;  %v687_v0 = vadd.f32 %v1277_v5, %v686_v9  ;;  %v724_v5 = vmul.f32 %v1294_v26, %v1294_v26 }
 0x134   : > { %v688_v13 = vadd.f32 %v687_v0, %v614_v20  ;;  %v751_v14 = vadd.f32 %v750_v11, %v720_v49 }
 0x136   : > { %v752_v15 = vadd.f32 %v751_v14, %v721_v12  ;;  %v689_v7 = vadd.f32 %v688_v13, %v617_v30 }
 0x138   : > { %v690_v62 = vadd.f32 %v1287_v18, %v689_v7  ;;  %v753_v19 = vadd.f32 %v752_v15, %v722_v16 }
 0x13a   : > { %v691_v20 = vadd.f32 %v1294_v26, %v690_v62  ;;  %v754_v21 = vadd.f32 %v753_v19, %v723_v17 }
 0x13c   : > { %692 = vst [vmem:[%s267_s25] sm:$0xff] %v691_v20  ;;  %v755_v22 = vadd.f32 %v754_v21, %v724_v5 }
 0x13e   : > { %756 = vst [vmem:[%s274_s27] sm:$0xff] %v755_v22 }
 0x13f PF: > { %s15_s17 = sadd.s32 1, %s1125_s17   ;;  %s1365_s15 = smov %s1121_s16 }
 0x140   : > { %p12_p6 = scmp.ge.s32.totalorder %s15_s17, 4   ;;  %s1366_s16 = smov %s1368_s18 }
 0x142   :  { %14 = sbr.rel (!%p12_p6) target bundleno = 2 (0x2), region = 85 }

// kernel: bottleneckcsp_forward.13
= control target key start
LH: loop header
LB: loop body
LE: loop exit
PB: predicated region body
PF: predicated region fallthrough
CT: control target
= control target key end

     0   :  { %s1630_s0 = inlined_call_operand.vmem [shape: f32[512,128], index: 0, kind: input, shape index: {}]   ;;  %s1631_s1 = inlined_call_operand.vmem [shape: f32[1,128], index: 1, kind: input, shape index: {}]   ;;  %s1632_s2 = inlined_call_operand.vmem [shape: f32[1,128], index: 2, kind: input, shape index: {}]   ;;  %s1633_s3 = inlined_call_operand.vmem [shape: bf16[512,128], index: 3, kind: output, shape index: {}]  }
   0x1   :  { %v14_v0 = vld [vmem:[%s1630_s0] sm:$0xff]  ;;  %v15_v1 = vld [vmem:[%s1630_s0 + $0x8] sm:$0xff]  ;;  %v16_v6 = vld [vmem:[%s1630_s0 + $0x10] sm:$0xff] }
   0x2   :  { %v1216_v2 = vld [vmem:[%s1631_s1] ss:$0 sm:$0xff]  ;;  %v17_v7 = vld [vmem:[%s1630_s0 + $0x18] sm:$0xff]  ;;  %v19_v11 = vld [vmem:[%s1630_s0 + $0x28] sm:$0xff] }
   0x3   :  { %v85_v3 = vmul.f32 %v1216_v2, %v14_v0  ;;  %v86_v4 = vmul.f32 %v1216_v2, %v15_v1  ;;  %v1223_v5 = vld [vmem:[%s1632_s2] ss:$0 sm:$0xff]  ;;  %v87_v8 = vmul.f32 %v1216_v2, %v16_v6  ;;  %v88_v9 = vmul.f32 %v1216_v2, %v17_v7  ;;  %v20_v12 = vld [vmem:[%s1630_s0 + $0x30] sm:$0xff]  ;;  %v21_v17 = vld [vmem:[%s1630_s0 + $0x38] sm:$0xff] }
   0x4   :  { %v18_v10 = vld [vmem:[%s1630_s0 + $0x20] sm:$0xff]  ;;  %v90_v16 = vmul.f32 %v1216_v2, %v19_v11  ;;  %v91_v20 = vmul.f32 %v1216_v2, %v20_v12  ;;  %v92_v21 = vmul.f32 %v1216_v2, %v21_v17  ;;  %v23_v59 = vld [vmem:[%s1630_s0 + $0x48] sm:$0xff]  ;;  %v24_v0 = vld [vmem:[%s1630_s0 + $0x50] sm:$0xff] }
   0x5   :  { %v156_v13 = vadd.f32 %v1223_v5, %v85_v3  ;;  %v157_v14 = vadd.f32 %v1223_v5, %v86_v4  ;;  %v89_v15 = vmul.f32 %v1216_v2, %v18_v10  ;;  %v158_v18 = vadd.f32 %v1223_v5, %v87_v8  ;;  %v22_v54 = vld [vmem:[%s1630_s0 + $0x40] sm:$0xff]  ;;  %v25_v1 = vld [vmem:[%s1630_s0 + $0x58] sm:$0xff] }
   0x6   :  { %v159_v19 = vadd.f32 %v1223_v5, %v88_v9  ;;  %v161_v25 = vadd.f32 %v1223_v5, %v90_v16  ;;  %v162_v28 = vadd.f32 %v1223_v5, %v91_v20  ;;  %v163_v29 = vadd.f32 %v1223_v5, %v92_v21  ;;  %v26_v8 = vld [vmem:[%s1630_s0 + $0x60] sm:$0xff]  ;;  %v27_v9 = vld [vmem:[%s1630_s0 + $0x68] sm:$0xff] }
   0x7   :  { %v220_v22 = vadd.f32 3.0, %v156_v13  ;;  %v221_v23 = vadd.f32 3.0, %v157_v14  ;;  %v160_v24 = vadd.f32 %v1223_v5, %v89_v15  ;;  %v222_v26 = vadd.f32 3.0, %v158_v18 }
   0x8   :  { %v223_v27 = vadd.f32 3.0, %v159_v19  ;;  %v225_v33 = vadd.f32 3.0, %v161_v25  ;;  %v226_v36 = vadd.f32 3.0, %v162_v28  ;;  %v227_v37 = vadd.f32 3.0, %v163_v29 }
   0x9   :  { %v284_v30 = vmax.f32 %v220_v22, 0.0  ;;  %v285_v31 = vmax.f32 %v221_v23, 0.0  ;;  %v224_v32 = vadd.f32 3.0, %v160_v24  ;;  %v286_v34 = vmax.f32 %v222_v26, 0.0 }
   0xa   :  { %v287_v35 = vmax.f32 %v223_v27, 0.0  ;;  %v289_v41 = vmax.f32 %v225_v33, 0.0  ;;  %v290_v44 = vmax.f32 %v226_v36, 0.0  ;;  %v291_v45 = vmax.f32 %v227_v37, 0.0 }
   0xb   :  { %v348_v38 = vmin.f32 %v284_v30, 6.0  ;;  %v349_v39 = vmin.f32 %v285_v31, 6.0  ;;  %v288_v40 = vmax.f32 %v224_v32, 0.0  ;;  %v350_v42 = vmin.f32 %v286_v34, 6.0 }
   0xc   :  { %v351_v43 = vmin.f32 %v287_v35, 6.0  ;;  %v353_v49 = vmin.f32 %v289_v41, 6.0  ;;  %v354_v52 = vmin.f32 %v290_v44, 6.0  ;;  %v355_v53 = vmin.f32 %v291_v45, 6.0 }
   0xd   :  { %v412_v46 = vmul.f32 %v348_v38, %v156_v13  ;;  %v413_v47 = vmul.f32 %v349_v39, %v157_v14  ;;  %v352_v48 = vmin.f32 %v288_v40, 6.0  ;;  %v414_v50 = vmul.f32 %v350_v42, %v158_v18  ;;  %v28_v14 = vld [vmem:[%s1630_s0 + $0x70] sm:$0xff] }
   0xe   :  { %v415_v51 = vmul.f32 %v351_v43, %v159_v19  ;;  %v417_v58 = vmul.f32 %v353_v49, %v161_v25  ;;  %v418_v62 = vmul.f32 %v354_v52, %v162_v28  ;;  %v419_v63 = vmul.f32 %v355_v53, %v163_v29  ;;  %v29_v19 = vld [vmem:[%s1630_s0 + $0x78] sm:$0xff] }
   0xf   :  { %v476_v55 = vmul.f32 0.16666667, %v412_v46  ;;  %v477_v56 = vmul.f32 0.16666667, %v413_v47  ;;  %v416_v57 = vmul.f32 %v352_v48, %v160_v24  ;;  %v478_v60 = vmul.f32 0.16666667, %v414_v50 }
  0x10   :  { %v479_v61 = vmul.f32 0.16666667, %v415_v51  ;;  %v481_v6 = vmul.f32 0.16666667, %v417_v58  ;;  %v93_v7 = vmul.f32 %v1216_v2, %v22_v54  ;;  %v482_v11 = vmul.f32 0.16666667, %v418_v62 }
  0x11   :  { %v997_v3 = vpack.c.bf16 %v477_v56, %v476_v55  ;;  %v480_v4 = vmul.f32 0.16666667, %v416_v57  ;;  %v483_v12 = vmul.f32 0.16666667, %v419_v63  ;;  %v94_v13 = vmul.f32 %v1216_v2, %v23_v59  ;;  %v30_v56 = vld [vmem:[%s1630_s0 + $0x80] sm:$0xff] }
  0x12   :  { %v1002_v10 = vpack.c.bf16 %v479_v61, %v478_v60  ;;  %v164_v16 = vadd.f32 %v1223_v5, %v93_v7  ;;  %v95_v17 = vmul.f32 %v1216_v2, %v24_v0  ;;  %v96_v18 = vmul.f32 %v1216_v2, %v25_v1  ;;  %v31_v1 = vld [vmem:[%s1630_s0 + $0x88] sm:$0xff] }
  0x13   :  { %998 = vst [vmem:[%s1633_s3] sm:$0xff] %v997_v3   ;;  %v1007_v15 = vpack.c.bf16 %v481_v6, %v480_v4  ;;  %v1012_v20 = vpack.c.bf16 %v483_v12, %v482_v11  ;;  %v165_v21 = vadd.f32 %v1223_v5, %v94_v13  ;;  %v97_v22 = vmul.f32 %v1216_v2, %v26_v8  ;;  %v32_v8 = vld [vmem:[%s1630_s0 + $0x90] sm:$0xff] }
  0x14   :  { %1154 = vst [vmem:[%s1633_s3 + $0x8] sm:$0xff] %v1002_v10   ;;  %v98_v23 = vmul.f32 %v1216_v2, %v27_v9  ;;  %v228_v24 = vadd.f32 3.0, %v164_v16  ;;  %v166_v25 = vadd.f32 %v1223_v5, %v95_v17  ;;  %v167_v26 = vadd.f32 %v1223_v5, %v96_v18  ;;  %v33_v9 = vld [vmem:[%s1630_s0 + $0x98] sm:$0xff] }
  0x15   :  { %1155 = vst [vmem:[%s1633_s3 + $0x10] sm:$0xff] %v1007_v15   ;;  %v99_v27 = vmul.f32 %v1216_v2, %v28_v14  ;;  %1156 = vst [vmem:[%s1633_s3 + $0x18] sm:$0xff] %v1012_v20   ;;  %v229_v28 = vadd.f32 3.0, %v165_v21  ;;  %v168_v29 = vadd.f32 %v1223_v5, %v97_v22  ;;  %v100_v31 = vmul.f32 %v1216_v2, %v29_v19  ;;  %v34_v14 = vld [vmem:[%s1630_s0 + $0xa0] sm:$0xff]  ;;  %v35_v15 = vld [vmem:[%s1630_s0 + $0xa8] sm:$0xff] }
  0x16   :  { %v169_v30 = vadd.f32 %v1223_v5, %v98_v23  ;;  %v292_v32 = vmax.f32 %v228_v24, 0.0  ;;  %v230_v33 = vadd.f32 3.0, %v166_v25  ;;  %v231_v34 = vadd.f32 3.0, %v167_v26  ;;  %v36_v20 = vld [vmem:[%s1630_s0 + $0xb0] sm:$0xff] }
  0x17   :  { %v170_v35 = vadd.f32 %v1223_v5, %v99_v27  ;;  %v293_v36 = vmax.f32 %v229_v28, 0.0  ;;  %v232_v37 = vadd.f32 3.0, %v168_v29  ;;  %v171_v39 = vadd.f32 %v1223_v5, %v100_v31 }
  0x18   :  { %v233_v38 = vadd.f32 3.0, %v169_v30  ;;  %v356_v40 = vmin.f32 %v292_v32, 6.0  ;;  %v294_v41 = vmax.f32 %v230_v33, 0.0  ;;  %v295_v42 = vmax.f32 %v231_v34, 0.0 }
  0x19   :  { %v234_v43 = vadd.f32 3.0, %v170_v35  ;;  %v357_v44 = vmin.f32 %v293_v36, 6.0  ;;  %v296_v45 = vmax.f32 %v232_v37, 0.0  ;;  %v235_v47 = vadd.f32 3.0, %v171_v39 }
  0x1a   :  { %v297_v46 = vmax.f32 %v233_v38, 0.0  ;;  %v420_v48 = vmul.f32 %v356_v40, %v164_v16  ;;  %v358_v49 = vmin.f32 %v294_v41, 6.0  ;;  %v359_v50 = vmin.f32 %v295_v42, 6.0 }
  0x1b   :  { %v298_v51 = vmax.f32 %v234_v43, 0.0  ;;  %v421_v52 = vmul.f32 %v357_v44, %v165_v21  ;;  %v360_v53 = vmin.f32 %v296_v45, 6.0  ;;  %v299_v55 = vmax.f32 %v235_v47, 0.0 }
  0x1c   :  { %v361_v54 = vmin.f32 %v297_v46, 6.0  ;;  %v484_v57 = vmul.f32 0.16666667, %v420_v48  ;;  %v422_v58 = vmul.f32 %v358_v49, %v166_v25  ;;  %v423_v59 = vmul.f32 %v359_v50, %v167_v26 }
  0x1d   :  { %v362_v60 = vmin.f32 %v298_v51, 6.0  ;;  %v485_v61 = vmul.f32 0.16666667, %v421_v52  ;;  %v424_v62 = vmul.f32 %v360_v53, %v168_v29  ;;  %v363_v0 = vmin.f32 %v299_v55, 6.0  ;;  %v37_v29 = vld [vmem:[%s1630_s0 + $0xb8] sm:$0xff] }
  0x1e   :  { %v425_v63 = vmul.f32 %v361_v54, %v169_v30  ;;  %v486_v3 = vmul.f32 0.16666667, %v422_v58  ;;  %v487_v4 = vmul.f32 0.16666667, %v423_v59  ;;  %v101_v7 = vmul.f32 %v1216_v2, %v30_v56  ;;  %v38_v58 = vld [vmem:[%s1630_s0 + $0xc0] sm:$0xff] }
  0x1f   :  { %v426_v6 = vmul.f32 %v362_v60, %v170_v35  ;;  %v1017_v10 = vpack.c.bf16 %v485_v61, %v484_v57  ;;  %v488_v11 = vmul.f32 0.16666667, %v424_v62  ;;  %v427_v13 = vmul.f32 %v363_v0, %v171_v39 }
  0x20   :  { %v489_v12 = vmul.f32 0.16666667, %v425_v63  ;;  %v1022_v16 = vpack.c.bf16 %v487_v4, %v486_v3  ;;  %v102_v18 = vmul.f32 %v1216_v2, %v31_v1  ;;  %v172_v19 = vadd.f32 %v1223_v5, %v101_v7  ;;  %v39_v4 = vld [vmem:[%s1630_s0 + $0xc8] sm:$0xff] }
  0x21   :  { %v490_v17 = vmul.f32 0.16666667, %v426_v6  ;;  %1157 = vst [vmem:[%s1633_s3 + $0x20] sm:$0xff] %v1017_v10   ;;  %v491_v22 = vmul.f32 0.16666667, %v427_v13  ;;  %v103_v23 = vmul.f32 %v1216_v2, %v32_v8  ;;  %v104_v24 = vmul.f32 %v1216_v2, %v33_v9  ;;  %v40_v10 = vld [vmem:[%s1630_s0 + $0xd0] sm:$0xff] }
  0x22   :  { %v1027_v21 = vpack.c.bf16 %v489_v12, %v488_v11  ;;  %1158 = vst [vmem:[%s1633_s3 + $0x28] sm:$0xff] %v1022_v16   ;;  %v173_v25 = vadd.f32 %v1223_v5, %v102_v18  ;;  %v236_v26 = vadd.f32 3.0, %v172_v19  ;;  %v105_v27 = vmul.f32 %v1216_v2, %v34_v14 }
  0x23   :  { %v106_v28 = vmul.f32 %v1216_v2, %v35_v15  ;;  %v1032_v30 = vpack.c.bf16 %v491_v22, %v490_v17  ;;  %v174_v31 = vadd.f32 %v1223_v5, %v103_v23  ;;  %v175_v32 = vadd.f32 %v1223_v5, %v104_v24  ;;  %v41_v15 = vld [vmem:[%s1630_s0 + $0xd8] sm:$0xff] }
  0x24   :  { %1159 = vst [vmem:[%s1633_s3 + $0x30] sm:$0xff] %v1027_v21   ;;  %v107_v33 = vmul.f32 %v1216_v2, %v36_v20  ;;  %v237_v34 = vadd.f32 3.0, %v173_v25  ;;  %v300_v35 = vmax.f32 %v236_v26, 0.0  ;;  %v176_v36 = vadd.f32 %v1223_v5, %v105_v27  ;;  %v42_v20 = vld [vmem:[%s1630_s0 + $0xe0] sm:$0xff]  ;;  %v43_v21 = vld [vmem:[%s1630_s0 + $0xe8] sm:$0xff]  ;;  %v44_v26 = vld [vmem:[%s1630_s0 + $0xf0] sm:$0xff] }
  0x25   :  { %v177_v37 = vadd.f32 %v1223_v5, %v106_v28  ;;  %1160 = vst [vmem:[%s1633_s3 + $0x38] sm:$0xff] %v1032_v30   ;;  %v238_v38 = vadd.f32 3.0, %v174_v31  ;;  %v239_v39 = vadd.f32 3.0, %v175_v32  ;;  %v108_v40 = vmul.f32 %v1216_v2, %v37_v29 }
  0x26   :  { %v178_v41 = vadd.f32 %v1223_v5, %v107_v33  ;;  %v301_v42 = vmax.f32 %v237_v34, 0.0  ;;  %v364_v43 = vmin.f32 %v300_v35, 6.0  ;;  %v240_v44 = vadd.f32 3.0, %v176_v36  ;;  %v45_v35 = vld [vmem:[%s1630_s0 + $0xf8] sm:$0xff] }
  0x27   :  { %v241_v45 = vadd.f32 3.0, %v177_v37  ;;  %v302_v46 = vmax.f32 %v238_v38, 0.0  ;;  %v303_v47 = vmax.f32 %v239_v39, 0.0  ;;  %v179_v48 = vadd.f32 %v1223_v5, %v108_v40 }
  0x28   :  { %v242_v49 = vadd.f32 3.0, %v178_v41  ;;  %v365_v50 = vmin.f32 %v301_v42, 6.0  ;;  %v428_v51 = vmul.f32 %v364_v43, %v172_v19  ;;  %v304_v52 = vmax.f32 %v240_v44, 0.0 }
  0x29   :  { %v305_v53 = vmax.f32 %v241_v45, 0.0  ;;  %v366_v54 = vmin.f32 %v302_v46, 6.0  ;;  %v367_v55 = vmin.f32 %v303_v47, 6.0  ;;  %v243_v56 = vadd.f32 3.0, %v179_v48 }
  0x2a   :  { %v306_v57 = vmax.f32 %v242_v49, 0.0  ;;  %v429_v59 = vmul.f32 %v365_v50, %v173_v25  ;;  %v492_v60 = vmul.f32 0.16666667, %v428_v51  ;;  %v368_v61 = vmin.f32 %v304_v52, 6.0 }
  0x2b   :  { %v369_v62 = vmin.f32 %v305_v53, 6.0  ;;  %v430_v63 = vmul.f32 %v366_v54, %v174_v31  ;;  %v431_v0 = vmul.f32 %v367_v55, %v175_v32  ;;  %v307_v1 = vmax.f32 %v243_v56, 0.0 }
  0x2c   :  { %v370_v3 = vmin.f32 %v306_v57, 6.0  ;;  %v493_v6 = vmul.f32 0.16666667, %v429_v59  ;;  %v432_v7 = vmul.f32 %v368_v61, %v176_v36  ;;  %v109_v9 = vmul.f32 %v1216_v2, %v38_v58 }
  0x2d   :  { %v433_v8 = vmul.f32 %v369_v62, %v177_v37  ;;  %v494_v11 = vmul.f32 0.16666667, %v430_v63  ;;  %v495_v12 = vmul.f32 0.16666667, %v431_v0  ;;  %v371_v13 = vmin.f32 %v307_v1, 6.0  ;;  %v46_v0 = vld [vmem:[%s1630_s0 + $0x100] sm:$0xff] }
  0x2e   :  { %v434_v14 = vmul.f32 %v370_v3, %v178_v41  ;;  %v1037_v16 = vpack.c.bf16 %v493_v6, %v492_v60  ;;  %v496_v17 = vmul.f32 0.16666667, %v432_v7  ;;  %v110_v19 = vmul.f32 %v1216_v2, %v39_v4 }
  0x2f   :  { %v497_v18 = vmul.f32 0.16666667, %v433_v8  ;;  %v1042_v22 = vpack.c.bf16 %v495_v12, %v494_v11  ;;  %v435_v23 = vmul.f32 %v371_v13, %v179_v48  ;;  %v180_v25 = vadd.f32 %v1223_v5, %v109_v9  ;;  %v47_v11 = vld [vmem:[%s1630_s0 + $0x108] sm:$0xff] }
  0x30   :  { %v498_v24 = vmul.f32 0.16666667, %v434_v14  ;;  %1161 = vst [vmem:[%s1633_s3 + $0x40] sm:$0xff] %v1037_v16   ;;  %v181_v28 = vadd.f32 %v1223_v5, %v110_v19  ;;  %v111_v29 = vmul.f32 %v1216_v2, %v40_v10  ;;  %v112_v30 = vmul.f32 %v1216_v2, %v41_v15  ;;  %v48_v16 = vld [vmem:[%s1630_s0 + $0x110] sm:$0xff] }
  0x31   :  { %v1047_v27 = vpack.c.bf16 %v497_v18, %v496_v17  ;;  %1162 = vst [vmem:[%s1633_s3 + $0x48] sm:$0xff] %v1042_v22   ;;  %v499_v31 = vmul.f32 0.16666667, %v435_v23  ;;  %v244_v32 = vadd.f32 3.0, %v180_v25  ;;  %v113_v33 = vmul.f32 %v1216_v2, %v42_v20 }
  0x32   :  { %v114_v34 = vmul.f32 %v1216_v2, %v43_v21  ;;  %v245_v36 = vadd.f32 3.0, %v181_v28  ;;  %v182_v37 = vadd.f32 %v1223_v5, %v111_v29  ;;  %v183_v38 = vadd.f32 %v1223_v5, %v112_v30  ;;  %v49_v21 = vld [vmem:[%s1630_s0 + $0x118] sm:$0xff] }
  0x33   :  { %1163 = vst [vmem:[%s1633_s3 + $0x50] sm:$0xff] %v1047_v27   ;;  %v115_v39 = vmul.f32 %v1216_v2, %v44_v26  ;;  %v1052_v40 = vpack.c.bf16 %v499_v31, %v498_v24  ;;  %v308_v41 = vmax.f32 %v244_v32, 0.0  ;;  %v184_v42 = vadd.f32 %v1223_v5, %v113_v33  ;;  %v50_v26 = vld [vmem:[%s1630_s0 + $0x120] sm:$0xff]  ;;  %v51_v31 = vld [vmem:[%s1630_s0 + $0x128] sm:$0xff]  ;;  %v52_v32 = vld [vmem:[%s1630_s0 + $0x130] sm:$0xff] }
  0x34   :  { %v185_v43 = vadd.f32 %v1223_v5, %v114_v34  ;;  %v309_v44 = vmax.f32 %v245_v36, 0.0  ;;  %v246_v45 = vadd.f32 3.0, %v182_v37  ;;  %v247_v46 = vadd.f32 3.0, %v183_v38 }
  0x35   :  { %v116_v47 = vmul.f32 %v1216_v2, %v45_v35  ;;  %1164 = vst [vmem:[%s1633_s3 + $0x58] sm:$0xff] %v1052_v40   ;;  %v372_v48 = vmin.f32 %v308_v41, 6.0  ;;  %v248_v49 = vadd.f32 3.0, %v184_v42  ;;  %v186_v51 = vadd.f32 %v1223_v5, %v115_v39  ;;  %v53_v41 = vld [vmem:[%s1630_s0 + $0x138] sm:$0xff] }
  0x36   :  { %v249_v50 = vadd.f32 3.0, %v185_v43  ;;  %v373_v52 = vmin.f32 %v309_v44, 6.0  ;;  %v310_v53 = vmax.f32 %v246_v45, 0.0  ;;  %v311_v54 = vmax.f32 %v247_v46, 0.0 }
  0x37   :  { %v187_v55 = vadd.f32 %v1223_v5, %v116_v47  ;;  %v436_v56 = vmul.f32 %v372_v48, %v180_v25  ;;  %v312_v57 = vmax.f32 %v248_v49, 0.0  ;;  %v250_v59 = vadd.f32 3.0, %v186_v51 }
  0x38   :  { %v313_v58 = vmax.f32 %v249_v50, 0.0  ;;  %v437_v60 = vmul.f32 %v373_v52, %v181_v28  ;;  %v374_v61 = vmin.f32 %v310_v53, 6.0  ;;  %v375_v62 = vmin.f32 %v311_v54, 6.0 }
  0x39   :  { %v251_v63 = vadd.f32 3.0, %v187_v55  ;;  %v500_v1 = vmul.f32 0.16666667, %v436_v56  ;;  %v376_v3 = vmin.f32 %v312_v57, 6.0  ;;  %v314_v6 = vmax.f32 %v250_v59, 0.0 }
  0x3a   :  { %v377_v4 = vmin.f32 %v313_v58, 6.0  ;;  %v501_v7 = vmul.f32 0.16666667, %v437_v60  ;;  %v438_v8 = vmul.f32 %v374_v61, %v182_v37  ;;  %v439_v9 = vmul.f32 %v375_v62, %v183_v38 }
  0x3b   :  { %v315_v10 = vmax.f32 %v251_v63, 0.0  ;;  %v440_v12 = vmul.f32 %v376_v3, %v184_v42  ;;  %v378_v14 = vmin.f32 %v314_v6, 6.0  ;;  %v117_v15 = vmul.f32 %v1216_v2, %v46_v0 }
  0x3c   :  { %v441_v13 = vmul.f32 %v377_v4, %v185_v43  ;;  %v1057_v17 = vpack.c.bf16 %v501_v7, %v500_v1  ;;  %v502_v18 = vmul.f32 0.16666667, %v438_v8  ;;  %v503_v19 = vmul.f32 0.16666667, %v439_v9  ;;  %v54_v8 = vld [vmem:[%s1630_s0 + $0x140] sm:$0xff] }
  0x3d   :  { %v379_v20 = vmin.f32 %v315_v10, 6.0  ;;  %v504_v22 = vmul.f32 0.16666667, %v440_v12  ;;  %v442_v24 = vmul.f32 %v378_v14, %v186_v51  ;;  %v118_v25 = vmul.f32 %v1216_v2, %v47_v11 }
  0x3e   :  { %v505_v23 = vmul.f32 0.16666667, %v441_v13  ;;  %1165 = vst [vmem:[%s1633_s3 + $0x60] sm:$0xff] %v1057_v17   ;;  %v1062_v27 = vpack.c.bf16 %v503_v19, %v502_v18  ;;  %v188_v29 = vadd.f32 %v1223_v5, %v117_v15  ;;  %v119_v30 = vmul.f32 %v1216_v2, %v48_v16  ;;  %v55_v17 = vld [vmem:[%s1630_s0 + $0x148] sm:$0xff] }
  0x3f   :  { %v443_v28 = vmul.f32 %v379_v20, %v187_v55  ;;  %v506_v34 = vmul.f32 0.16666667, %v442_v24  ;;  %v189_v35 = vadd.f32 %v1223_v5, %v118_v25  ;;  %v120_v36 = vmul.f32 %v1216_v2, %v49_v21 }
  0x40   :  { %v1067_v33 = vpack.c.bf16 %v505_v23, %v504_v22  ;;  %1166 = vst [vmem:[%s1633_s3 + $0x68] sm:$0xff] %v1062_v27   ;;  %v252_v38 = vadd.f32 3.0, %v188_v29  ;;  %v190_v39 = vadd.f32 %v1223_v5, %v119_v30  ;;  %v121_v40 = vmul.f32 %v1216_v2, %v50_v26  ;;  %v56_v22 = vld [vmem:[%s1630_s0 + $0x150] sm:$0xff]  ;;  %v57_v27 = vld [vmem:[%s1630_s0 + $0x158] sm:$0xff] }
  0x41   :  { %v507_v37 = vmul.f32 0.16666667, %v443_v28  ;;  %v253_v42 = vadd.f32 3.0, %v189_v35  ;;  %v191_v43 = vadd.f32 %v1223_v5, %v120_v36  ;;  %v122_v44 = vmul.f32 %v1216_v2, %v51_v31 }
  0x42   :  { %1167 = vst [vmem:[%s1633_s3 + $0x70] sm:$0xff] %v1067_v33   ;;  %v123_v45 = vmul.f32 %v1216_v2, %v52_v32  ;;  %v316_v47 = vmax.f32 %v252_v38, 0.0  ;;  %v254_v48 = vadd.f32 3.0, %v190_v39  ;;  %v192_v49 = vadd.f32 %v1223_v5, %v121_v40  ;;  %v58_v32 = vld [vmem:[%s1630_s0 + $0x160] sm:$0xff] }
  0x43   :  { %v1072_v46 = vpack.c.bf16 %v507_v37, %v506_v34  ;;  %v317_v50 = vmax.f32 %v253_v42, 0.0  ;;  %v255_v51 = vadd.f32 3.0, %v191_v43  ;;  %v193_v52 = vadd.f32 %v1223_v5, %v122_v44  ;;  %v59_v37 = vld [vmem:[%s1630_s0 + $0x168] sm:$0xff]  ;;  %v60_v42 = vld [vmem:[%s1630_s0 + $0x170] sm:$0xff] }
  0x44   :  { %v124_v53 = vmul.f32 %v1216_v2, %v53_v41  ;;  %v380_v54 = vmin.f32 %v316_v47, 6.0  ;;  %v318_v55 = vmax.f32 %v254_v48, 0.0  ;;  %v256_v56 = vadd.f32 3.0, %v192_v49 }
  0x45   :  { %1168 = vst [vmem:[%s1633_s3 + $0x78] sm:$0xff] %v1072_v46   ;;  %v194_v57 = vadd.f32 %v1223_v5, %v123_v45  ;;  %v381_v58 = vmin.f32 %v317_v50, 6.0  ;;  %v319_v59 = vmax.f32 %v255_v51, 0.0  ;;  %v257_v60 = vadd.f32 3.0, %v193_v52  ;;  %v61_v51 = vld [vmem:[%s1630_s0 + $0x178] sm:$0xff] }
  0x46   :  { %v195_v61 = vadd.f32 %v1223_v5, %v124_v53  ;;  %v444_v62 = vmul.f32 %v380_v54, %v188_v29  ;;  %v382_v63 = vmin.f32 %v318_v55, 6.0  ;;  %v320_v0 = vmax.f32 %v256_v56, 0.0 }
  0x47   :  { %v258_v1 = vadd.f32 3.0, %v194_v57  ;;  %v445_v3 = vmul.f32 %v381_v58, %v189_v35  ;;  %v383_v4 = vmin.f32 %v319_v59, 6.0  ;;  %v321_v6 = vmax.f32 %v257_v60, 0.0 }
  0x48   :  { %v259_v7 = vadd.f32 3.0, %v195_v61  ;;  %v508_v9 = vmul.f32 0.16666667, %v444_v62  ;;  %v446_v10 = vmul.f32 %v382_v63, %v190_v39  ;;  %v384_v11 = vmin.f32 %v320_v0, 6.0 }
  0x49   :  { %v322_v12 = vmax.f32 %v258_v1, 0.0  ;;  %v509_v13 = vmul.f32 0.16666667, %v445_v3  ;;  %v447_v14 = vmul.f32 %v383_v4, %v191_v43  ;;  %v385_v15 = vmin.f32 %v321_v6, 6.0 }
  0x4a   :  { %v323_v16 = vmax.f32 %v259_v7, 0.0  ;;  %v510_v18 = vmul.f32 0.16666667, %v446_v10  ;;  %v448_v19 = vmul.f32 %v384_v11, %v192_v49  ;;  %v125_v21 = vmul.f32 %v1216_v2, %v54_v8  ;;  %v62_v10 = vld [vmem:[%s1630_s0 + $0x180] sm:$0xff] }
  0x4b   :  { %v386_v20 = vmin.f32 %v322_v12, 6.0  ;;  %v1077_v23 = vpack.c.bf16 %v509_v13, %v508_v9  ;;  %v511_v24 = vmul.f32 0.16666667, %v447_v14  ;;  %v449_v25 = vmul.f32 %v385_v15, %v193_v52 }
  0x4c   :  { %v387_v26 = vmin.f32 %v323_v16, 6.0  ;;  %v512_v28 = vmul.f32 0.16666667, %v448_v19  ;;  %v126_v30 = vmul.f32 %v1216_v2, %v55_v17  ;;  %v196_v31 = vadd.f32 %v1223_v5, %v125_v21  ;;  %v63_v19 = vld [vmem:[%s1630_s0 + $0x188] sm:$0xff] }
  0x4d   :  { %v450_v29 = vmul.f32 %v386_v20, %v194_v57  ;;  %1169 = vst [vmem:[%s1633_s3 + $0x80] sm:$0xff] %v1077_v23   ;;  %v1082_v33 = vpack.c.bf16 %v511_v24, %v510_v18  ;;  %v513_v34 = vmul.f32 0.16666667, %v449_v25  ;;  %v127_v36 = vmul.f32 %v1216_v2, %v56_v22 }
  0x4e   :  { %v451_v35 = vmul.f32 %v387_v26, %v195_v61  ;;  %v197_v39 = vadd.f32 %v1223_v5, %v126_v30  ;;  %v260_v40 = vadd.f32 3.0, %v196_v31  ;;  %v128_v41 = vmul.f32 %v1216_v2, %v57_v27 }
  0x4f   :  { %v514_v38 = vmul.f32 0.16666667, %v450_v29  ;;  %1170 = vst [vmem:[%s1633_s3 + $0x88] sm:$0xff] %v1082_v33   ;;  %v1087_v43 = vpack.c.bf16 %v513_v34, %v512_v28  ;;  %v198_v45 = vadd.f32 %v1223_v5, %v127_v36  ;;  %v129_v46 = vmul.f32 %v1216_v2, %v58_v32  ;;  %v64_v28 = vld [vmem:[%s1630_s0 + $0x190] sm:$0xff]  ;;  %v65_v33 = vld [vmem:[%s1630_s0 + $0x198] sm:$0xff] }
  0x50   :  { %v515_v44 = vmul.f32 0.16666667, %v451_v35  ;;  %v261_v47 = vadd.f32 3.0, %v197_v39  ;;  %v324_v48 = vmax.f32 %v260_v40, 0.0  ;;  %v199_v49 = vadd.f32 %v1223_v5, %v128_v41 }
  0x51   :  { %v130_v50 = vmul.f32 %v1216_v2, %v59_v37  ;;  %1171 = vst [vmem:[%s1633_s3 + $0x90] sm:$0xff] %v1087_v43   ;;  %v262_v53 = vadd.f32 3.0, %v198_v45  ;;  %v200_v54 = vadd.f32 %v1223_v5, %v129_v46  ;;  %v131_v55 = vmul.f32 %v1216_v2, %v60_v42  ;;  %v67_v43 = vld [vmem:[%s1630_s0 + $0x1a8] sm:$0xff] }
  0x52   :  { %v1092_v52 = vpack.c.bf16 %v515_v44, %v514_v38  ;;  %v325_v56 = vmax.f32 %v261_v47, 0.0  ;;  %v388_v57 = vmin.f32 %v324_v48, 6.0  ;;  %v263_v58 = vadd.f32 3.0, %v199_v49  ;;  %v66_v38 = vld [vmem:[%s1630_s0 + $0x1a0] sm:$0xff]  ;;  %v68_v48 = vld [vmem:[%s1630_s0 + $0x1b0] sm:$0xff] }
  0x53   :  { %v201_v59 = vadd.f32 %v1223_v5, %v130_v50  ;;  %v326_v60 = vmax.f32 %v262_v53, 0.0  ;;  %v264_v61 = vadd.f32 3.0, %v200_v54  ;;  %v132_v62 = vmul.f32 %v1216_v2, %v61_v51 }
  0x54   :  { %1172 = vst [vmem:[%s1633_s3 + $0x98] sm:$0xff] %v1092_v52   ;;  %v202_v63 = vadd.f32 %v1223_v5, %v131_v55  ;;  %v389_v0 = vmin.f32 %v325_v56, 6.0  ;;  %v452_v1 = vmul.f32 %v388_v57, %v196_v31  ;;  %v327_v3 = vmax.f32 %v263_v58, 0.0  ;;  %v69_v57 = vld [vmem:[%s1630_s0 + $0x1b8] sm:$0xff] }
  0x55   :  { %v265_v4 = vadd.f32 3.0, %v201_v59  ;;  %v390_v6 = vmin.f32 %v326_v60, 6.0  ;;  %v328_v7 = vmax.f32 %v264_v61, 0.0  ;;  %v203_v8 = vadd.f32 %v1223_v5, %v132_v62 }
  0x56   :  { %v266_v9 = vadd.f32 3.0, %v202_v63  ;;  %v453_v11 = vmul.f32 %v389_v0, %v197_v39  ;;  %v516_v12 = vmul.f32 0.16666667, %v452_v1  ;;  %v391_v13 = vmin.f32 %v327_v3, 6.0 }
  0x57   :  { %v329_v14 = vmax.f32 %v265_v4, 0.0  ;;  %v454_v15 = vmul.f32 %v390_v6, %v198_v45  ;;  %v392_v16 = vmin.f32 %v328_v7, 6.0  ;;  %v267_v17 = vadd.f32 3.0, %v203_v8 }
  0x58   :  { %v330_v18 = vmax.f32 %v266_v9, 0.0  ;;  %v517_v20 = vmul.f32 0.16666667, %v453_v11  ;;  %v455_v21 = vmul.f32 %v391_v13, %v199_v49  ;;  %v133_v23 = vmul.f32 %v1216_v2, %v62_v10 }
  0x59   :  { %v393_v22 = vmin.f32 %v329_v14, 6.0  ;;  %v518_v24 = vmul.f32 0.16666667, %v454_v15  ;;  %v456_v25 = vmul.f32 %v392_v16, %v200_v54  ;;  %v331_v26 = vmax.f32 %v267_v17, 0.0  ;;  %v70_v16 = vld [vmem:[%s1630_s0 + $0x1c0] sm:$0xff] }
  0x5a   :  { %v394_v27 = vmin.f32 %v330_v18, 6.0  ;;  %v1097_v29 = vpack.c.bf16 %v517_v20, %v516_v12  ;;  %v519_v30 = vmul.f32 0.16666667, %v455_v21  ;;  %v134_v32 = vmul.f32 %v1216_v2, %v63_v19 }
  0x5b   :  { %v457_v31 = vmul.f32 %v393_v22, %v201_v59  ;;  %v520_v34 = vmul.f32 0.16666667, %v456_v25  ;;  %v395_v35 = vmin.f32 %v331_v26, 6.0  ;;  %v204_v37 = vadd.f32 %v1223_v5, %v133_v23  ;;  %v71_v25 = vld [vmem:[%s1630_s0 + $0x1c8] sm:$0xff] }
  0x5c   :  { %v458_v36 = vmul.f32 %v394_v27, %v202_v63  ;;  %1173 = vst [vmem:[%s1633_s3 + $0xa0] sm:$0xff] %v1097_v29   ;;  %v1102_v39 = vpack.c.bf16 %v519_v30, %v518_v24  ;;  %v205_v41 = vadd.f32 %v1223_v5, %v134_v32  ;;  %v135_v42 = vmul.f32 %v1216_v2, %v64_v28  ;;  %v72_v30 = vld [vmem:[%s1630_s0 + $0x1d0] sm:$0xff] }
  0x5d   :  { %v521_v40 = vmul.f32 0.16666667, %v457_v31  ;;  %v459_v44 = vmul.f32 %v395_v35, %v203_v8  ;;  %v268_v46 = vadd.f32 3.0, %v204_v37  ;;  %v136_v47 = vmul.f32 %v1216_v2, %v65_v33 }
  0x5e   :  { %v522_v45 = vmul.f32 0.16666667, %v458_v36  ;;  %1174 = vst [vmem:[%s1633_s3 + $0xa8] sm:$0xff] %v1102_v39   ;;  %v269_v50 = vadd.f32 3.0, %v205_v41  ;;  %v206_v51 = vadd.f32 %v1223_v5, %v135_v42  ;;  %v137_v52 = vmul.f32 %v1216_v2, %v66_v38  ;;  %v73_v39 = vld [vmem:[%s1630_s0 + $0x1d8] sm:$0xff] }
  0x5f   :  { %v1107_v49 = vpack.c.bf16 %v521_v40, %v520_v34  ;;  %v523_v53 = vmul.f32 0.16666667, %v459_v44  ;;  %v332_v54 = vmax.f32 %v268_v46, 0.0  ;;  %v207_v55 = vadd.f32 %v1223_v5, %v136_v47  ;;  %v74_v44 = vld [vmem:[%s1630_s0 + $0x1e0] sm:$0xff] }
  0x60   :  { %v138_v56 = vmul.f32 %v1216_v2, %v67_v43  ;;  %v333_v58 = vmax.f32 %v269_v50, 0.0  ;;  %v270_v59 = vadd.f32 3.0, %v206_v51  ;;  %v208_v60 = vadd.f32 %v1223_v5, %v137_v52 }
  0x61   :  { %1175 = vst [vmem:[%s1633_s3 + $0xb0] sm:$0xff] %v1107_v49   ;;  %v139_v61 = vmul.f32 %v1216_v2, %v68_v48  ;;  %v1112_v62 = vpack.c.bf16 %v523_v53, %v522_v45  ;;  %v396_v63 = vmin.f32 %v332_v54, 6.0  ;;  %v271_v0 = vadd.f32 3.0, %v207_v55  ;;  %v75_v53 = vld [vmem:[%s1630_s0 + $0x1e8] sm:$0xff]  ;;  %v76_v54 = vld [vmem:[%s1630_s0 + $0x1f0] sm:$0xff] }
  0x62   :  { %v209_v1 = vadd.f32 %v1223_v5, %v138_v56  ;;  %v397_v3 = vmin.f32 %v333_v58, 6.0  ;;  %v334_v4 = vmax.f32 %v270_v59, 0.0  ;;  %v272_v6 = vadd.f32 3.0, %v208_v60 }
  0x63   :  { %v140_v7 = vmul.f32 %v1216_v2, %v69_v57  ;;  %1176 = vst [vmem:[%s1633_s3 + $0xb8] sm:$0xff] %v1112_v62   ;;  %v460_v8 = vmul.f32 %v396_v63, %v204_v37  ;;  %v335_v9 = vmax.f32 %v271_v0, 0.0  ;;  %v210_v11 = vadd.f32 %v1223_v5, %v139_v61  ;;  %v77_v63 = vld [vmem:[%s1630_s0 + $0x1f8] sm:$0xff] }
  0x64   :  { %v273_v10 = vadd.f32 3.0, %v209_v1  ;;  %v461_v12 = vmul.f32 %v397_v3, %v205_v41  ;;  %v398_v13 = vmin.f32 %v334_v4, 6.0  ;;  %v336_v14 = vmax.f32 %v272_v6, 0.0 }
  0x65   :  { %v211_v15 = vadd.f32 %v1223_v5, %v140_v7  ;;  %v524_v17 = vmul.f32 0.16666667, %v460_v8  ;;  %v399_v18 = vmin.f32 %v335_v9, 6.0  ;;  %v274_v20 = vadd.f32 3.0, %v210_v11 }
  0x66   :  { %v337_v19 = vmax.f32 %v273_v10, 0.0  ;;  %v525_v21 = vmul.f32 0.16666667, %v461_v12  ;;  %v462_v22 = vmul.f32 %v398_v13, %v206_v51  ;;  %v400_v23 = vmin.f32 %v336_v14, 6.0 }
  0x67   :  { %v275_v24 = vadd.f32 3.0, %v211_v15  ;;  %v463_v26 = vmul.f32 %v399_v18, %v207_v55  ;;  %v338_v28 = vmax.f32 %v274_v20, 0.0  ;;  %v141_v29 = vmul.f32 %v1216_v2, %v70_v16 }
  0x68   :  { %v401_v27 = vmin.f32 %v337_v19, 6.0  ;;  %v1117_v31 = vpack.c.bf16 %v525_v21, %v524_v17  ;;  %v526_v32 = vmul.f32 0.16666667, %v462_v22  ;;  %v464_v33 = vmul.f32 %v400_v23, %v208_v60  ;;  %v1186_v60 = vld [vmem:[%s1632_s2] ss:$0 sm:$0xff] }
  0x69   :  { %v339_v34 = vmax.f32 %v275_v24, 0.0  ;;  %v527_v35 = vmul.f32 0.16666667, %v463_v26  ;;  %v402_v37 = vmin.f32 %v338_v28, 6.0  ;;  %v142_v38 = vmul.f32 %v1216_v2, %v71_v25 }
  0x6a   :  { %v465_v36 = vmul.f32 %v401_v27, %v209_v1  ;;  %1177 = vst [vmem:[%s1633_s3 + $0xc0] sm:$0xff] %v1117_v31   ;;  %v528_v40 = vmul.f32 0.16666667, %v464_v33  ;;  %v212_v42 = vadd.f32 %v1223_v5, %v141_v29  ;;  %v143_v43 = vmul.f32 %v1216_v2, %v72_v30 }
  0x6b   :  { %v403_v41 = vmin.f32 %v339_v34, 6.0  ;;  %v1122_v45 = vpack.c.bf16 %v527_v35, %v526_v32  ;;  %v466_v47 = vmul.f32 %v402_v37, %v210_v11  ;;  %v213_v48 = vadd.f32 %v1223_v5, %v142_v38 }
  0x6c   :  { %v529_v46 = vmul.f32 0.16666667, %v465_v36  ;;  %v276_v50 = vadd.f32 3.0, %v212_v42  ;;  %v144_v51 = vmul.f32 %v1216_v2, %v73_v39  ;;  %v214_v52 = vadd.f32 %v1223_v5, %v143_v43  ;;  %v1185_v2 = vld [vmem:[%s1631_s1] ss:$0 sm:$0xff] }
  0x6d   :  { %v467_v49 = vmul.f32 %v403_v41, %v211_v15  ;;  %1178 = vst [vmem:[%s1633_s3 + $0xc8] sm:$0xff] %v1122_v45   ;;  %v530_v56 = vmul.f32 0.16666667, %v466_v47  ;;  %v277_v57 = vadd.f32 3.0, %v213_v48  ;;  %v145_v5 = vmul.f32 %v1185_v2, %v74_v44 }
  0x6e   :  { %v1127_v55 = vpack.c.bf16 %v529_v46, %v528_v40  ;;  %v340_v59 = vmax.f32 %v276_v50, 0.0  ;;  %v215_v61 = vadd.f32 %v1186_v60, %v144_v51  ;;  %v278_v62 = vadd.f32 3.0, %v214_v52 }
  0x6f   :  { %v531_v58 = vmul.f32 0.16666667, %v467_v49  ;;  %v341_v0 = vmax.f32 %v277_v57, 0.0  ;;  %v146_v1 = vmul.f32 %v1185_v2, %v75_v53  ;;  %v216_v3 = vadd.f32 %v1186_v60, %v145_v5 }
  0x70   :  { %1179 = vst [vmem:[%s1633_s3 + $0xd0] sm:$0xff] %v1127_v55   ;;  %v147_v4 = vmul.f32 %v1185_v2, %v76_v54  ;;  %v404_v7 = vmin.f32 %v340_v59, 6.0  ;;  %v279_v8 = vadd.f32 3.0, %v215_v61  ;;  %v342_v9 = vmax.f32 %v278_v62, 0.0 }
  0x71   :  { %v1132_v6 = vpack.c.bf16 %v531_v58, %v530_v56  ;;  %v405_v10 = vmin.f32 %v341_v0, 6.0  ;;  %v217_v11 = vadd.f32 %v1186_v60, %v146_v1  ;;  %v280_v12 = vadd.f32 3.0, %v216_v3 }
  0x72   :  { %v148_v13 = vmul.f32 %v1185_v2, %v77_v63  ;;  %v468_v14 = vmul.f32 %v404_v7, %v212_v42  ;;  %v343_v15 = vmax.f32 %v279_v8, 0.0  ;;  %v406_v16 = vmin.f32 %v342_v9, 6.0 }
  0x73   :  { %1180 = vst [vmem:[%s1633_s3 + $0xd8] sm:$0xff] %v1132_v6   ;;  %v218_v17 = vadd.f32 %v1186_v60, %v147_v4  ;;  %v469_v18 = vmul.f32 %v405_v10, %v213_v48  ;;  %v281_v19 = vadd.f32 3.0, %v217_v11  ;;  %v344_v20 = vmax.f32 %v280_v12, 0.0 }
  0x74   :  { %v219_v21 = vadd.f32 %v1186_v60, %v148_v13  ;;  %v532_v22 = vmul.f32 0.16666667, %v468_v14  ;;  %v407_v23 = vmin.f32 %v343_v15, 6.0  ;;  %v470_v24 = vmul.f32 %v406_v16, %v214_v52 }
  0x75   :  { %v282_v25 = vadd.f32 3.0, %v218_v17  ;;  %v533_v26 = vmul.f32 0.16666667, %v469_v18  ;;  %v345_v27 = vmax.f32 %v281_v19, 0.0  ;;  %v408_v28 = vmin.f32 %v344_v20, 6.0 }
  0x76   :  { %v283_v29 = vadd.f32 3.0, %v219_v21  ;;  %v471_v30 = vmul.f32 %v407_v23, %v215_v61  ;;  %v534_v31 = vmul.f32 0.16666667, %v470_v24 }
  0x77   :  { %v346_v32 = vmax.f32 %v282_v25, 0.0  ;;  %v1137_v33 = vpack.c.bf16 %v533_v26, %v532_v22  ;;  %v409_v34 = vmin.f32 %v345_v27, 6.0  ;;  %v472_v35 = vmul.f32 %v408_v28, %v216_v3 }
  0x78   :  { %v347_v36 = vmax.f32 %v283_v29, 0.0  ;;  %v535_v37 = vmul.f32 0.16666667, %v471_v30 }
  0x79   :  { %v410_v38 = vmin.f32 %v346_v32, 6.0  ;;  %1181 = vst [vmem:[%s1633_s3 + $0xe0] sm:$0xff] %v1137_v33   ;;  %v473_v39 = vmul.f32 %v409_v34, %v217_v11  ;;  %v536_v40 = vmul.f32 0.16666667, %v472_v35 }
  0x7a   :  { %v411_v41 = vmin.f32 %v347_v36, 6.0  ;;  %v1142_v42 = vpack.c.bf16 %v535_v37, %v534_v31 }
  0x7b   :  { %v474_v43 = vmul.f32 %v410_v38, %v218_v17  ;;  %v537_v44 = vmul.f32 0.16666667, %v473_v39 }
  0x7c   :  { %v475_v45 = vmul.f32 %v411_v41, %v219_v21  ;;  %1182 = vst [vmem:[%s1633_s3 + $0xe8] sm:$0xff] %v1142_v42  }
  0x7d   :  { %v538_v46 = vmul.f32 0.16666667, %v474_v43  ;;  %v1147_v47 = vpack.c.bf16 %v537_v44, %v536_v40 }
  0x7e   :  { %v539_v48 = vmul.f32 0.16666667, %v475_v45 }
  0x7f   :  { %1183 = vst [vmem:[%s1633_s3 + $0xf0] sm:$0xff] %v1147_v47  }
  0x80   :  { %v1152_v49 = vpack.c.bf16 %v539_v48, %v538_v46 }
  0x82   :  { %1184 = vst [vmem:[%s1633_s3 + $0xf8] sm:$0xff] %v1152_v49  }

// kernel: bottleneckcsp_forward.21
= control target key start
LH: loop header
LB: loop body
LE: loop exit
PB: predicated region body
PF: predicated region fallthrough
CT: control target
= control target key end

     0   :  { %s1503_s0 = inlined_call_operand.vmem [shape: f32[512,128], index: 0, kind: input, shape index: {}]   ;;  %s1504_s1 = inlined_call_operand.vmem [shape: f32[1,128], index: 1, kind: input, shape index: {}]   ;;  %s1505_s2 = inlined_call_operand.vmem [shape: f32[1,128], index: 2, kind: input, shape index: {}]   ;;  %s1506_s3 = inlined_call_operand.vmem [shape: bf16[512,128], index: 3, kind: output, shape index: {}]  }
   0x1   :  { %v14_v0 = vld [vmem:[%s1503_s0] sm:$0xff]  ;;  %v15_v1 = vld [vmem:[%s1503_s0 + $0x8] sm:$0xff]  ;;  %v16_v6 = vld [vmem:[%s1503_s0 + $0x10] sm:$0xff] }
   0x2   :  { %v1086_v2 = vld [vmem:[%s1504_s1] ss:$0 sm:$0xff]  ;;  %v17_v7 = vld [vmem:[%s1503_s0 + $0x18] sm:$0xff]  ;;  %v19_v11 = vld [vmem:[%s1503_s0 + $0x28] sm:$0xff] }
   0x3   :  { %v85_v3 = vmul.f32 %v1086_v2, %v14_v0  ;;  %v86_v4 = vmul.f32 %v1086_v2, %v15_v1  ;;  %v1093_v5 = vld [vmem:[%s1505_s2] ss:$0 sm:$0xff]  ;;  %v87_v8 = vmul.f32 %v1086_v2, %v16_v6  ;;  %v88_v9 = vmul.f32 %v1086_v2, %v17_v7  ;;  %v20_v12 = vld [vmem:[%s1503_s0 + $0x30] sm:$0xff]  ;;  %v21_v17 = vld [vmem:[%s1503_s0 + $0x38] sm:$0xff] }
   0x4   :  { %v18_v10 = vld [vmem:[%s1503_s0 + $0x20] sm:$0xff]  ;;  %v90_v16 = vmul.f32 %v1086_v2, %v19_v11  ;;  %v91_v20 = vmul.f32 %v1086_v2, %v20_v12  ;;  %v92_v21 = vmul.f32 %v1086_v2, %v21_v17  ;;  %v23_v35 = vld [vmem:[%s1503_s0 + $0x48] sm:$0xff]  ;;  %v24_v36 = vld [vmem:[%s1503_s0 + $0x50] sm:$0xff] }
   0x5   :  { %v156_v13 = vadd.f32 %v1093_v5, %v85_v3  ;;  %v157_v14 = vadd.f32 %v1093_v5, %v86_v4  ;;  %v89_v15 = vmul.f32 %v1086_v2, %v18_v10  ;;  %v158_v18 = vadd.f32 %v1093_v5, %v87_v8  ;;  %v22_v34 = vld [vmem:[%s1503_s0 + $0x40] sm:$0xff]  ;;  %v25_v42 = vld [vmem:[%s1503_s0 + $0x58] sm:$0xff]  ;;  %v27_v48 = vld [vmem:[%s1503_s0 + $0x68] sm:$0xff] }
   0x6   :  { %v159_v19 = vadd.f32 %v1093_v5, %v88_v9  ;;  %v161_v29 = vadd.f32 %v1093_v5, %v90_v16  ;;  %v162_v33 = vadd.f32 %v1093_v5, %v91_v20  ;;  %v163_v40 = vadd.f32 %v1093_v5, %v92_v21  ;;  %v26_v47 = vld [vmem:[%s1503_s0 + $0x60] sm:$0xff]  ;;  %v28_v60 = vld [vmem:[%s1503_s0 + $0x70] sm:$0xff]  ;;  %v29_v7 = vld [vmem:[%s1503_s0 + $0x78] sm:$0xff] }
   0x7   :  { %vm220_vm0 = vcmp.ge.f32.partialorder %v156_v13, 0.0  ;;  %vm221_vm1 = vcmp.ge.f32.partialorder %v157_v14, 0.0  ;;  %v284_v22 = vmul.f32 0.1, %v156_v13  ;;  %v285_v23 = vmul.f32 0.1, %v157_v14 }
   0x8   :  { %vm222_vm2 = vcmp.ge.f32.partialorder %v158_v18, 0.0  ;;  %vm223_vm3 = vcmp.ge.f32.partialorder %v159_v19, 0.0  ;;  %v286_v24 = vmul.f32 0.1, %v158_v18  ;;  %v287_v25 = vmul.f32 0.1, %v159_v19 }
   0x9   :  { %v348_v26 = vsel %vm220_vm0, %v156_v13, %v284_v22  ;;  %v349_v27 = vsel %vm221_vm1, %v157_v14, %v285_v23  ;;  %v160_v28 = vadd.f32 %v1093_v5, %v89_v15  ;;  %vm225_vm5 = vcmp.ge.f32.partialorder %v161_v29, 0.0  ;;  %v30_v12 = vld [vmem:[%s1503_s0 + $0x80] sm:$0xff]  ;;  %v31_v13 = vld [vmem:[%s1503_s0 + $0x88] sm:$0xff]  ;;  %v32_v20 = vld [vmem:[%s1503_s0 + $0x90] sm:$0xff] }
   0xa   :  { %v869_v30 = vpack.c.bf16 %v349_v27, %v348_v26  ;;  %v350_v31 = vsel %vm222_vm2, %v158_v18, %v286_v24  ;;  %v351_v32 = vsel %vm223_vm3, %v159_v19, %v287_v25  ;;  %v289_v39 = vmul.f32 0.1, %v161_v29  ;;  %v33_v25 = vld [vmem:[%s1503_s0 + $0x98] sm:$0xff] }
   0xb   :  { %v874_v37 = vpack.c.bf16 %v351_v32, %v350_v31  ;;  %vm224_vm4 = vcmp.ge.f32.partialorder %v160_v28, 0.0  ;;  %v288_v38 = vmul.f32 0.1, %v160_v28  ;;  %vm226_vm6 = vcmp.ge.f32.partialorder %v162_v33, 0.0 }
   0xc   :  { %870 = vst [vmem:[%s1506_s3] sm:$0xff] %v869_v30   ;;  %v290_v41 = vmul.f32 0.1, %v162_v33  ;;  %v93_v44 = vmul.f32 %v1086_v2, %v22_v34  ;;  %v94_v45 = vmul.f32 %v1086_v2, %v23_v35  ;;  %v95_v46 = vmul.f32 %v1086_v2, %v24_v36 }
   0xd   :  { %1026 = vst [vmem:[%s1506_s3 + $0x8] sm:$0xff] %v874_v37   ;;  %v352_v43 = vsel %vm224_vm4, %v160_v28, %v288_v38  ;;  %v353_v49 = vsel %vm225_vm5, %v161_v29, %v289_v39  ;;  %vm227_vm7 = vcmp.ge.f32.partialorder %v163_v40, 0.0  ;;  %v291_v50 = vmul.f32 0.1, %v163_v40  ;;  %v35_v37 = vld [vmem:[%s1503_s0 + $0xa8] sm:$0xff] }
   0xe   :  { %v354_v51 = vsel %vm226_vm6, %v162_v33, %v290_v41  ;;  %v879_v52 = vpack.c.bf16 %v353_v49, %v352_v43  ;;  %v164_v53 = vadd.f32 %v1093_v5, %v93_v44  ;;  %v165_v54 = vadd.f32 %v1093_v5, %v94_v45  ;;  %v34_v33 = vld [vmem:[%s1503_s0 + $0xa0] sm:$0xff]  ;;  %v36_v44 = vld [vmem:[%s1503_s0 + $0xb0] sm:$0xff]  ;;  %v37_v49 = vld [vmem:[%s1503_s0 + $0xb8] sm:$0xff] }
   0xf   :  { %v96_v55 = vmul.f32 %v1086_v2, %v25_v42  ;;  %v355_v56 = vsel %vm227_vm7, %v163_v40, %v291_v50  ;;  %v166_v57 = vadd.f32 %v1093_v5, %v95_v46  ;;  %v97_v58 = vmul.f32 %v1086_v2, %v26_v47  ;;  %v38_v50 = vld [vmem:[%s1503_s0 + $0xc0] sm:$0xff] }
  0x10   :  { %v98_v59 = vmul.f32 %v1086_v2, %v27_v48  ;;  %1027 = vst [vmem:[%s1506_s3 + $0x10] sm:$0xff] %v879_v52   ;;  %v884_v61 = vpack.c.bf16 %v355_v56, %v354_v51  ;;  %vm228_vm8 = vcmp.ge.f32.partialorder %v164_v53, 0.0  ;;  %vm229_vm9 = vcmp.ge.f32.partialorder %v165_v54, 0.0  ;;  %v39_v51 = vld [vmem:[%s1503_s0 + $0xc8] sm:$0xff] }
  0x11   :  { %v292_v62 = vmul.f32 0.1, %v164_v53  ;;  %v293_v63 = vmul.f32 0.1, %v165_v54  ;;  %v167_v0 = vadd.f32 %v1093_v5, %v96_v55  ;;  %vm230_vm10 = vcmp.ge.f32.partialorder %v166_v57, 0.0 }
  0x12   :  { %v294_v1 = vmul.f32 0.1, %v166_v57  ;;  %1028 = vst [vmem:[%s1506_s3 + $0x18] sm:$0xff] %v884_v61   ;;  %v168_v4 = vadd.f32 %v1093_v5, %v97_v58  ;;  %v169_v6 = vadd.f32 %v1093_v5, %v98_v59  ;;  %v99_v8 = vmul.f32 %v1086_v2, %v28_v60 }
  0x13   :  { %v356_v3 = vsel %vm228_vm8, %v164_v53, %v292_v62  ;;  %v357_v9 = vsel %vm229_vm9, %v165_v54, %v293_v63  ;;  %vm231_vm11 = vcmp.ge.f32.partialorder %v167_v0, 0.0  ;;  %v295_v10 = vmul.f32 0.1, %v167_v0  ;;  %v40_v62 = vld [vmem:[%s1503_s0 + $0xd0] sm:$0xff] }
  0x14   :  { %v358_v11 = vsel %vm230_vm10, %v166_v57, %v294_v1  ;;  %v889_v14 = vpack.c.bf16 %v357_v9, %v356_v3  ;;  %vm232_vm12 = vcmp.ge.f32.partialorder %v168_v4, 0.0  ;;  %vm233_vm13 = vcmp.ge.f32.partialorder %v169_v6, 0.0 }
  0x15   :  { %v296_v15 = vmul.f32 0.1, %v168_v4  ;;  %v359_v16 = vsel %vm231_vm11, %v167_v0, %v295_v10  ;;  %v297_v17 = vmul.f32 0.1, %v169_v6  ;;  %v100_v18 = vmul.f32 %v1086_v2, %v29_v7  ;;  %v41_v10 = vld [vmem:[%s1503_s0 + $0xd8] sm:$0xff] }
  0x16   :  { %v170_v19 = vadd.f32 %v1093_v5, %v99_v8  ;;  %1029 = vst [vmem:[%s1506_s3 + $0x20] sm:$0xff] %v889_v14   ;;  %v894_v21 = vpack.c.bf16 %v359_v16, %v358_v11  ;;  %v101_v23 = vmul.f32 %v1086_v2, %v30_v12  ;;  %v102_v24 = vmul.f32 %v1086_v2, %v31_v13  ;;  %v42_v14 = vld [vmem:[%s1503_s0 + $0xe0] sm:$0xff] }
  0x17   :  { %v360_v22 = vsel %vm232_vm12, %v168_v4, %v296_v15  ;;  %v361_v26 = vsel %vm233_vm13, %v169_v6, %v297_v17  ;;  %v171_v27 = vadd.f32 %v1093_v5, %v100_v18  ;;  %v103_v32 = vmul.f32 %v1086_v2, %v32_v20  ;;  %v43_v15 = vld [vmem:[%s1503_s0 + $0xe8] sm:$0xff] }
  0x18   :  { %vm234_vm14 = vcmp.ge.f32.partialorder %v170_v19, 0.0  ;;  %v298_v28 = vmul.f32 0.1, %v170_v19  ;;  %1030 = vst [vmem:[%s1506_s3 + $0x28] sm:$0xff] %v894_v21   ;;  %v899_v29 = vpack.c.bf16 %v361_v26, %v360_v22  ;;  %v172_v30 = vadd.f32 %v1093_v5, %v101_v23  ;;  %v44_v26 = vld [vmem:[%s1503_s0 + $0xf0] sm:$0xff] }
  0x19   :  { %v173_v31 = vadd.f32 %v1093_v5, %v102_v24  ;;  %vm235_vm15 = vcmp.ge.f32.partialorder %v171_v27, 0.0  ;;  %v299_v34 = vmul.f32 0.1, %v171_v27  ;;  %v104_v36 = vmul.f32 %v1086_v2, %v33_v25 }
  0x1a   :  { %v362_v35 = vsel %vm234_vm14, %v170_v19, %v298_v28  ;;  %1031 = vst [vmem:[%s1506_s3 + $0x30] sm:$0xff] %v899_v29   ;;  %vm236_vm0 = vcmp.ge.f32.partialorder %v172_v30, 0.0  ;;  %v300_v38 = vmul.f32 0.1, %v172_v30  ;;  %v174_v41 = vadd.f32 %v1093_v5, %v103_v32 }
  0x1b   :  { %vm237_vm1 = vcmp.ge.f32.partialorder %v173_v31, 0.0  ;;  %v301_v39 = vmul.f32 0.1, %v173_v31  ;;  %v363_v40 = vsel %vm235_vm15, %v171_v27, %v299_v34  ;;  %v175_v42 = vadd.f32 %v1093_v5, %v104_v36 }
  0x1c   :  { %v105_v43 = vmul.f32 %v1086_v2, %v34_v33  ;;  %v904_v45 = vpack.c.bf16 %v363_v40, %v362_v35  ;;  %v364_v46 = vsel %vm236_vm0, %v172_v30, %v300_v38  ;;  %v106_v48 = vmul.f32 %v1086_v2, %v35_v37  ;;  %v46_v38 = vld [vmem:[%s1503_s0 + $0x100] sm:$0xff] }
  0x1d   :  { %v365_v47 = vsel %vm237_vm1, %v173_v31, %v301_v39  ;;  %vm238_vm2 = vcmp.ge.f32.partialorder %v174_v41, 0.0  ;;  %vm239_vm3 = vcmp.ge.f32.partialorder %v175_v42, 0.0  ;;  %v302_v53 = vmul.f32 0.1, %v174_v41  ;;  %v45_v31 = vld [vmem:[%s1503_s0 + $0xf8] sm:$0xff] }
  0x1e   :  { %v909_v52 = vpack.c.bf16 %v365_v47, %v364_v46  ;;  %1032 = vst [vmem:[%s1506_s3 + $0x38] sm:$0xff] %v904_v45   ;;  %v303_v54 = vmul.f32 0.1, %v175_v42  ;;  %v176_v55 = vadd.f32 %v1093_v5, %v105_v43  ;;  %v177_v56 = vadd.f32 %v1093_v5, %v106_v48 }
  0x1f   :  { %v107_v57 = vmul.f32 %v1086_v2, %v36_v44  ;;  %v366_v58 = vsel %vm238_vm2, %v174_v41, %v302_v53  ;;  %v108_v59 = vmul.f32 %v1086_v2, %v37_v49  ;;  %v109_v60 = vmul.f32 %v1086_v2, %v38_v50  ;;  %v48_v50 = vld [vmem:[%s1503_s0 + $0x110] sm:$0xff] }
  0x20   :  { %1033 = vst [vmem:[%s1506_s3 + $0x40] sm:$0xff] %v909_v52   ;;  %v110_v61 = vmul.f32 %v1086_v2, %v39_v51  ;;  %v367_v63 = vsel %vm239_vm3, %v175_v42, %v303_v54  ;;  %vm240_vm4 = vcmp.ge.f32.partialorder %v176_v55, 0.0  ;;  %vm241_vm5 = vcmp.ge.f32.partialorder %v177_v56, 0.0  ;;  %v47_v42 = vld [vmem:[%s1503_s0 + $0x108] sm:$0xff]  ;;  %v49_v51 = vld [vmem:[%s1503_s0 + $0x118] sm:$0xff] }
  0x21   :  { %v304_v0 = vmul.f32 0.1, %v176_v55  ;;  %v914_v1 = vpack.c.bf16 %v367_v63, %v366_v58  ;;  %v305_v3 = vmul.f32 0.1, %v177_v56  ;;  %v178_v4 = vadd.f32 %v1093_v5, %v107_v57  ;;  %v51_v63 = vld [vmem:[%s1503_s0 + $0x128] sm:$0xff] }
  0x22   :  { %v179_v6 = vadd.f32 %v1093_v5, %v108_v59  ;;  %v180_v8 = vadd.f32 %v1093_v5, %v109_v60  ;;  %v181_v9 = vadd.f32 %v1093_v5, %v110_v61  ;;  %v111_v11 = vmul.f32 %v1086_v2, %v40_v62 }
  0x23   :  { %v368_v7 = vsel %vm240_vm4, %v176_v55, %v304_v0  ;;  %1034 = vst [vmem:[%s1506_s3 + $0x48] sm:$0xff] %v914_v1   ;;  %v369_v12 = vsel %vm241_vm5, %v177_v56, %v305_v3  ;;  %vm242_vm6 = vcmp.ge.f32.partialorder %v178_v4, 0.0  ;;  %v306_v13 = vmul.f32 0.1, %v178_v4  ;;  %v50_v55 = vld [vmem:[%s1503_s0 + $0x120] sm:$0xff] }
  0x24   :  { %vm243_vm7 = vcmp.ge.f32.partialorder %v179_v6, 0.0  ;;  %v919_v16 = vpack.c.bf16 %v369_v12, %v368_v7  ;;  %v307_v17 = vmul.f32 0.1, %v179_v6  ;;  %vm244_vm8 = vcmp.ge.f32.partialorder %v180_v8, 0.0 }
  0x25   :  { %vm245_vm9 = vcmp.ge.f32.partialorder %v181_v9, 0.0  ;;  %v370_v18 = vsel %vm242_vm6, %v178_v4, %v306_v13  ;;  %v308_v19 = vmul.f32 0.1, %v180_v8  ;;  %v309_v20 = vmul.f32 0.1, %v181_v9  ;;  %v52_v4 = vld [vmem:[%s1503_s0 + $0x130] sm:$0xff] }
  0x26   :  { %v112_v21 = vmul.f32 %v1086_v2, %v41_v10  ;;  %1035 = vst [vmem:[%s1506_s3 + $0x50] sm:$0xff] %v919_v16   ;;  %v371_v22 = vsel %vm243_vm7, %v179_v6, %v307_v17  ;;  %v182_v23 = vadd.f32 %v1093_v5, %v111_v11  ;;  %v113_v24 = vmul.f32 %v1086_v2, %v42_v14  ;;  %v53_v13 = vld [vmem:[%s1503_s0 + $0x138] sm:$0xff] }
  0x27   :  { %v114_v25 = vmul.f32 %v1086_v2, %v43_v15  ;;  %v924_v27 = vpack.c.bf16 %v371_v22, %v370_v18  ;;  %v372_v28 = vsel %vm244_vm8, %v180_v8, %v308_v19  ;;  %v373_v29 = vsel %vm245_vm9, %v181_v9, %v309_v20  ;;  %v54_v20 = vld [vmem:[%s1503_s0 + $0x140] sm:$0xff] }
  0x28   :  { %v183_v30 = vadd.f32 %v1093_v5, %v112_v21  ;;  %v929_v32 = vpack.c.bf16 %v373_v29, %v372_v28  ;;  %vm246_vm10 = vcmp.ge.f32.partialorder %v182_v23, 0.0  ;;  %v310_v33 = vmul.f32 0.1, %v182_v23 }
  0x29   :  { %v184_v34 = vadd.f32 %v1093_v5, %v113_v24  ;;  %1036 = vst [vmem:[%s1506_s3 + $0x58] sm:$0xff] %v924_v27   ;;  %v185_v36 = vadd.f32 %v1093_v5, %v114_v25  ;;  %v115_v37 = vmul.f32 %v1086_v2, %v44_v26  ;;  %v116_v41 = vmul.f32 %v1086_v2, %v45_v31  ;;  %v55_v24 = vld [vmem:[%s1503_s0 + $0x148] sm:$0xff] }
  0x2a   :  { %vm247_vm11 = vcmp.ge.f32.partialorder %v183_v30, 0.0  ;;  %v311_v35 = vmul.f32 0.1, %v183_v30  ;;  %1037 = vst [vmem:[%s1506_s3 + $0x60] sm:$0xff] %v929_v32   ;;  %v374_v39 = vsel %vm246_vm10, %v182_v23, %v310_v33  ;;  %v117_v49 = vmul.f32 %v1086_v2, %v46_v38  ;;  %v56_v32 = vld [vmem:[%s1503_s0 + $0x150] sm:$0xff]  ;;  %v57_v33 = vld [vmem:[%s1503_s0 + $0x158] sm:$0xff] }
  0x2b   :  { %vm248_vm12 = vcmp.ge.f32.partialorder %v184_v34, 0.0  ;;  %v312_v40 = vmul.f32 0.1, %v184_v34  ;;  %vm249_vm13 = vcmp.ge.f32.partialorder %v185_v36, 0.0  ;;  %v313_v44 = vmul.f32 0.1, %v185_v36 }
  0x2c   :  { %v375_v43 = vsel %vm247_vm11, %v183_v30, %v311_v35  ;;  %v186_v45 = vadd.f32 %v1093_v5, %v115_v37  ;;  %v187_v48 = vadd.f32 %v1093_v5, %v116_v41  ;;  %v118_v54 = vmul.f32 %v1086_v2, %v47_v42  ;;  %v58_v37 = vld [vmem:[%s1503_s0 + $0x160] sm:$0xff] }
  0x2d   :  { %v934_v46 = vpack.c.bf16 %v375_v43, %v374_v39  ;;  %v376_v47 = vsel %vm248_vm12, %v184_v34, %v312_v40  ;;  %v377_v52 = vsel %vm249_vm13, %v185_v36, %v313_v44  ;;  %v188_v58 = vadd.f32 %v1093_v5, %v117_v49  ;;  %v60_v49 = vld [vmem:[%s1503_s0 + $0x170] sm:$0xff] }
  0x2e   :  { %vm250_vm14 = vcmp.ge.f32.partialorder %v186_v45, 0.0  ;;  %v314_v53 = vmul.f32 0.1, %v186_v45  ;;  %v939_v56 = vpack.c.bf16 %v377_v52, %v376_v47  ;;  %vm251_vm15 = vcmp.ge.f32.partialorder %v187_v48, 0.0 }
  0x2f   :  { %1038 = vst [vmem:[%s1506_s3 + $0x68] sm:$0xff] %v934_v46   ;;  %v315_v57 = vmul.f32 0.1, %v187_v48  ;;  %v189_v60 = vadd.f32 %v1093_v5, %v118_v54  ;;  %v119_v61 = vmul.f32 %v1086_v2, %v48_v50  ;;  %v120_v62 = vmul.f32 %v1086_v2, %v49_v51 }
  0x30   :  { %v378_v59 = vsel %vm250_vm14, %v186_v45, %v314_v53  ;;  %1039 = vst [vmem:[%s1506_s3 + $0x70] sm:$0xff] %v939_v56   ;;  %vm252_vm0 = vcmp.ge.f32.partialorder %v188_v58, 0.0  ;;  %v316_v1 = vmul.f32 0.1, %v188_v58  ;;  %v121_v3 = vmul.f32 %v1086_v2, %v50_v55  ;;  %v59_v45 = vld [vmem:[%s1503_s0 + $0x168] sm:$0xff] }
  0x31   :  { %v379_v0 = vsel %vm251_vm15, %v187_v48, %v315_v57  ;;  %vm253_vm1 = vcmp.ge.f32.partialorder %v189_v60, 0.0  ;;  %v317_v7 = vmul.f32 0.1, %v189_v60  ;;  %v190_v8 = vadd.f32 %v1093_v5, %v119_v61  ;;  %v61_v57 = vld [vmem:[%s1503_s0 + $0x178] sm:$0xff] }
  0x32   :  { %v944_v6 = vpack.c.bf16 %v379_v0, %v378_v59  ;;  %v380_v9 = vsel %vm252_vm0, %v188_v58, %v316_v1  ;;  %v191_v10 = vadd.f32 %v1093_v5, %v120_v62  ;;  %v122_v11 = vmul.f32 %v1086_v2, %v51_v63  ;;  %v62_v0 = vld [vmem:[%s1503_s0 + $0x180] sm:$0xff] }
  0x33   :  { %v192_v12 = vadd.f32 %v1093_v5, %v121_v3  ;;  %v381_v14 = vsel %vm253_vm1, %v189_v60, %v317_v7  ;;  %vm254_vm2 = vcmp.ge.f32.partialorder %v190_v8, 0.0  ;;  %v318_v15 = vmul.f32 0.1, %v190_v8 }
  0x34   :  { %1040 = vst [vmem:[%s1506_s3 + $0x78] sm:$0xff] %v944_v6   ;;  %v123_v16 = vmul.f32 %v1086_v2, %v52_v4  ;;  %v949_v17 = vpack.c.bf16 %v381_v14, %v380_v9  ;;  %vm255_vm3 = vcmp.ge.f32.partialorder %v191_v10, 0.0  ;;  %v319_v18 = vmul.f32 0.1, %v191_v10  ;;  %v63_v6 = vld [vmem:[%s1503_s0 + $0x188] sm:$0xff]  ;;  %v64_v14 = vld [vmem:[%s1503_s0 + $0x190] sm:$0xff] }
  0x35   :  { %v193_v19 = vadd.f32 %v1093_v5, %v122_v11  ;;  %v382_v21 = vsel %vm254_vm2, %v190_v8, %v318_v15  ;;  %vm256_vm4 = vcmp.ge.f32.partialorder %v192_v12, 0.0  ;;  %v320_v22 = vmul.f32 0.1, %v192_v12  ;;  %v65_v15 = vld [vmem:[%s1503_s0 + $0x198] sm:$0xff] }
  0x36   :  { %v124_v23 = vmul.f32 %v1086_v2, %v53_v13  ;;  %1041 = vst [vmem:[%s1506_s3 + $0x80] sm:$0xff] %v949_v17   ;;  %v383_v25 = vsel %vm255_vm3, %v191_v10, %v319_v18  ;;  %v194_v27 = vadd.f32 %v1093_v5, %v123_v16  ;;  %v125_v31 = vmul.f32 %v1086_v2, %v54_v20 }
  0x37   :  { %vm257_vm5 = vcmp.ge.f32.partialorder %v193_v19, 0.0  ;;  %v321_v26 = vmul.f32 0.1, %v193_v19  ;;  %v954_v28 = vpack.c.bf16 %v383_v25, %v382_v21  ;;  %v384_v29 = vsel %vm256_vm4, %v192_v12, %v320_v22 }
  0x38   :  { %v195_v30 = vadd.f32 %v1093_v5, %v124_v23  ;;  %vm258_vm6 = vcmp.ge.f32.partialorder %v194_v27, 0.0  ;;  %v322_v35 = vmul.f32 0.1, %v194_v27  ;;  %v126_v36 = vmul.f32 %v1086_v2, %v55_v24 }
  0x39   :  { %v385_v34 = vsel %vm257_vm5, %v193_v19, %v321_v26  ;;  %1042 = vst [vmem:[%s1506_s3 + $0x88] sm:$0xff] %v954_v28   ;;  %v196_v40 = vadd.f32 %v1093_v5, %v125_v31  ;;  %v127_v43 = vmul.f32 %v1086_v2, %v56_v32  ;;  %v128_v44 = vmul.f32 %v1086_v2, %v57_v33  ;;  %v66_v19 = vld [vmem:[%s1503_s0 + $0x1a0] sm:$0xff]  ;;  %v68_v31 = vld [vmem:[%s1503_s0 + $0x1b0] sm:$0xff] }
  0x3a   :  { %v959_v38 = vpack.c.bf16 %v385_v34, %v384_v29  ;;  %vm259_vm7 = vcmp.ge.f32.partialorder %v195_v30, 0.0  ;;  %v323_v39 = vmul.f32 0.1, %v195_v30  ;;  %v386_v41 = vsel %vm258_vm6, %v194_v27, %v322_v35  ;;  %v67_v27 = vld [vmem:[%s1503_s0 + $0x1a8] sm:$0xff] }
  0x3b   :  { %v197_v42 = vadd.f32 %v1093_v5, %v126_v36  ;;  %vm260_vm8 = vcmp.ge.f32.partialorder %v196_v40, 0.0  ;;  %v324_v47 = vmul.f32 0.1, %v196_v40  ;;  %v129_v48 = vmul.f32 %v1086_v2, %v58_v37 }
  0x3c   :  { %1043 = vst [vmem:[%s1506_s3 + $0x90] sm:$0xff] %v959_v38   ;;  %v387_v46 = vsel %vm259_vm7, %v195_v30, %v323_v39  ;;  %v198_v52 = vadd.f32 %v1093_v5, %v127_v43  ;;  %v199_v54 = vadd.f32 %v1093_v5, %v128_v44  ;;  %v130_v55 = vmul.f32 %v1086_v2, %v59_v45  ;;  %v69_v39 = vld [vmem:[%s1503_s0 + $0x1b8] sm:$0xff] }
  0x3d   :  { %v964_v50 = vpack.c.bf16 %v387_v46, %v386_v41  ;;  %vm261_vm9 = vcmp.ge.f32.partialorder %v197_v42, 0.0  ;;  %v325_v51 = vmul.f32 0.1, %v197_v42  ;;  %v388_v53 = vsel %vm260_vm8, %v196_v40, %v324_v47  ;;  %v70_v46 = vld [vmem:[%s1503_s0 + $0x1c0] sm:$0xff] }
  0x3e   :  { %v200_v56 = vadd.f32 %v1093_v5, %v129_v48  ;;  %vm262_vm10 = vcmp.ge.f32.partialorder %v198_v52, 0.0  ;;  %v326_v59 = vmul.f32 0.1, %v198_v52  ;;  %v131_v60 = vmul.f32 %v1086_v2, %v60_v49 }
  0x3f   :  { %1044 = vst [vmem:[%s1506_s3 + $0x98] sm:$0xff] %v964_v50   ;;  %v389_v58 = vsel %vm261_vm9, %v197_v42, %v325_v51  ;;  %vm263_vm11 = vcmp.ge.f32.partialorder %v199_v54, 0.0  ;;  %v327_v62 = vmul.f32 0.1, %v199_v54  ;;  %v201_v63 = vadd.f32 %v1093_v5, %v130_v55  ;;  %v71_v50 = vld [vmem:[%s1503_s0 + $0x1c8] sm:$0xff] }
  0x40   :  { %v969_v61 = vpack.c.bf16 %v389_v58, %v388_v53  ;;  %v390_v1 = vsel %vm262_vm10, %v198_v52, %v326_v59  ;;  %vm264_vm12 = vcmp.ge.f32.partialorder %v200_v56, 0.0  ;;  %v328_v3 = vmul.f32 0.1, %v200_v56  ;;  %v72_v58 = vld [vmem:[%s1503_s0 + $0x1d0] sm:$0xff]  ;;  %v73_v59 = vld [vmem:[%s1503_s0 + $0x1d8] sm:$0xff] }
  0x41   :  { %v132_v4 = vmul.f32 %v1086_v2, %v61_v57  ;;  %v391_v7 = vsel %vm263_vm11, %v199_v54, %v327_v62  ;;  %vm265_vm13 = vcmp.ge.f32.partialorder %v201_v63, 0.0  ;;  %v329_v8 = vmul.f32 0.1, %v201_v63 }
  0x42   :  { %1045 = vst [vmem:[%s1506_s3 + $0xa0] sm:$0xff] %v969_v61   ;;  %v202_v9 = vadd.f32 %v1093_v5, %v131_v60  ;;  %v974_v10 = vpack.c.bf16 %v391_v7, %v390_v1  ;;  %v392_v11 = vsel %vm264_vm12, %v200_v56, %v328_v3  ;;  %v133_v13 = vmul.f32 %v1086_v2, %v62_v0 }
  0x43   :  { %v203_v12 = vadd.f32 %v1093_v5, %v132_v4  ;;  %v393_v16 = vsel %vm265_vm13, %v201_v63, %v329_v8  ;;  %v134_v18 = vmul.f32 %v1086_v2, %v63_v6  ;;  %v135_v25 = vmul.f32 %v1086_v2, %v64_v14  ;;  %v74_v63 = vld [vmem:[%s1503_s0 + $0x1e0] sm:$0xff] }
  0x44   :  { %vm266_vm14 = vcmp.ge.f32.partialorder %v202_v9, 0.0  ;;  %v330_v17 = vmul.f32 0.1, %v202_v9  ;;  %1046 = vst [vmem:[%s1506_s3 + $0xa8] sm:$0xff] %v974_v10   ;;  %v979_v20 = vpack.c.bf16 %v393_v16, %v392_v11  ;;  %v204_v22 = vadd.f32 %v1093_v5, %v133_v13  ;;  %v76_v13 = vld [vmem:[%s1503_s0 + $0x1f0] sm:$0xff] }
  0x45   :  { %vm267_vm15 = vcmp.ge.f32.partialorder %v203_v12, 0.0  ;;  %v331_v21 = vmul.f32 0.1, %v203_v12  ;;  %v205_v24 = vadd.f32 %v1093_v5, %v134_v18  ;;  %v136_v26 = vmul.f32 %v1086_v2, %v65_v15 }
  0x46   :  { %v394_v23 = vsel %vm266_vm14, %v202_v9, %v330_v17  ;;  %1047 = vst [vmem:[%s1506_s3 + $0xb0] sm:$0xff] %v979_v20   ;;  %vm268_vm0 = vcmp.ge.f32.partialorder %v204_v22, 0.0  ;;  %v332_v29 = vmul.f32 0.1, %v204_v22  ;;  %v137_v30 = vmul.f32 %v1086_v2, %v66_v19  ;;  %v75_v9 = vld [vmem:[%s1503_s0 + $0x1e8] sm:$0xff] }
  0x47   :  { %v395_v28 = vsel %vm267_vm15, %v203_v12, %v331_v21  ;;  %vm269_vm1 = vcmp.ge.f32.partialorder %v205_v24, 0.0  ;;  %v333_v33 = vmul.f32 0.1, %v205_v24  ;;  %v206_v34 = vadd.f32 %v1093_v5, %v135_v25  ;;  %v77_v21 = vld [vmem:[%s1503_s0 + $0x1f8] sm:$0xff] }
  0x48   :  { %v984_v32 = vpack.c.bf16 %v395_v28, %v394_v23  ;;  %v396_v35 = vsel %vm268_vm0, %v204_v22, %v332_v29  ;;  %v207_v36 = vadd.f32 %v1093_v5, %v136_v26  ;;  %v138_v37 = vmul.f32 %v1086_v2, %v67_v27 }
  0x49   :  { %v208_v38 = vadd.f32 %v1093_v5, %v137_v30  ;;  %v397_v40 = vsel %vm269_vm1, %v205_v24, %v333_v33  ;;  %vm270_vm2 = vcmp.ge.f32.partialorder %v206_v34, 0.0  ;;  %v334_v41 = vmul.f32 0.1, %v206_v34 }
  0x4a   :  { %1048 = vst [vmem:[%s1506_s3 + $0xb8] sm:$0xff] %v984_v32   ;;  %v139_v42 = vmul.f32 %v1086_v2, %v68_v31  ;;  %v989_v43 = vpack.c.bf16 %v397_v40, %v396_v35  ;;  %vm271_vm3 = vcmp.ge.f32.partialorder %v207_v36, 0.0  ;;  %v335_v44 = vmul.f32 0.1, %v207_v36 }
  0x4b   :  { %v209_v45 = vadd.f32 %v1093_v5, %v138_v37  ;;  %v398_v47 = vsel %vm270_vm2, %v206_v34, %v334_v41  ;;  %vm272_vm4 = vcmp.ge.f32.partialorder %v208_v38, 0.0  ;;  %v336_v48 = vmul.f32 0.1, %v208_v38 }
  0x4c   :  { %v140_v49 = vmul.f32 %v1086_v2, %v69_v39  ;;  %1049 = vst [vmem:[%s1506_s3 + $0xc0] sm:$0xff] %v989_v43   ;;  %v399_v51 = vsel %vm271_vm3, %v207_v36, %v335_v44  ;;  %v210_v53 = vadd.f32 %v1093_v5, %v139_v42  ;;  %v141_v57 = vmul.f32 %v1086_v2, %v70_v46 }
  0x4d   :  { %vm273_vm5 = vcmp.ge.f32.partialorder %v209_v45, 0.0  ;;  %v337_v52 = vmul.f32 0.1, %v209_v45  ;;  %v994_v54 = vpack.c.bf16 %v399_v51, %v398_v47  ;;  %v400_v55 = vsel %vm272_vm4, %v208_v38, %v336_v48 }
  0x4e   :  { %v211_v56 = vadd.f32 %v1093_v5, %v140_v49  ;;  %vm274_vm6 = vcmp.ge.f32.partialorder %v210_v53, 0.0  ;;  %v338_v61 = vmul.f32 0.1, %v210_v53  ;;  %v142_v62 = vmul.f32 %v1086_v2, %v71_v50 }
  0x4f   :  { %v401_v60 = vsel %vm273_vm5, %v209_v45, %v337_v52  ;;  %1050 = vst [vmem:[%s1506_s3 + $0xc8] sm:$0xff] %v994_v54   ;;  %v212_v3 = vadd.f32 %v1093_v5, %v141_v57  ;;  %v143_v7 = vmul.f32 %v1086_v2, %v72_v58  ;;  %v144_v8 = vmul.f32 %v1086_v2, %v73_v59 }
  0x50   :  { %v999_v0 = vpack.c.bf16 %v401_v60, %v400_v55  ;;  %vm275_vm7 = vcmp.ge.f32.partialorder %v211_v56, 0.0  ;;  %v339_v1 = vmul.f32 0.1, %v211_v56  ;;  %v402_v4 = vsel %vm274_vm6, %v210_v53, %v338_v61 }
  0x51   :  { %v213_v6 = vadd.f32 %v1093_v5, %v142_v62  ;;  %vm276_vm8 = vcmp.ge.f32.partialorder %v212_v3, 0.0  ;;  %v340_v11 = vmul.f32 0.1, %v212_v3  ;;  %v145_v12 = vmul.f32 %v1086_v2, %v74_v63 }
  0x52   :  { %1051 = vst [vmem:[%s1506_s3 + $0xd0] sm:$0xff] %v999_v0   ;;  %v403_v10 = vsel %vm275_vm7, %v211_v56, %v339_v1  ;;  %v214_v16 = vadd.f32 %v1093_v5, %v143_v7  ;;  %v215_v18 = vadd.f32 %v1093_v5, %v144_v8  ;;  %v146_v19 = vmul.f32 %v1086_v2, %v75_v9 }
  0x53   :  { %v1004_v14 = vpack.c.bf16 %v403_v10, %v402_v4  ;;  %vm277_vm9 = vcmp.ge.f32.partialorder %v213_v6, 0.0  ;;  %v341_v15 = vmul.f32 0.1, %v213_v6  ;;  %v404_v17 = vsel %vm276_vm8, %v212_v3, %v340_v11 }
  0x54   :  { %v216_v20 = vadd.f32 %v1093_v5, %v145_v12  ;;  %vm278_vm10 = vcmp.ge.f32.partialorder %v214_v16, 0.0  ;;  %v342_v23 = vmul.f32 0.1, %v214_v16  ;;  %v147_v24 = vmul.f32 %v1086_v2, %v76_v13 }
  0x55   :  { %1052 = vst [vmem:[%s1506_s3 + $0xd8] sm:$0xff] %v1004_v14   ;;  %v405_v22 = vsel %vm277_vm9, %v213_v6, %v341_v15  ;;  %vm279_vm11 = vcmp.ge.f32.partialorder %v215_v18, 0.0  ;;  %v343_v26 = vmul.f32 0.1, %v215_v18  ;;  %v217_v27 = vadd.f32 %v1093_v5, %v146_v19 }
  0x56   :  { %v1009_v25 = vpack.c.bf16 %v405_v22, %v404_v17  ;;  %v406_v28 = vsel %vm278_vm10, %v214_v16, %v342_v23  ;;  %vm280_vm12 = vcmp.ge.f32.partialorder %v216_v20, 0.0  ;;  %v344_v29 = vmul.f32 0.1, %v216_v20 }
  0x57   :  { %v148_v30 = vmul.f32 %v1086_v2, %v77_v21  ;;  %v407_v31 = vsel %vm279_vm11, %v215_v18, %v343_v26  ;;  %vm281_vm13 = vcmp.ge.f32.partialorder %v217_v27, 0.0  ;;  %v345_v32 = vmul.f32 0.1, %v217_v27 }
  0x58   :  { %1053 = vst [vmem:[%s1506_s3 + $0xe0] sm:$0xff] %v1009_v25   ;;  %v218_v33 = vadd.f32 %v1093_v5, %v147_v24  ;;  %v1014_v34 = vpack.c.bf16 %v407_v31, %v406_v28  ;;  %v408_v35 = vsel %vm280_vm12, %v216_v20, %v344_v29 }
  0x59   :  { %v219_v36 = vadd.f32 %v1093_v5, %v148_v30  ;;  %v409_v37 = vsel %vm281_vm13, %v217_v27, %v345_v32 }
  0x5a   :  { %vm282_vm14 = vcmp.ge.f32.partialorder %v218_v33, 0.0  ;;  %v346_v38 = vmul.f32 0.1, %v218_v33  ;;  %1054 = vst [vmem:[%s1506_s3 + $0xe8] sm:$0xff] %v1014_v34   ;;  %v1019_v2 = vpack.c.bf16 %v409_v37, %v408_v35 }
  0x5b   :  { %vm283_vm15 = vcmp.ge.f32.partialorder %v219_v36, 0.0  ;;  %v347_v39 = vmul.f32 0.1, %v219_v36 }
  0x5c   :  { %v410_v40 = vsel %vm282_vm14, %v218_v33, %v346_v38  ;;  %1055 = vst [vmem:[%s1506_s3 + $0xf0] sm:$0xff] %v1019_v2  }
  0x5d   :  { %v411_v41 = vsel %vm283_vm15, %v219_v36, %v347_v39 }
  0x5e   :  { %v1024_v42 = vpack.c.bf16 %v411_v41, %v410_v40 }
  0x60   :  { %1056 = vst [vmem:[%s1506_s3 + $0xf8] sm:$0xff] %v1024_v42  }

// kernel: bottleneckcsp_forward.17
= control target key start
LH: loop header
LB: loop body
LE: loop exit
PB: predicated region body
PF: predicated region fallthrough
CT: control target
= control target key end

     0   :  { %s2146_s0 = inlined_call_operand.vmem [shape: f32[512,128], index: 0, kind: input, shape index: {}]   ;;  %s2147_s1 = inlined_call_operand.vmem [shape: f32[1,128], index: 1, kind: input, shape index: {}]   ;;  %s2148_s2 = inlined_call_operand.vmem [shape: f32[1,128], index: 2, kind: input, shape index: {}]   ;;  %s2149_s3 = inlined_call_operand.vmem [shape: bf16[512,128], index: 3, kind: input, shape index: {}]   ;;  %s2150_s4 = inlined_call_operand.vmem [shape: bf16[512,128], index: 4, kind: output, shape index: {}]  }
   0x1   :  { %v17_v0 = vld [vmem:[%s2146_s0] sm:$0xff]  ;;  %v18_v1 = vld [vmem:[%s2146_s0 + $0x8] sm:$0xff]  ;;  %v19_v7 = vld [vmem:[%s2146_s0 + $0x10] sm:$0xff] }
   0x2   :  { %v1575_v2 = vld [vmem:[%s2147_s1] ss:$0 sm:$0xff]  ;;  %v20_v10 = vld [vmem:[%s2146_s0 + $0x18] sm:$0xff]  ;;  %v1601_v12 = vld [vmem:[%s2149_s3 + $0x8] sm:$0xff]  }
   0x3   :  { %v88_v3 = vmul.f32 %v1575_v2, %v17_v0  ;;  %v89_v4 = vmul.f32 %v1575_v2, %v18_v1  ;;  %v1582_v5 = vld [vmem:[%s2148_s2] ss:$0 sm:$0xff]  ;;  %v90_v11 = vmul.f32 %v1575_v2, %v19_v7  ;;  %v91_v16 = vmul.f32 %v1575_v2, %v20_v10  ;;  %v22_v18 = vld [vmem:[%s2146_s0 + $0x28] sm:$0xff]  ;;  %v1616_v19 = vld [vmem:[%s2149_s3 + $0x10] sm:$0xff]  }
   0x4   :  { %v1587_v6 = vld [vmem:[%s2149_s3] sm:$0xff]   ;;  %v1195_v17 = vunpack.c.l.bf16 %v1601_v12  ;;  %v1196_v21 = vunpack.c.h.bf16 %v1601_v12  ;;  %v93_v23 = vmul.f32 %v1575_v2, %v22_v18  ;;  %v23_v24 = vld [vmem:[%s2146_s0 + $0x30] sm:$0xff]  ;;  %v1199_v28 = vunpack.c.l.bf16 %v1616_v19  ;;  %v24_v29 = vld [vmem:[%s2146_s0 + $0x38] sm:$0xff] }
   0x5   :  { %v1191_v8 = vunpack.c.l.bf16 %v1587_v6  ;;  %v1192_v9 = vunpack.c.h.bf16 %v1587_v6  ;;  %v21_v13 = vld [vmem:[%s2146_s0 + $0x20] sm:$0xff]  ;;  %v159_v14 = vadd.f32 %v1582_v5, %v88_v3  ;;  %v160_v15 = vadd.f32 %v1582_v5, %v89_v4  ;;  %v1479_v3 = vld [vmem:[%s2149_s3 + $0x18] sm:$0xff]  }
   0x6   :  { %v161_v20 = vadd.f32 %v1582_v5, %v90_v11  ;;  %v92_v22 = vmul.f32 %v1575_v2, %v21_v13  ;;  %v162_v27 = vadd.f32 %v1582_v5, %v91_v16  ;;  %v164_v32 = vadd.f32 %v1582_v5, %v93_v23  ;;  %v25_v11 = vld [vmem:[%s2146_s0 + $0x40] sm:$0xff]  ;;  %v26_v16 = vld [vmem:[%s2146_s0 + $0x48] sm:$0xff] }
   0x7   :  { %v223_v25 = vadd.f32 3.0, %v159_v14  ;;  %v224_v26 = vadd.f32 3.0, %v160_v15  ;;  %v1200_v33 = vunpack.c.h.bf16 %v1616_v19  ;;  %v94_v37 = vmul.f32 %v1575_v2, %v23_v24 }
   0x8   :  { %v225_v30 = vadd.f32 3.0, %v161_v20  ;;  %v163_v31 = vadd.f32 %v1582_v5, %v92_v22  ;;  %v226_v36 = vadd.f32 3.0, %v162_v27  ;;  %v228_v40 = vadd.f32 3.0, %v164_v32 }
   0x9   :  { %v287_v34 = vmax.f32 %v223_v25, 0.0  ;;  %v288_v35 = vmax.f32 %v224_v26, 0.0  ;;  %v95_v41 = vmul.f32 %v1575_v2, %v24_v29  ;;  %v165_v45 = vadd.f32 %v1582_v5, %v94_v37  ;;  %v27_v25 = vld [vmem:[%s2146_s0 + $0x50] sm:$0xff] }
   0xa   :  { %v289_v38 = vmax.f32 %v225_v30, 0.0  ;;  %v227_v39 = vadd.f32 3.0, %v163_v31  ;;  %v290_v44 = vmax.f32 %v226_v36, 0.0  ;;  %v292_v48 = vmax.f32 %v228_v40, 0.0  ;;  %v1665_v30 = vld [vmem:[%s2149_s3 + $0x28] sm:$0xff]  }
   0xb   :  { %v351_v42 = vmin.f32 %v287_v34, 6.0  ;;  %v352_v43 = vmin.f32 %v288_v35, 6.0  ;;  %v166_v49 = vadd.f32 %v1582_v5, %v95_v41  ;;  %v229_v53 = vadd.f32 3.0, %v165_v45  ;;  %v29_v35 = vld [vmem:[%s2146_s0 + $0x60] sm:$0xff]  ;;  %v30_v40 = vld [vmem:[%s2146_s0 + $0x68] sm:$0xff]  ;;  %v1684_v41 = vld [vmem:[%s2149_s3 + $0x30] sm:$0xff]  }
   0xc   :  { %v353_v46 = vmin.f32 %v289_v38, 6.0  ;;  %v291_v47 = vmax.f32 %v227_v39, 0.0  ;;  %v354_v52 = vmin.f32 %v290_v44, 6.0  ;;  %v356_v56 = vmin.f32 %v292_v48, 6.0 }
   0xd   :  { %v415_v50 = vmul.f32 %v351_v42, %v159_v14  ;;  %v416_v51 = vmul.f32 %v352_v43, %v160_v15  ;;  %v230_v57 = vadd.f32 3.0, %v166_v49  ;;  %v293_v61 = vmax.f32 %v229_v53, 0.0 }
   0xe   :  { %v417_v54 = vmul.f32 %v353_v46, %v161_v20  ;;  %v355_v55 = vmin.f32 %v291_v47, 6.0  ;;  %v418_v60 = vmul.f32 %v354_v52, %v162_v27  ;;  %v420_v0 = vmul.f32 %v356_v56, %v164_v32 }
   0xf   :  { %v479_v58 = vmul.f32 0.16666667, %v415_v50  ;;  %v480_v59 = vmul.f32 0.16666667, %v416_v51  ;;  %v294_v1 = vmax.f32 %v230_v57, 0.0  ;;  %v357_v10 = vmin.f32 %v293_v61, 6.0 }
  0x10   :  { %v481_v62 = vmul.f32 0.16666667, %v417_v54  ;;  %v419_v63 = vmul.f32 %v355_v55, %v163_v31  ;;  %v482_v7 = vmul.f32 0.16666667, %v418_v60  ;;  %v484_v14 = vmul.f32 0.16666667, %v420_v0 }
  0x11   :  { %v671_v4 = vadd.f32 %v1191_v8, %v479_v58  ;;  %v672_v6 = vadd.f32 %v1192_v9, %v480_v59  ;;  %v358_v15 = vmin.f32 %v294_v1, 6.0  ;;  %v421_v20 = vmul.f32 %v357_v10, %v165_v45  ;;  %v1649_v8 = vld [vmem:[%s2149_s3 + $0x20] sm:$0xff]   ;;  %v31_v50 = vld [vmem:[%s2146_s0 + $0x70] sm:$0xff]  ;;  %v32_v59 = vld [vmem:[%s2146_s0 + $0x78] sm:$0xff] }
  0x12   :  { %v673_v12 = vadd.f32 %v1195_v17, %v481_v62  ;;  %v483_v13 = vmul.f32 0.16666667, %v419_v63  ;;  %v674_v19 = vadd.f32 %v1196_v21, %v482_v7  ;;  %v1203_v22 = vunpack.c.l.bf16 %v1479_v3 }
  0x13   :  { %v1320_v18 = vpack.c.bf16 %v672_v6, %v671_v4  ;;  %v676_v23 = vadd.f32 %v1200_v33, %v484_v14  ;;  %v422_v24 = vmul.f32 %v358_v15, %v166_v49  ;;  %v1204_v17 = vunpack.c.h.bf16 %v1479_v3 }
  0x14   :  { %v675_v9 = vadd.f32 %v1199_v28, %v483_v13  ;;  %v1325_v21 = vpack.c.bf16 %v674_v19, %v673_v12  ;;  %v485_v26 = vmul.f32 0.16666667, %v421_v20  ;;  %v96_v27 = vmul.f32 %v1575_v2, %v25_v11  ;;  %v28_v28 = vld [vmem:[%s2146_s0 + $0x58] sm:$0xff] }
  0x15   :  { %1321 = vst [vmem:[%s2150_s4] sm:$0xff] %v1320_v18   ;;  %v97_v29 = vmul.f32 %v1575_v2, %v26_v16  ;;  %v486_v32 = vmul.f32 0.16666667, %v422_v24  ;;  %v1207_v33 = vunpack.c.l.bf16 %v1649_v8  ;;  %v1208_v34 = vunpack.c.h.bf16 %v1649_v8 }
  0x16   :  { %v1330_v31 = vpack.c.bf16 %v676_v23, %v675_v9  ;;  %1508 = vst [vmem:[%s2150_s4 + $0x8] sm:$0xff] %v1325_v21   ;;  %v677_v36 = vadd.f32 %v1203_v22, %v485_v26  ;;  %v167_v37 = vadd.f32 %v1582_v5, %v96_v27  ;;  %v98_v39 = vmul.f32 %v1575_v2, %v27_v25  ;;  %v1483_v26 = vld [vmem:[%s2149_s3 + $0x38] sm:$0xff]  }
  0x17   :  { %v168_v38 = vadd.f32 %v1582_v5, %v97_v29  ;;  %v678_v42 = vadd.f32 %v1204_v17, %v486_v32  ;;  %v99_v43 = vmul.f32 %v1575_v2, %v28_v28  ;;  %v1211_v44 = vunpack.c.l.bf16 %v1665_v30 }
  0x18   :  { %1509 = vst [vmem:[%s2150_s4 + $0x10] sm:$0xff] %v1330_v31   ;;  %v1212_v45 = vunpack.c.h.bf16 %v1665_v30  ;;  %v231_v46 = vadd.f32 3.0, %v167_v37  ;;  %v169_v48 = vadd.f32 %v1582_v5, %v98_v39  ;;  %v100_v49 = vmul.f32 %v1575_v2, %v29_v35 }
  0x19   :  { %v232_v47 = vadd.f32 3.0, %v168_v38  ;;  %v1335_v51 = vpack.c.bf16 %v678_v42, %v677_v36  ;;  %v170_v52 = vadd.f32 %v1582_v5, %v99_v43  ;;  %v101_v53 = vmul.f32 %v1575_v2, %v30_v40 }
  0x1a   :  { %v1215_v54 = vunpack.c.l.bf16 %v1684_v41  ;;  %v295_v55 = vmax.f32 %v231_v46, 0.0  ;;  %v233_v57 = vadd.f32 3.0, %v169_v48  ;;  %v171_v58 = vadd.f32 %v1582_v5, %v100_v49 }
  0x1b   :  { %v296_v56 = vmax.f32 %v232_v47, 0.0  ;;  %1510 = vst [vmem:[%s2150_s4 + $0x18] sm:$0xff] %v1335_v51   ;;  %v234_v60 = vadd.f32 3.0, %v170_v52  ;;  %v172_v61 = vadd.f32 %v1582_v5, %v101_v53  ;;  %v1216_v62 = vunpack.c.h.bf16 %v1684_v41  ;;  %v1725_v47 = vld [vmem:[%s2149_s3 + $0x40] sm:$0xff]  }
  0x1c   :  { %v102_v63 = vmul.f32 %v1575_v2, %v31_v50  ;;  %v359_v0 = vmin.f32 %v295_v55, 6.0  ;;  %v297_v3 = vmax.f32 %v233_v57, 0.0  ;;  %v235_v4 = vadd.f32 3.0, %v171_v58 }
  0x1d   :  { %v360_v1 = vmin.f32 %v296_v56, 6.0  ;;  %v298_v6 = vmax.f32 %v234_v60, 0.0  ;;  %v236_v7 = vadd.f32 3.0, %v172_v61  ;;  %v103_v10 = vmul.f32 %v1575_v2, %v32_v59  ;;  %v36_v56 = vld [vmem:[%s2146_s0 + $0x98] sm:$0xff]  ;;  %v1744_v59 = vld [vmem:[%s2149_s3 + $0x48] sm:$0xff]   ;;  %v37_v60 = vld [vmem:[%s2146_s0 + $0xa0] sm:$0xff] }
  0x1e   :  { %v173_v11 = vadd.f32 %v1582_v5, %v102_v63  ;;  %v423_v12 = vmul.f32 %v359_v0, %v167_v37  ;;  %v361_v14 = vmin.f32 %v297_v3, 6.0  ;;  %v299_v15 = vmax.f32 %v235_v4, 0.0  ;;  %v33_v37 = vld [vmem:[%s2146_s0 + $0x80] sm:$0xff] }
  0x1f   :  { %v424_v13 = vmul.f32 %v360_v1, %v168_v38  ;;  %v362_v16 = vmin.f32 %v298_v6, 6.0  ;;  %v300_v18 = vmax.f32 %v236_v7, 0.0  ;;  %v174_v19 = vadd.f32 %v1582_v5, %v103_v10  ;;  %v34_v38 = vld [vmem:[%s2146_s0 + $0x88] sm:$0xff] }
  0x20   :  { %v237_v20 = vadd.f32 3.0, %v173_v11  ;;  %v487_v22 = vmul.f32 0.16666667, %v423_v12  ;;  %v425_v9 = vmul.f32 %v361_v14, %v169_v48  ;;  %v363_v23 = vmin.f32 %v299_v15, 6.0  ;;  %v38_v1 = vld [vmem:[%s2146_s0 + $0xa8] sm:$0xff] }
  0x21   :  { %v488_v8 = vmul.f32 0.16666667, %v424_v13  ;;  %v426_v24 = vmul.f32 %v362_v16, %v170_v52  ;;  %v364_v17 = vmin.f32 %v300_v18, 6.0  ;;  %v238_v25 = vadd.f32 3.0, %v174_v19 }
  0x22   :  { %v301_v21 = vmax.f32 %v237_v20, 0.0  ;;  %v679_v27 = vadd.f32 %v1207_v33, %v487_v22  ;;  %v489_v28 = vmul.f32 0.16666667, %v425_v9  ;;  %v427_v30 = vmul.f32 %v363_v23, %v171_v58  ;;  %v39_v20 = vld [vmem:[%s2146_s0 + $0xb0] sm:$0xff] }
  0x23   :  { %v680_v29 = vadd.f32 %v1208_v34, %v488_v8  ;;  %v490_v31 = vmul.f32 0.16666667, %v426_v24  ;;  %v428_v32 = vmul.f32 %v364_v17, %v172_v61  ;;  %v302_v35 = vmax.f32 %v238_v25, 0.0 }
  0x24   :  { %v365_v36 = vmin.f32 %v301_v21, 6.0  ;;  %v681_v40 = vadd.f32 %v1211_v44, %v489_v28  ;;  %v491_v41 = vmul.f32 0.16666667, %v427_v30  ;;  %v1219_v42 = vunpack.c.l.bf16 %v1483_v26 }
  0x25   :  { %v1340_v39 = vpack.c.bf16 %v680_v29, %v679_v27  ;;  %v682_v33 = vadd.f32 %v1212_v45, %v490_v31  ;;  %v492_v34 = vmul.f32 0.16666667, %v428_v32  ;;  %v366_v43 = vmin.f32 %v302_v35, 6.0  ;;  %v35_v45 = vld [vmem:[%s2146_s0 + $0x90] sm:$0xff] }
  0x26   :  { %v429_v46 = vmul.f32 %v365_v36, %v173_v11  ;;  %v683_v48 = vadd.f32 %v1215_v54, %v491_v41  ;;  %v1220_v49 = vunpack.c.h.bf16 %v1483_v26  ;;  %v104_v50 = vmul.f32 %v1575_v2, %v33_v37  ;;  %v40_v26 = vld [vmem:[%s2146_s0 + $0xb8] sm:$0xff] }
  0x27   :  { %1511 = vst [vmem:[%s2150_s4 + $0x20] sm:$0xff] %v1340_v39   ;;  %v105_v44 = vmul.f32 %v1575_v2, %v34_v38  ;;  %v1345_v51 = vpack.c.bf16 %v682_v33, %v681_v40  ;;  %v684_v52 = vadd.f32 %v1216_v62, %v492_v34  ;;  %v430_v53 = vmul.f32 %v366_v43, %v174_v19  ;;  %v1769_v19 = vld [vmem:[%s2149_s3 + $0x50] sm:$0xff]  }
  0x28   :  { %v493_v55 = vmul.f32 0.16666667, %v429_v46  ;;  %v175_v57 = vadd.f32 %v1582_v5, %v104_v50  ;;  %v1223_v58 = vunpack.c.l.bf16 %v1725_v47  ;;  %v106_v0 = vmul.f32 %v1575_v2, %v35_v45 }
  0x29   :  { %v176_v54 = vadd.f32 %v1582_v5, %v105_v44  ;;  %1512 = vst [vmem:[%s2150_s4 + $0x28] sm:$0xff] %v1345_v51   ;;  %v1350_v61 = vpack.c.bf16 %v684_v52, %v683_v48  ;;  %v494_v62 = vmul.f32 0.16666667, %v430_v53  ;;  %v1224_v6 = vunpack.c.h.bf16 %v1725_v47 }
  0x2a   :  { %v685_v63 = vadd.f32 %v1219_v42, %v493_v55  ;;  %v239_v3 = vadd.f32 3.0, %v175_v57  ;;  %v107_v7 = vmul.f32 %v1575_v2, %v36_v56  ;;  %v177_v11 = vadd.f32 %v1582_v5, %v106_v0  ;;  %v1487_v56 = vld [vmem:[%s2149_s3 + $0x58] sm:$0xff]  }
  0x2b   :  { %v240_v4 = vadd.f32 3.0, %v176_v54  ;;  %1513 = vst [vmem:[%s2150_s4 + $0x30] sm:$0xff] %v1350_v61   ;;  %v686_v10 = vadd.f32 %v1220_v49, %v494_v62  ;;  %v1227_v12 = vunpack.c.l.bf16 %v1744_v59  ;;  %v108_v13 = vmul.f32 %v1575_v2, %v37_v60  ;;  %v42_v61 = vld [vmem:[%s2146_s0 + $0xc8] sm:$0xff] }
  0x2c   :  { %v303_v14 = vmax.f32 %v239_v3, 0.0  ;;  %v178_v16 = vadd.f32 %v1582_v5, %v107_v7  ;;  %v109_v18 = vmul.f32 %v1575_v2, %v38_v1  ;;  %v241_v8 = vadd.f32 3.0, %v177_v11 }
  0x2d   :  { %v304_v15 = vmax.f32 %v240_v4, 0.0  ;;  %v1355_v22 = vpack.c.bf16 %v686_v10, %v685_v63  ;;  %v1228_v9 = vunpack.c.h.bf16 %v1744_v59  ;;  %v179_v23 = vadd.f32 %v1582_v5, %v108_v13  ;;  %v1805_v10 = vld [vmem:[%s2149_s3 + $0x60] sm:$0xff]  }
  0x2e   :  { %v367_v24 = vmin.f32 %v303_v14, 6.0  ;;  %v242_v25 = vadd.f32 3.0, %v178_v16  ;;  %v180_v21 = vadd.f32 %v1582_v5, %v109_v18  ;;  %v305_v27 = vmax.f32 %v241_v8, 0.0 }
  0x2f   :  { %v368_v17 = vmin.f32 %v304_v15, 6.0  ;;  %1514 = vst [vmem:[%s2150_s4 + $0x38] sm:$0xff] %v1355_v22   ;;  %v243_v29 = vadd.f32 3.0, %v179_v23  ;;  %v1231_v28 = vunpack.c.l.bf16 %v1769_v19  ;;  %v110_v30 = vmul.f32 %v1575_v2, %v39_v20  ;;  %v43_v15 = vld [vmem:[%s2146_s0 + $0xd0] sm:$0xff] }
  0x30   :  { %v431_v31 = vmul.f32 %v367_v24, %v175_v57  ;;  %v306_v35 = vmax.f32 %v242_v25, 0.0  ;;  %v244_v36 = vadd.f32 3.0, %v180_v21  ;;  %v369_v37 = vmin.f32 %v305_v27, 6.0  ;;  %v41_v57 = vld [vmem:[%s2146_s0 + $0xc0] sm:$0xff] }
  0x31   :  { %v432_v32 = vmul.f32 %v368_v17, %v176_v54  ;;  %v307_v38 = vmax.f32 %v243_v29, 0.0  ;;  %v111_v39 = vmul.f32 %v1575_v2, %v40_v26  ;;  %v181_v40 = vadd.f32 %v1582_v5, %v110_v30  ;;  %v1820_v17 = vld [vmem:[%s2149_s3 + $0x68] sm:$0xff]   ;;  %v45_v29 = vld [vmem:[%s2146_s0 + $0xe0] sm:$0xff] }
  0x32   :  { %v495_v41 = vmul.f32 0.16666667, %v431_v31  ;;  %v370_v33 = vmin.f32 %v306_v35, 6.0  ;;  %v308_v34 = vmax.f32 %v244_v36, 0.0  ;;  %v433_v43 = vmul.f32 %v369_v37, %v177_v11 }
  0x33   :  { %v496_v42 = vmul.f32 0.16666667, %v432_v32  ;;  %v371_v46 = vmin.f32 %v307_v38, 6.0  ;;  %v182_v47 = vadd.f32 %v1582_v5, %v111_v39  ;;  %v245_v48 = vadd.f32 3.0, %v181_v40 }
  0x34   :  { %v687_v49 = vadd.f32 %v1223_v58, %v495_v41  ;;  %v434_v44 = vmul.f32 %v370_v33, %v178_v16  ;;  %v372_v45 = vmin.f32 %v308_v34, 6.0  ;;  %v497_v51 = vmul.f32 0.16666667, %v433_v43  ;;  %v44_v16 = vld [vmem:[%s2146_s0 + $0xd8] sm:$0xff]  ;;  %v1845_v34 = vld [vmem:[%s2149_s3 + $0x70] sm:$0xff]  }
  0x35   :  { %v688_v50 = vadd.f32 %v1224_v6, %v496_v42  ;;  %v435_v52 = vmul.f32 %v371_v46, %v179_v23  ;;  %v246_v53 = vadd.f32 3.0, %v182_v47  ;;  %v309_v55 = vmax.f32 %v245_v48, 0.0 }
  0x36   :  { %v498_v59 = vmul.f32 0.16666667, %v434_v44  ;;  %v436_v60 = vmul.f32 %v372_v45, %v180_v21  ;;  %v1232_v58 = vunpack.c.h.bf16 %v1769_v19  ;;  %v689_v62 = vadd.f32 %v1227_v12, %v497_v51 }
  0x37   :  { %v1360_v54 = vpack.c.bf16 %v688_v50, %v687_v49  ;;  %v499_v63 = vmul.f32 0.16666667, %v435_v52  ;;  %v310_v0 = vmax.f32 %v246_v53, 0.0  ;;  %v373_v1 = vmin.f32 %v309_v55, 6.0  ;;  %v47_v49 = vld [vmem:[%s2146_s0 + $0xf0] sm:$0xff]  ;;  %v48_v52 = vld [vmem:[%s2146_s0 + $0xf8] sm:$0xff] }
  0x38   :  { %v690_v3 = vadd.f32 %v1228_v9, %v498_v59  ;;  %v500_v4 = vmul.f32 0.16666667, %v436_v60  ;;  %v1235_v6 = vunpack.c.l.bf16 %v1487_v56  ;;  %v112_v7 = vmul.f32 %v1575_v2, %v41_v57 }
  0x39   :  { %1515 = vst [vmem:[%s2150_s4 + $0x40] sm:$0xff] %v1360_v54   ;;  %v691_v11 = vadd.f32 %v1231_v28, %v499_v63  ;;  %v374_v13 = vmin.f32 %v310_v0, 6.0  ;;  %v437_v12 = vmul.f32 %v373_v1, %v181_v40  ;;  %v113_v14 = vmul.f32 %v1575_v2, %v42_v61  ;;  %v46_v28 = vld [vmem:[%s2146_s0 + $0xe8] sm:$0xff] }
  0x3a   :  { %v1365_v18 = vpack.c.bf16 %v690_v3, %v689_v62  ;;  %v692_v19 = vadd.f32 %v1232_v58, %v500_v4  ;;  %v1236_v20 = vunpack.c.h.bf16 %v1487_v56  ;;  %v183_v22 = vadd.f32 %v1582_v5, %v112_v7 }
  0x3b   :  { %v438_v8 = vmul.f32 %v374_v13, %v182_v47  ;;  %v501_v9 = vmul.f32 0.16666667, %v437_v12  ;;  %v184_v23 = vadd.f32 %v1582_v5, %v113_v14  ;;  %v1239_v24 = vunpack.c.l.bf16 %v1805_v10 }
  0x3c   :  { %1516 = vst [vmem:[%s2150_s4 + $0x48] sm:$0xff] %v1365_v18   ;;  %v1370_v25 = vpack.c.bf16 %v692_v19, %v691_v11  ;;  %v247_v21 = vadd.f32 3.0, %v183_v22  ;;  %v114_v26 = vmul.f32 %v1575_v2, %v43_v15  ;;  %v115_v27 = vmul.f32 %v1575_v2, %v44_v16 }
  0x3d   :  { %v502_v30 = vmul.f32 0.16666667, %v438_v8  ;;  %v693_v31 = vadd.f32 %v1235_v6, %v501_v9  ;;  %v248_v32 = vadd.f32 3.0, %v184_v23  ;;  %v1240_v35 = vunpack.c.h.bf16 %v1805_v10  ;;  %v49_v8 = vld [vmem:[%s2146_s0 + $0x100] sm:$0xff] }
  0x3e   :  { %1517 = vst [vmem:[%s2150_s4 + $0x50] sm:$0xff] %v1370_v25   ;;  %v311_v36 = vmax.f32 %v247_v21, 0.0  ;;  %v185_v37 = vadd.f32 %v1582_v5, %v114_v26  ;;  %v186_v38 = vadd.f32 %v1582_v5, %v115_v27  ;;  %v1243_v39 = vunpack.c.l.bf16 %v1820_v17  ;;  %v1491_v25 = vld [vmem:[%s2149_s3 + $0x78] sm:$0xff]   ;;  %v50_v21 = vld [vmem:[%s2146_s0 + $0x108] sm:$0xff] }
  0x3f   :  { %v694_v40 = vadd.f32 %v1236_v20, %v502_v30  ;;  %v312_v41 = vmax.f32 %v248_v32, 0.0  ;;  %v116_v42 = vmul.f32 %v1575_v2, %v45_v29  ;;  %v117_v33 = vmul.f32 %v1575_v2, %v46_v28 }
  0x40   :  { %v375_v43 = vmin.f32 %v311_v36, 6.0  ;;  %v249_v46 = vadd.f32 3.0, %v185_v37  ;;  %v250_v47 = vadd.f32 3.0, %v186_v38  ;;  %v1244_v48 = vunpack.c.h.bf16 %v1820_v17 }
  0x41   :  { %v1375_v50 = vpack.c.bf16 %v694_v40, %v693_v31  ;;  %v376_v44 = vmin.f32 %v312_v41, 6.0  ;;  %v187_v45 = vadd.f32 %v1582_v5, %v116_v42  ;;  %v188_v51 = vadd.f32 %v1582_v5, %v117_v33  ;;  %v52_v40 = vld [vmem:[%s2146_s0 + $0x118] sm:$0xff] }
  0x42   :  { %v439_v53 = vmul.f32 %v375_v43, %v183_v22  ;;  %v313_v55 = vmax.f32 %v249_v46, 0.0  ;;  %v314_v56 = vmax.f32 %v250_v47, 0.0  ;;  %v1247_v57 = vunpack.c.l.bf16 %v1845_v34  ;;  %v1492_v43 = vld [vmem:[%s2149_s3 + $0x80] sm:$0xff]  }
  0x43   :  { %1518 = vst [vmem:[%s2150_s4 + $0x58] sm:$0xff] %v1375_v50   ;;  %v440_v54 = vmul.f32 %v376_v44, %v184_v23  ;;  %v251_v59 = vadd.f32 3.0, %v187_v45  ;;  %v252_v60 = vadd.f32 3.0, %v188_v51  ;;  %v118_v58 = vmul.f32 %v1575_v2, %v47_v49 }
  0x44   :  { %v503_v61 = vmul.f32 0.16666667, %v439_v53  ;;  %v377_v62 = vmin.f32 %v313_v55, 6.0  ;;  %v378_v63 = vmin.f32 %v314_v56, 6.0  ;;  %v119_v0 = vmul.f32 %v1575_v2, %v48_v52  ;;  %v53_v52 = vld [vmem:[%s2146_s0 + $0x120] sm:$0xff] }
  0x45   :  { %v504_v1 = vmul.f32 0.16666667, %v440_v54  ;;  %v315_v3 = vmax.f32 %v251_v59, 0.0  ;;  %v316_v4 = vmax.f32 %v252_v60, 0.0  ;;  %v189_v6 = vadd.f32 %v1582_v5, %v118_v58  ;;  %v1493_v54 = vld [vmem:[%s2149_s3 + $0x88] sm:$0xff]  }
  0x46   :  { %v695_v7 = vadd.f32 %v1239_v24, %v503_v61  ;;  %v441_v10 = vmul.f32 %v377_v62, %v185_v37  ;;  %v442_v11 = vmul.f32 %v378_v63, %v186_v38  ;;  %v190_v13 = vadd.f32 %v1582_v5, %v119_v0  ;;  %v54_v59 = vld [vmem:[%s2146_s0 + $0x128] sm:$0xff] }
  0x47   :  { %v696_v12 = vadd.f32 %v1240_v35, %v504_v1  ;;  %v379_v14 = vmin.f32 %v315_v3, 6.0  ;;  %v380_v15 = vmin.f32 %v316_v4, 6.0  ;;  %v253_v16 = vadd.f32 3.0, %v189_v6  ;;  %v51_v35 = vld [vmem:[%s2146_s0 + $0x110] sm:$0xff] }
  0x48   :  { %v505_v18 = vmul.f32 0.16666667, %v441_v10  ;;  %v506_v19 = vmul.f32 0.16666667, %v442_v11  ;;  %v1248_v20 = vunpack.c.h.bf16 %v1845_v34  ;;  %v254_v22 = vadd.f32 3.0, %v190_v13  ;;  %v55_v11 = vld [vmem:[%s2146_s0 + $0x130] sm:$0xff] }
  0x49   :  { %v1380_v9 = vpack.c.bf16 %v696_v12, %v695_v7  ;;  %v443_v23 = vmul.f32 %v379_v14, %v187_v45  ;;  %v444_v24 = vmul.f32 %v380_v15, %v188_v51  ;;  %v317_v17 = vmax.f32 %v253_v16, 0.0  ;;  %v56_v16 = vld [vmem:[%s2146_s0 + $0x138] sm:$0xff] }
  0x4a   :  { %v697_v26 = vadd.f32 %v1243_v39, %v505_v18  ;;  %v698_v27 = vadd.f32 %v1244_v48, %v506_v19  ;;  %v318_v29 = vmax.f32 %v254_v22, 0.0  ;;  %v120_v32 = vmul.f32 %v1575_v2, %v49_v8 }
  0x4b   :  { %1519 = vst [vmem:[%s2150_s4 + $0x60] sm:$0xff] %v1380_v9   ;;  %v507_v28 = vmul.f32 0.16666667, %v443_v23  ;;  %v508_v30 = vmul.f32 0.16666667, %v444_v24  ;;  %v381_v31 = vmin.f32 %v317_v17, 6.0  ;;  %v1251_v38 = vunpack.c.l.bf16 %v1491_v25 }
  0x4c   :  { %v1385_v36 = vpack.c.bf16 %v698_v27, %v697_v26  ;;  %v382_v37 = vmin.f32 %v318_v29, 6.0  ;;  %v121_v39 = vmul.f32 %v1575_v2, %v50_v21  ;;  %v191_v34 = vadd.f32 %v1582_v5, %v120_v32 }
  0x4d   :  { %v699_v41 = vadd.f32 %v1247_v57, %v507_v28  ;;  %v700_v42 = vadd.f32 %v1248_v20, %v508_v30  ;;  %v445_v33 = vmul.f32 %v381_v31, %v189_v6  ;;  %v1252_v47 = vunpack.c.h.bf16 %v1491_v25  ;;  %v1494_v30 = vld [vmem:[%s2149_s3 + $0x90] sm:$0xff]  }
  0x4e   :  { %1520 = vst [vmem:[%s2150_s4 + $0x68] sm:$0xff] %v1385_v36   ;;  %v446_v46 = vmul.f32 %v382_v37, %v190_v13  ;;  %v192_v48 = vadd.f32 %v1582_v5, %v121_v39  ;;  %v122_v49 = vmul.f32 %v1575_v2, %v51_v35  ;;  %v255_v45 = vadd.f32 3.0, %v191_v34 }
  0x4f   :  { %v1390_v50 = vpack.c.bf16 %v700_v42, %v699_v41  ;;  %v509_v44 = vmul.f32 0.16666667, %v445_v33  ;;  %v123_v51 = vmul.f32 %v1575_v2, %v52_v40  ;;  %v1255_v56 = vunpack.c.l.bf16 %v1492_v43 }
  0x50   :  { %v510_v53 = vmul.f32 0.16666667, %v446_v46  ;;  %v256_v55 = vadd.f32 3.0, %v192_v48  ;;  %v193_v57 = vadd.f32 %v1582_v5, %v122_v49  ;;  %v319_v58 = vmax.f32 %v255_v45, 0.0  ;;  %v57_v46 = vld [vmem:[%s2146_s0 + $0x140] sm:$0xff]  ;;  %v1495_v45 = vld [vmem:[%s2149_s3 + $0x98] sm:$0xff]  }
  0x51   :  { %1521 = vst [vmem:[%s2150_s4 + $0x70] sm:$0xff] %v1390_v50   ;;  %v701_v60 = vadd.f32 %v1251_v38, %v509_v44  ;;  %v1256_v61 = vunpack.c.h.bf16 %v1492_v43  ;;  %v194_v62 = vadd.f32 %v1582_v5, %v123_v51  ;;  %v124_v3 = vmul.f32 %v1575_v2, %v53_v52 }
  0x52   :  { %v702_v63 = vadd.f32 %v1252_v47, %v510_v53  ;;  %v320_v0 = vmax.f32 %v256_v55, 0.0  ;;  %v257_v1 = vadd.f32 3.0, %v193_v57  ;;  %v383_v4 = vmin.f32 %v319_v58, 6.0  ;;  %v58_v47 = vld [vmem:[%s2146_s0 + $0x148] sm:$0xff] }
  0x53   :  { %v258_v6 = vadd.f32 3.0, %v194_v62  ;;  %v1259_v7 = vunpack.c.l.bf16 %v1493_v54  ;;  %v125_v10 = vmul.f32 %v1575_v2, %v54_v59  ;;  %v195_v15 = vadd.f32 %v1582_v5, %v124_v3 }
  0x54   :  { %v1395_v13 = vpack.c.bf16 %v702_v63, %v701_v60  ;;  %v384_v12 = vmin.f32 %v320_v0, 6.0  ;;  %v321_v14 = vmax.f32 %v257_v1, 0.0  ;;  %v447_v18 = vmul.f32 %v383_v4, %v191_v34  ;;  %v59_v60 = vld [vmem:[%s2146_s0 + $0x150] sm:$0xff]  ;;  %v60_v0 = vld [vmem:[%s2146_s0 + $0x158] sm:$0xff] }
  0x55   :  { %v322_v19 = vmax.f32 %v258_v6, 0.0  ;;  %v1260_v20 = vunpack.c.h.bf16 %v1493_v54  ;;  %v196_v22 = vadd.f32 %v1582_v5, %v125_v10  ;;  %v259_v23 = vadd.f32 3.0, %v195_v15 }
  0x56   :  { %1522 = vst [vmem:[%s2150_s4 + $0x78] sm:$0xff] %v1395_v13   ;;  %v448_v8 = vmul.f32 %v384_v12, %v192_v48  ;;  %v385_v9 = vmin.f32 %v321_v14, 6.0  ;;  %v126_v24 = vmul.f32 %v1575_v2, %v55_v11  ;;  %v511_v17 = vmul.f32 0.16666667, %v447_v18 }
  0x57   :  { %v386_v25 = vmin.f32 %v322_v19, 6.0  ;;  %v260_v21 = vadd.f32 3.0, %v196_v22  ;;  %v127_v26 = vmul.f32 %v1575_v2, %v56_v16  ;;  %v323_v28 = vmax.f32 %v259_v23, 0.0  ;;  %v61_v19 = vld [vmem:[%s2146_s0 + $0x160] sm:$0xff]  ;;  %v62_v23 = vld [vmem:[%s2146_s0 + $0x168] sm:$0xff] }
  0x58   :  { %v512_v27 = vmul.f32 0.16666667, %v448_v8  ;;  %v449_v29 = vmul.f32 %v385_v9, %v193_v57  ;;  %v197_v31 = vadd.f32 %v1582_v5, %v126_v24  ;;  %v703_v32 = vadd.f32 %v1255_v56, %v511_v17 }
  0x59   :  { %v450_v35 = vmul.f32 %v386_v25, %v194_v62  ;;  %v324_v36 = vmax.f32 %v260_v21, 0.0  ;;  %v198_v37 = vadd.f32 %v1582_v5, %v127_v26  ;;  %v387_v40 = vmin.f32 %v323_v28, 6.0  ;;  %v1497_v26 = vld [vmem:[%s2149_s3 + $0xa8] sm:$0xff]  }
  0x5a   :  { %v704_v38 = vadd.f32 %v1256_v61, %v512_v27  ;;  %v513_v39 = vmul.f32 0.16666667, %v449_v29  ;;  %v261_v41 = vadd.f32 3.0, %v197_v31  ;;  %v1263_v34 = vunpack.c.l.bf16 %v1494_v30 }
  0x5b   :  { %v514_v42 = vmul.f32 0.16666667, %v450_v35  ;;  %v388_v33 = vmin.f32 %v324_v36, 6.0  ;;  %v262_v43 = vadd.f32 3.0, %v198_v37  ;;  %v451_v50 = vmul.f32 %v387_v40, %v195_v15 }
  0x5c   :  { %v1400_v48 = vpack.c.bf16 %v704_v38, %v703_v32  ;;  %v705_v49 = vadd.f32 %v1259_v7, %v513_v39  ;;  %v325_v44 = vmax.f32 %v261_v41, 0.0  ;;  %v1264_v53 = vunpack.c.h.bf16 %v1494_v30  ;;  %v1496_v7 = vld [vmem:[%s2149_s3 + $0xa0] sm:$0xff]  }
  0x5d   :  { %v706_v51 = vadd.f32 %v1260_v20, %v514_v42  ;;  %v452_v52 = vmul.f32 %v388_v33, %v196_v22  ;;  %v326_v55 = vmax.f32 %v262_v43, 0.0  ;;  %v515_v56 = vmul.f32 0.16666667, %v451_v50 }
  0x5e   :  { %1523 = vst [vmem:[%s2150_s4 + $0x80] sm:$0xff] %v1400_v48   ;;  %v389_v57 = vmin.f32 %v325_v44, 6.0  ;;  %v128_v54 = vmul.f32 %v1575_v2, %v57_v46  ;;  %v129_v59 = vmul.f32 %v1575_v2, %v58_v47  ;;  %v1267_v63 = vunpack.c.l.bf16 %v1495_v45  ;;  %v64_v46 = vld [vmem:[%s2146_s0 + $0x178] sm:$0xff] }
  0x5f   :  { %v1405_v58 = vpack.c.bf16 %v706_v51, %v705_v49  ;;  %v516_v61 = vmul.f32 0.16666667, %v452_v52  ;;  %v390_v62 = vmin.f32 %v326_v55, 6.0  ;;  %v707_v1 = vadd.f32 %v1263_v34, %v515_v56  ;;  %v1498_v56 = vld [vmem:[%s2149_s3 + $0xb0] sm:$0xff]  }
  0x60   :  { %v453_v3 = vmul.f32 %v389_v57, %v197_v31  ;;  %v199_v4 = vadd.f32 %v1582_v5, %v128_v54  ;;  %v200_v6 = vadd.f32 %v1582_v5, %v129_v59  ;;  %v1268_v13 = vunpack.c.h.bf16 %v1495_v45 }
  0x61   :  { %1524 = vst [vmem:[%s2150_s4 + $0x88] sm:$0xff] %v1405_v58   ;;  %v708_v10 = vadd.f32 %v1264_v53, %v516_v61  ;;  %v454_v11 = vmul.f32 %v390_v62, %v198_v37  ;;  %v130_v12 = vmul.f32 %v1575_v2, %v59_v60  ;;  %v131_v18 = vmul.f32 %v1575_v2, %v60_v0  ;;  %v63_v37 = vld [vmem:[%s2146_s0 + $0x170] sm:$0xff]  ;;  %v1995_v0 = vld [vmem:[%s2148_s2] ss:$0 sm:$0xff] }
  0x62   :  { %v517_v14 = vmul.f32 0.16666667, %v453_v3  ;;  %v263_v15 = vadd.f32 3.0, %v199_v4  ;;  %v264_v16 = vadd.f32 3.0, %v200_v6  ;;  %v1271_v8 = vunpack.c.l.bf16 %v1496_v7 }
  0x63   :  { %v1410_v20 = vpack.c.bf16 %v708_v10, %v707_v1  ;;  %v518_v22 = vmul.f32 0.16666667, %v454_v11  ;;  %v201_v9 = vadd.f32 %v1582_v5, %v130_v12  ;;  %v202_v21 = vadd.f32 %v1582_v5, %v131_v18  ;;  %v66_v10 = vld [vmem:[%s2146_s0 + $0x188] sm:$0xff] }
  0x64   :  { %v709_v24 = vadd.f32 %v1267_v63, %v517_v14  ;;  %v327_v17 = vmax.f32 %v263_v15, 0.0  ;;  %v328_v25 = vmax.f32 %v264_v16, 0.0  ;;  %v1272_v29 = vunpack.c.h.bf16 %v1496_v7  ;;  %v1499_v15 = vld [vmem:[%s2149_s3 + $0xb8] sm:$0xff]  }
  0x65   :  { %1525 = vst [vmem:[%s2150_s4 + $0x90] sm:$0xff] %v1410_v20   ;;  %v710_v27 = vadd.f32 %v1268_v13, %v518_v22  ;;  %v265_v28 = vadd.f32 3.0, %v201_v9  ;;  %v132_v30 = vmul.f32 %v1575_v2, %v61_v19  ;;  %v266_v35 = vadd.f32 3.0, %v202_v21  ;;  %v2013_v20 = vld [vmem:[%s2147_s1] ss:$0 sm:$0xff] }
  0x66   :  { %v391_v31 = vmin.f32 %v327_v17, 6.0  ;;  %v392_v32 = vmin.f32 %v328_v25, 6.0  ;;  %v133_v36 = vmul.f32 %v1575_v2, %v62_v23  ;;  %v1275_v40 = vunpack.c.l.bf16 %v1497_v26  ;;  %v67_v17 = vld [vmem:[%s2146_s0 + $0x190] sm:$0xff] }
  0x67   :  { %v1415_v38 = vpack.c.bf16 %v710_v27, %v709_v24  ;;  %v329_v39 = vmax.f32 %v265_v28, 0.0  ;;  %v203_v41 = vadd.f32 %v1582_v5, %v132_v30  ;;  %v330_v34 = vmax.f32 %v266_v35, 0.0  ;;  %v1500_v35 = vld [vmem:[%s2149_s3 + $0xc0] sm:$0xff]  }
  0x68   :  { %v455_v42 = vmul.f32 %v391_v31, %v199_v4  ;;  %v456_v33 = vmul.f32 %v392_v32, %v200_v6  ;;  %v204_v43 = vadd.f32 %v1582_v5, %v133_v36  ;;  %v1276_v48 = vunpack.c.h.bf16 %v1497_v26 }
  0x69   :  { %1526 = vst [vmem:[%s2150_s4 + $0x98] sm:$0xff] %v1415_v38   ;;  %v393_v47 = vmin.f32 %v329_v39, 6.0  ;;  %v267_v49 = vadd.f32 3.0, %v203_v41  ;;  %v134_v50 = vmul.f32 %v1575_v2, %v63_v37  ;;  %v394_v51 = vmin.f32 %v330_v34, 6.0  ;;  %v69_v34 = vld [vmem:[%s2146_s0 + $0x1a0] sm:$0xff] }
  0x6a   :  { %v519_v44 = vmul.f32 0.16666667, %v455_v42  ;;  %v520_v45 = vmul.f32 0.16666667, %v456_v33  ;;  %v268_v52 = vadd.f32 3.0, %v204_v43  ;;  %v135_v57 = vmul.f32 %v1575_v2, %v64_v46  ;;  %v65_v2 = vld [vmem:[%s2146_s0 + $0x180] sm:$0xff] }
  0x6b   :  { %v457_v53 = vmul.f32 %v393_v47, %v201_v9  ;;  %v331_v55 = vmax.f32 %v267_v49, 0.0  ;;  %v205_v54 = vadd.f32 %v1582_v5, %v134_v50  ;;  %v458_v58 = vmul.f32 %v394_v51, %v202_v21  ;;  %v70_v49 = vld [vmem:[%s2146_s0 + $0x1a8] sm:$0xff] }
  0x6c   :  { %v711_v59 = vadd.f32 %v1271_v8, %v519_v44  ;;  %v712_v60 = vadd.f32 %v1272_v29, %v520_v45  ;;  %v332_v61 = vmax.f32 %v268_v52, 0.0  ;;  %v206_v1 = vadd.f32 %v1995_v0, %v135_v57  ;;  %v68_v29 = vld [vmem:[%s2146_s0 + $0x198] sm:$0xff]  ;;  %v1501_v52 = vld [vmem:[%s2149_s3 + $0xc8] sm:$0xff]  }
  0x6d   :  { %v521_v62 = vmul.f32 0.16666667, %v457_v53  ;;  %v395_v63 = vmin.f32 %v331_v55, 6.0  ;;  %v269_v3 = vadd.f32 3.0, %v205_v54  ;;  %v522_v5 = vmul.f32 0.16666667, %v458_v58 }
  0x6e   :  { %v1420_v4 = vpack.c.bf16 %v712_v60, %v711_v59  ;;  %v396_v6 = vmin.f32 %v332_v61, 6.0  ;;  %v1279_v7 = vunpack.c.l.bf16 %v1498_v56  ;;  %v270_v12 = vadd.f32 3.0, %v206_v1 }
  0x6f   :  { %v713_v11 = vadd.f32 %v1275_v40, %v521_v62  ;;  %v459_v13 = vmul.f32 %v395_v63, %v203_v41  ;;  %v333_v14 = vmax.f32 %v269_v3, 0.0  ;;  %v714_v16 = vadd.f32 %v1276_v48, %v522_v5  ;;  %v71_v3 = vld [vmem:[%s2146_s0 + $0x1b0] sm:$0xff] }
  0x70   :  { %1527 = vst [vmem:[%s2150_s4 + $0xa0] sm:$0xff] %v1420_v4   ;;  %v460_v18 = vmul.f32 %v396_v6, %v204_v43  ;;  %v1280_v19 = vunpack.c.h.bf16 %v1498_v56  ;;  %v136_v22 = vmul.f32 %v2013_v20, %v65_v2  ;;  %v334_v9 = vmax.f32 %v270_v12, 0.0 }
  0x71   :  { %v523_v8 = vmul.f32 0.16666667, %v459_v13  ;;  %v397_v23 = vmin.f32 %v333_v14, 6.0  ;;  %v137_v24 = vmul.f32 %v2013_v20, %v66_v10  ;;  %v1425_v25 = vpack.c.bf16 %v714_v16, %v713_v11 }
  0x72   :  { %v524_v21 = vmul.f32 0.16666667, %v460_v18  ;;  %v1283_v26 = vunpack.c.l.bf16 %v1499_v15  ;;  %v207_v27 = vadd.f32 %v1995_v0, %v136_v22  ;;  %v398_v30 = vmin.f32 %v334_v9, 6.0  ;;  %v1502_v18 = vld [vmem:[%s2149_s3 + $0xd0] sm:$0xff]  }
  0x73   :  { %v715_v28 = vadd.f32 %v1279_v7, %v523_v8  ;;  %v461_v31 = vmul.f32 %v397_v23, %v205_v54  ;;  %v208_v32 = vadd.f32 %v1995_v0, %v137_v24  ;;  %1528 = vst [vmem:[%s2150_s4 + $0xa8] sm:$0xff] %v1425_v25   ;;  %v1284_v37 = vunpack.c.h.bf16 %v1499_v15  ;;  %v72_v7 = vld [vmem:[%s2146_s0 + $0x1b8] sm:$0xff] }
  0x74   :  { %v716_v36 = vadd.f32 %v1280_v19, %v524_v21  ;;  %v271_v38 = vadd.f32 3.0, %v207_v27  ;;  %v138_v39 = vmul.f32 %v2013_v20, %v67_v17  ;;  %v462_v40 = vmul.f32 %v398_v30, %v206_v1  ;;  %v73_v30 = vld [vmem:[%s2146_s0 + $0x1c0] sm:$0xff] }
  0x75   :  { %v525_v41 = vmul.f32 0.16666667, %v461_v31  ;;  %v272_v42 = vadd.f32 3.0, %v208_v32  ;;  %v139_v33 = vmul.f32 %v2013_v20, %v68_v29  ;;  %v1287_v47 = vunpack.c.l.bf16 %v1500_v35 }
  0x76   :  { %v1430_v43 = vpack.c.bf16 %v716_v36, %v715_v28  ;;  %v335_v46 = vmax.f32 %v271_v38, 0.0  ;;  %v209_v48 = vadd.f32 %v1995_v0, %v138_v39  ;;  %v526_v50 = vmul.f32 0.16666667, %v462_v40  ;;  %v74_v38 = vld [vmem:[%s2146_s0 + $0x1c8] sm:$0xff] }
  0x77   :  { %v717_v44 = vadd.f32 %v1283_v26, %v525_v41  ;;  %v336_v45 = vmax.f32 %v272_v42, 0.0  ;;  %v210_v51 = vadd.f32 %v1995_v0, %v139_v33  ;;  %v1288_v55 = vunpack.c.h.bf16 %v1500_v35 }
  0x78   :  { %1529 = vst [vmem:[%s2150_s4 + $0xb0] sm:$0xff] %v1430_v43   ;;  %v399_v53 = vmin.f32 %v335_v46, 6.0  ;;  %v273_v56 = vadd.f32 3.0, %v209_v48  ;;  %v140_v57 = vmul.f32 %v2013_v20, %v69_v34  ;;  %v718_v54 = vadd.f32 %v1284_v37, %v526_v50  ;;  %v1503_v37 = vld [vmem:[%s2149_s3 + $0xd8] sm:$0xff]  }
  0x79   :  { %v400_v59 = vmin.f32 %v336_v45, 6.0  ;;  %v274_v60 = vadd.f32 3.0, %v210_v51  ;;  %v141_v58 = vmul.f32 %v2013_v20, %v70_v49  ;;  %v1291_v63 = vunpack.c.l.bf16 %v1501_v52 }
  0x7a   :  { %v463_v61 = vmul.f32 %v399_v53, %v207_v27  ;;  %v337_v62 = vmax.f32 %v273_v56, 0.0  ;;  %v211_v1 = vadd.f32 %v1995_v0, %v140_v57  ;;  %v1435_v2 = vpack.c.bf16 %v718_v54, %v717_v44  ;;  %v75_v44 = vld [vmem:[%s2146_s0 + $0x1d0] sm:$0xff]  ;;  %v76_v56 = vld [vmem:[%s2146_s0 + $0x1d8] sm:$0xff] }
  0x7b   :  { %v464_v4 = vmul.f32 %v400_v59, %v208_v32  ;;  %v338_v5 = vmax.f32 %v274_v60, 0.0  ;;  %v212_v6 = vadd.f32 %v1995_v0, %v141_v58  ;;  %v1292_v13 = vunpack.c.h.bf16 %v1501_v52 }
  0x7c   :  { %v527_v10 = vmul.f32 0.16666667, %v463_v61  ;;  %v401_v11 = vmin.f32 %v337_v62, 6.0  ;;  %v275_v12 = vadd.f32 3.0, %v211_v1  ;;  %1530 = vst [vmem:[%s2150_s4 + $0xb8] sm:$0xff] %v1435_v2   ;;  %v142_v19 = vmul.f32 %v2013_v20, %v71_v3 }
  0x7d   :  { %v528_v14 = vmul.f32 0.16666667, %v464_v4  ;;  %v402_v15 = vmin.f32 %v338_v5, 6.0  ;;  %v276_v16 = vadd.f32 3.0, %v212_v6  ;;  %v143_v23 = vmul.f32 %v2013_v20, %v72_v7  ;;  %v77_v5 = vld [vmem:[%s2146_s0 + $0x1e0] sm:$0xff] }
  0x7e   :  { %v719_v22 = vadd.f32 %v1287_v47, %v527_v10  ;;  %v465_v8 = vmul.f32 %v401_v11, %v209_v48  ;;  %v339_v9 = vmax.f32 %v275_v12, 0.0  ;;  %v213_v21 = vadd.f32 %v1995_v0, %v142_v19 }
  0x7f   :  { %v720_v24 = vadd.f32 %v1288_v55, %v528_v14  ;;  %v466_v17 = vmul.f32 %v402_v15, %v210_v51  ;;  %v340_v25 = vmax.f32 %v276_v16, 0.0  ;;  %v1295_v29 = vunpack.c.l.bf16 %v1502_v18  ;;  %v1504_v55 = vld [vmem:[%s2149_s3 + $0xe0] sm:$0xff]  }
  0x80   :  { %v529_v26 = vmul.f32 0.16666667, %v465_v8  ;;  %v403_v27 = vmin.f32 %v339_v9, 6.0  ;;  %v214_v28 = vadd.f32 %v1995_v0, %v143_v23  ;;  %v277_v36 = vadd.f32 3.0, %v213_v21 }
  0x81   :  { %v1440_v31 = vpack.c.bf16 %v720_v24, %v719_v22  ;;  %v530_v32 = vmul.f32 0.16666667, %v466_v17  ;;  %v404_v35 = vmin.f32 %v340_v25, 6.0  ;;  %v1296_v41 = vunpack.c.h.bf16 %v1502_v18  ;;  %v1505_v18 = vld [vmem:[%s2149_s3 + $0xe8] sm:$0xff]  }
  0x82   :  { %v721_v39 = vadd.f32 %v1291_v63, %v529_v26  ;;  %v467_v40 = vmul.f32 %v403_v27, %v211_v1  ;;  %v278_v42 = vadd.f32 3.0, %v214_v28  ;;  %v341_v43 = vmax.f32 %v277_v36, 0.0  ;;  %v80_v36 = vld [vmem:[%s2146_s0 + $0x1f8] sm:$0xff] }
  0x83   :  { %1531 = vst [vmem:[%s2150_s4 + $0xc0] sm:$0xff] %v1440_v31   ;;  %v722_v33 = vadd.f32 %v1292_v13, %v530_v32  ;;  %v468_v34 = vmul.f32 %v404_v35, %v212_v6  ;;  %v144_v46 = vmul.f32 %v2013_v20, %v73_v30  ;;  %v1299_v49 = vunpack.c.l.bf16 %v1503_v37  ;;  %v78_v13 = vld [vmem:[%s2146_s0 + $0x1e8] sm:$0xff] }
  0x84   :  { %v531_v47 = vmul.f32 0.16666667, %v467_v40  ;;  %v342_v48 = vmax.f32 %v278_v42, 0.0  ;;  %v145_v50 = vmul.f32 %v2013_v20, %v74_v38  ;;  %v405_v52 = vmin.f32 %v341_v43, 6.0 }
  0x85   :  { %v1445_v45 = vpack.c.bf16 %v722_v33, %v721_v39  ;;  %v532_v51 = vmul.f32 0.16666667, %v468_v34  ;;  %v215_v53 = vadd.f32 %v1995_v0, %v144_v46  ;;  %v1300_v59 = vunpack.c.h.bf16 %v1503_v37 }
  0x86   :  { %v723_v57 = vadd.f32 %v1295_v29, %v531_v47  ;;  %v406_v54 = vmin.f32 %v342_v48, 6.0  ;;  %v216_v60 = vadd.f32 %v1995_v0, %v145_v50  ;;  %v469_v61 = vmul.f32 %v405_v52, %v213_v21 }
  0x87   :  { %1532 = vst [vmem:[%s2150_s4 + $0xc8] sm:$0xff] %v1445_v45   ;;  %v724_v58 = vadd.f32 %v1296_v41, %v532_v51  ;;  %v279_v62 = vadd.f32 3.0, %v215_v53  ;;  %v146_v63 = vmul.f32 %v2013_v20, %v75_v44  ;;  %v1303_v2 = vunpack.c.l.bf16 %v1504_v55  ;;  %v1506_v45 = vld [vmem:[%s2149_s3 + $0xf0] sm:$0xff]  }
  0x88   :  { %v470_v1 = vmul.f32 %v406_v54, %v214_v28  ;;  %v280_v3 = vadd.f32 3.0, %v216_v60  ;;  %v147_v4 = vmul.f32 %v2013_v20, %v76_v56  ;;  %v533_v7 = vmul.f32 0.16666667, %v469_v61  ;;  %v79_v28 = vld [vmem:[%s2146_s0 + $0x1f0] sm:$0xff] }
  0x89   :  { %v1450_v6 = vpack.c.bf16 %v724_v58, %v723_v57  ;;  %v343_v10 = vmax.f32 %v279_v62, 0.0  ;;  %v217_v11 = vadd.f32 %v1995_v0, %v146_v63  ;;  %v1304_v15 = vunpack.c.h.bf16 %v1504_v55 }
  0x8a   :  { %v534_v12 = vmul.f32 0.16666667, %v470_v1  ;;  %v344_v14 = vmax.f32 %v280_v3, 0.0  ;;  %v218_v16 = vadd.f32 %v1995_v0, %v147_v4  ;;  %v725_v19 = vadd.f32 %v1299_v49, %v533_v7 }
  0x8b   :  { %1533 = vst [vmem:[%s2150_s4 + $0xd0] sm:$0xff] %v1450_v6   ;;  %v407_v22 = vmin.f32 %v343_v10, 6.0  ;;  %v281_v8 = vadd.f32 3.0, %v217_v11  ;;  %v148_v9 = vmul.f32 %v2013_v20, %v77_v5  ;;  %v149_v25 = vmul.f32 %v2013_v20, %v78_v13 }
  0x8c   :  { %v726_v23 = vadd.f32 %v1300_v59, %v534_v12  ;;  %v408_v24 = vmin.f32 %v344_v14, 6.0  ;;  %v282_v17 = vadd.f32 3.0, %v218_v16  ;;  %v1307_v27 = vunpack.c.l.bf16 %v1505_v18 }
  0x8d   :  { %v471_v21 = vmul.f32 %v407_v22, %v215_v53  ;;  %v345_v26 = vmax.f32 %v281_v8, 0.0  ;;  %v219_v29 = vadd.f32 %v1995_v0, %v148_v9  ;;  %v220_v35 = vadd.f32 %v1995_v0, %v149_v25 }
  0x8e   :  { %v1455_v30 = vpack.c.bf16 %v726_v23, %v725_v19  ;;  %v472_v31 = vmul.f32 %v408_v24, %v216_v60  ;;  %v346_v32 = vmax.f32 %v282_v17, 0.0  ;;  %v1308_v39 = vunpack.c.h.bf16 %v1505_v18 }
  0x8f   :  { %v535_v37 = vmul.f32 0.16666667, %v471_v21  ;;  %v409_v38 = vmin.f32 %v345_v26, 6.0  ;;  %v283_v40 = vadd.f32 3.0, %v219_v29  ;;  %v284_v33 = vadd.f32 3.0, %v220_v35 }
  0x90   :  { %1534 = vst [vmem:[%s2150_s4 + $0xd8] sm:$0xff] %v1455_v30   ;;  %v536_v41 = vmul.f32 0.16666667, %v472_v31  ;;  %v410_v42 = vmin.f32 %v346_v32, 6.0  ;;  %v150_v34 = vmul.f32 %v2013_v20, %v79_v28  ;;  %v151_v48 = vmul.f32 %v2013_v20, %v80_v36 }
  0x91   :  { %v727_v43 = vadd.f32 %v1303_v2, %v535_v37  ;;  %v473_v46 = vmul.f32 %v409_v38, %v217_v11  ;;  %v347_v47 = vmax.f32 %v283_v40, 0.0  ;;  %v348_v44 = vmax.f32 %v284_v33, 0.0 }
  0x92   :  { %v728_v49 = vadd.f32 %v1304_v15, %v536_v41  ;;  %v474_v50 = vmul.f32 %v410_v42, %v218_v16  ;;  %v221_v51 = vadd.f32 %v1995_v0, %v150_v34  ;;  %v222_v55 = vadd.f32 %v1995_v0, %v151_v48  ;;  %v1507_v0 = vld [vmem:[%s2149_s3 + $0xf8] sm:$0xff]  }
  0x93   :  { %v537_v52 = vmul.f32 0.16666667, %v473_v46  ;;  %v411_v53 = vmin.f32 %v347_v47, 6.0  ;;  %v412_v54 = vmin.f32 %v348_v44, 6.0  ;;  %v1311_v20 = vunpack.c.l.bf16 %v1506_v45 }
  0x94   :  { %v1460_v56 = vpack.c.bf16 %v728_v49, %v727_v43  ;;  %v538_v57 = vmul.f32 0.16666667, %v474_v50  ;;  %v285_v59 = vadd.f32 3.0, %v221_v51  ;;  %v286_v61 = vadd.f32 3.0, %v222_v55 }
  0x95   :  { %v729_v60 = vadd.f32 %v1307_v27, %v537_v52  ;;  %v475_v58 = vmul.f32 %v411_v53, %v219_v29  ;;  %v476_v63 = vmul.f32 %v412_v54, %v220_v35  ;;  %v1312_v1 = vunpack.c.h.bf16 %v1506_v45 }
  0x96   :  { %1535 = vst [vmem:[%s2150_s4 + $0xe0] sm:$0xff] %v1460_v56   ;;  %v730_v62 = vadd.f32 %v1308_v39, %v538_v57  ;;  %v349_v3 = vmax.f32 %v285_v59, 0.0  ;;  %v350_v4 = vmax.f32 %v286_v61, 0.0  ;;  %v1315_v14 = vunpack.c.l.bf16 %v1507_v0 }
  0x97   :  { %v539_v2 = vmul.f32 0.16666667, %v475_v58  ;;  %v540_v6 = vmul.f32 0.16666667, %v476_v63  ;;  %v1316_v16 = vunpack.c.h.bf16 %v1507_v0 }
  0x98   :  { %v1465_v5 = vpack.c.bf16 %v730_v62, %v729_v60  ;;  %v413_v7 = vmin.f32 %v349_v3, 6.0  ;;  %v414_v11 = vmin.f32 %v350_v4, 6.0 }
  0x99   :  { %v731_v10 = vadd.f32 %v1311_v20, %v539_v2  ;;  %v732_v13 = vadd.f32 %v1312_v1, %v540_v6 }
  0x9a   :  { %1536 = vst [vmem:[%s2150_s4 + $0xe8] sm:$0xff] %v1465_v5   ;;  %v477_v12 = vmul.f32 %v413_v7, %v221_v51  ;;  %v478_v15 = vmul.f32 %v414_v11, %v222_v55 }
  0x9b   :  { %v1470_v18 = vpack.c.bf16 %v732_v13, %v731_v10 }
  0x9c   :  { %v541_v19 = vmul.f32 0.16666667, %v477_v12  ;;  %v542_v22 = vmul.f32 0.16666667, %v478_v15 }
  0x9d   :  { %1537 = vst [vmem:[%s2150_s4 + $0xf0] sm:$0xff] %v1470_v18  }
  0x9e   :  { %v733_v8 = vadd.f32 %v1315_v14, %v541_v19  ;;  %v734_v9 = vadd.f32 %v1316_v16, %v542_v22 }
  0xa0   :  { %v1475_v23 = vpack.c.bf16 %v734_v9, %v733_v8 }
  0xa2   :  { %1538 = vst [vmem:[%s2150_s4 + $0xf8] sm:$0xff] %v1475_v23  }

// kernel: bottleneckcsp_forward.22
= control target key start
LH: loop header
LB: loop body
LE: loop exit
PB: predicated region body
PF: predicated region fallthrough
CT: control target
= control target key end

     0   :  { %s1774_s21 = smov 0   ;;  %s1776_s22 = smov 0   ;;  %s1945_s0 = inlined_call_operand.vmem [shape: bf16[512,128], index: 0, kind: input, shape index: {}]   ;;  %s1946_s1 = inlined_call_operand.vmem [shape: bf16[512,128], index: 1, kind: input, shape index: {}]   ;;  %s1947_s2 = inlined_call_operand.vmem [shape: bf16[128,128], index: 2, kind: input, shape index: {}]   ;;  %s1948_s3 = inlined_call_operand.vmem [shape: bf16[128,128], index: 3, kind: input, shape index: {}]   ;;  %s1949_s4 = inlined_call_operand.vmem [shape: f32[512,128], index: 4, kind: output, shape index: {0}]   ;;  %s1950_s5 = inlined_call_operand.vmem [shape: f32[16,128], index: 5, kind: output, shape index: {1}]   ;;  %s1951_s6 = inlined_call_operand.vmem [shape: f32[16,128], index: 6, kind: output, shape index: {2}]  }
   0x1   :  { %s1778_s23 = smov 0  }
   0x2 LB: > { %s29_s24 = sadd.s32 1, %s1733_s22  ;;  %p1408_p0 = scmp.ge.s32.totalorder %s1737_s23, 1  ;;  %s1737_s23 = sphi %s1778_s23, %s17_s23   ;;  %s1733_s22 = sphi %s1776_s22, %s1953_s22   ;;  %s1729_s21 = sphi %s1774_s21, %s1952_s21  }
   0x3   : > { %p31_p1 = scmp.ge.s32.totalorder %s29_s24, 2  ;;  %p265_p2 = scmp.lt.s32.totalorder %s1737_s23, 3 }
   0x5   : > { %s1955_s24 = smov (%p31_p1, %s29_s24), 0  ;;  %p266_p3 = pnand %p1408_p0, %p265_p2 }
   0x6   : > { %v1667_v0 = vld [vmem:[%s1948_s3] sm:$0xff] (!%p266_p3)   ;;  %s1409_s27 = sshll.u32 (!%p266_p3), %s1729_s21, 5  ;;  %v1669_v2 = vld [vmem:[%s1948_s3 + $0x8] sm:$0xff] (!%p266_p3)   ;;  %v1671_v4 = vld [vmem:[%s1948_s3 + $0x10] sm:$0xff] (!%p266_p3)   ;;  %p354_p5 = scmp.lt.s32.totalorder (!%p266_p3), %s1729_s21, 1 }
   0x7   : > { %269 = sbr.rel (%p266_p3) target bundleno = 322 (0x142), region = 36  ;;  %v1668_v1 = vld [vmem:[%s1947_s2] sm:$0xff] (!%p266_p3)   ;;  %1515 = vmatprep.subr.bf16.mxu1 (!%p266_p3), %v1667_v0  ;;  %p326_p4 = scmp.lt.s32.totalorder (!%p266_p3), %s1409_s27, 63  ;;  %v1670_v3 = vld [vmem:[%s1947_s2 + $0x8] sm:$0xff] (!%p266_p3)   ;;  %v1672_v5 = vld [vmem:[%s1947_s2 + $0x10] sm:$0xff] (!%p266_p3)  }
   0x8   : > { %1563 = vmatprep.subr.bf16.mxu0 (!%p266_p3), %v1668_v1  ;;  %1516 = vmatpush3.bf16.msra.mxu1 (!%p266_p3), %v1667_v0  ;;  %v1673_v6 = vld [vmem:[%s1948_s3 + $0x18] sm:$0xff] (!%p266_p3)   ;;  %v1675_v8 = vld [vmem:[%s1948_s3 + $0x20] sm:$0xff] (!%p266_p3)   ;;  %v1677_v10 = vld [vmem:[%s1948_s3 + $0x28] sm:$0xff] (!%p266_p3)  }
   0x9   : > { %1564 = vmatpush3.bf16.msra.mxu0 (!%p266_p3), %v1668_v1  ;;  %1517 = vmatprep.subr.bf16.mxu1 (!%p266_p3), %v1669_v2  ;;  %v1674_v7 = vld [vmem:[%s1947_s2 + $0x18] sm:$0xff] (!%p266_p3)   ;;  %v1676_v9 = vld [vmem:[%s1947_s2 + $0x20] sm:$0xff] (!%p266_p3)   ;;  %v1678_v11 = vld [vmem:[%s1947_s2 + $0x28] sm:$0xff] (!%p266_p3)  }
   0xa   : > { %1565 = vmatprep.subr.bf16.mxu0 (!%p266_p3), %v1670_v3  ;;  %v1679_v14 = vld [vmem:[%s1948_s3 + $0x30] sm:$0xff] (!%p266_p3)   ;;  %v1681_v16 = vld [vmem:[%s1948_s3 + $0x38] sm:$0xff] (!%p266_p3)  }
   0xb   : > { %v1680_v15 = vld [vmem:[%s1947_s2 + $0x30] sm:$0xff] (!%p266_p3)   ;;  %v1682_v17 = vld [vmem:[%s1947_s2 + $0x38] sm:$0xff] (!%p266_p3)  }
   0xc   : > { %1518 = vmatpush3.bf16.msra.mxu1 (!%p266_p3), %v1669_v2 }
   0xd   : > { %1566 = vmatpush3.bf16.msra.mxu0 (!%p266_p3), %v1670_v3  ;;  %1519 = vmatprep.subr.bf16.mxu1 (!%p266_p3), %v1671_v4 }
   0xe   : > { %s1957_s27 = smov (!%p326_p4, %s1409_s27), 63  ;;  %1567 = vmatprep.subr.bf16.mxu0 %v1672_v5  ;;  %s1959_s21 = smov (!%p354_p5, %s1729_s21), 1 }
   0xf   : > { %s1410_s18 = sshll.u32 %s1957_s27, 2  ;;  %s1414_s26 = sshll.u32 %s1957_s27, 3 }
  0x10   : > { %1520 = vmatpush3.bf16.msra.mxu1 %v1671_v4  ;;  %s1831_s30 = scalar_lea.vmem %s1946_s1, %s1410_s18  ;;  %s1839_s11 = scalar_lea.vmem %s1945_s0, %s1410_s18 }
  0x11   : > { %1568 = vmatpush3.bf16.msra.mxu0 %v1672_v5  ;;  %1521 = vmatprep.subr.bf16.mxu1 %v1673_v6  ;;  %v1683_v12 = vld [vmem:[%s1831_s30] sm:$0xff]   ;;  %v1685_v18 = vld [vmem:[%s1831_s30 + $0x8] sm:$0xff]   ;;  %v1687_v20 = vld [vmem:[%s1831_s30 + $0x10] sm:$0xff]   ;;  %s1892_s7 = scalar_lea.vmem %s1949_s4, %s1414_s26  ;;  %s1415_s27 = sshll.u32 %s1959_s21, 3 }
  0x12   : > { %1569 = vmatprep.subr.bf16.mxu0 %v1674_v7  ;;  %v1684_v13 = vld [vmem:[%s1839_s11] sm:$0xff]   ;;  %1531 = vmatprep.mubr.bf16.mxu1 %v1683_v12  ;;  %v1686_v19 = vld [vmem:[%s1839_s11 + $0x8] sm:$0xff]   ;;  %v1688_v21 = vld [vmem:[%s1839_s11 + $0x10] sm:$0xff]   ;;  %s360_s9 = scalar_lea.vmem %s1950_s5, %s1415_s27  ;;  %s367_s12 = scalar_lea.vmem %s1951_s6, %s1415_s27 }
  0x13   : > { %1579 = vmatprep.mubr.bf16.mxu0 %v1684_v13  ;;  %v1689_v22 = vld [vmem:[%s1831_s30 + $0x18] sm:$0xff]   ;;  %v1691_v24 = vld [vmem:[%s1831_s30 + $0x20] sm:$0xff]   ;;  %v1693_v26 = vld [vmem:[%s1831_s30 + $0x28] sm:$0xff]  }
  0x14   : > { %1522 = vmatpush3.bf16.msra.mxu1 %v1673_v6  ;;  %v1690_v23 = vld [vmem:[%s1839_s11 + $0x18] sm:$0xff]   ;;  %v1692_v25 = vld [vmem:[%s1839_s11 + $0x20] sm:$0xff]   ;;  %v1694_v27 = vld [vmem:[%s1839_s11 + $0x28] sm:$0xff]  }
  0x15   : > { %1570 = vmatpush3.bf16.msra.mxu0 %v1674_v7  ;;  %1523 = vmatprep.subr.bf16.mxu1 %v1675_v8  ;;  %v1695_v28 = vld [vmem:[%s1831_s30 + $0x30] sm:$0xff]   ;;  %v1697_v30 = vld [vmem:[%s1831_s30 + $0x38] sm:$0xff]   ;;  %v1699_v32 = vld [vmem:[%s1831_s30 + $0x40] sm:$0xff]  }
  0x16   : > { %1571 = vmatprep.subr.bf16.mxu0 %v1676_v9  ;;  %v1696_v29 = vld [vmem:[%s1839_s11 + $0x30] sm:$0xff]   ;;  %v1698_v31 = vld [vmem:[%s1839_s11 + $0x38] sm:$0xff]   ;;  %v1700_v33 = vld [vmem:[%s1839_s11 + $0x40] sm:$0xff]  }
  0x17   : > { %v1701_v34 = vld [vmem:[%s1831_s30 + $0x48] sm:$0xff]   ;;  %v1703_v36 = vld [vmem:[%s1831_s30 + $0x50] sm:$0xff]   ;;  %v1705_v38 = vld [vmem:[%s1831_s30 + $0x58] sm:$0xff]  }
  0x18   : > { %1524 = vmatpush3.bf16.msra.mxu1 %v1675_v8  ;;  %v1702_v35 = vld [vmem:[%s1839_s11 + $0x48] sm:$0xff]   ;;  %v1704_v37 = vld [vmem:[%s1839_s11 + $0x50] sm:$0xff]   ;;  %v1706_v39 = vld [vmem:[%s1839_s11 + $0x58] sm:$0xff]  }
  0x19   : > { %1572 = vmatpush3.bf16.msra.mxu0 %v1676_v9  ;;  %1525 = vmatprep.subr.bf16.mxu1 %v1677_v10  ;;  %v1707_v40 = vld [vmem:[%s1831_s30 + $0x60] sm:$0xff]   ;;  %v1709_v42 = vld [vmem:[%s1831_s30 + $0x68] sm:$0xff]   ;;  %v1711_v44 = vld [vmem:[%s1831_s30 + $0x70] sm:$0xff]  }
  0x1a   : > { %1573 = vmatprep.subr.bf16.mxu0 %v1678_v11  ;;  %v1708_v41 = vld [vmem:[%s1839_s11 + $0x60] sm:$0xff]   ;;  %v1710_v43 = vld [vmem:[%s1839_s11 + $0x68] sm:$0xff]   ;;  %v1712_v45 = vld [vmem:[%s1839_s11 + $0x70] sm:$0xff]  }
  0x1b   : > { %v1713_v46 = vld [vmem:[%s1831_s30 + $0x78] sm:$0xff]  }
  0x1c   : > { %1526 = vmatpush3.bf16.msra.mxu1 %v1677_v10  ;;  %v1714_v47 = vld [vmem:[%s1839_s11 + $0x78] sm:$0xff]  }
  0x1d   : > { %1574 = vmatpush3.bf16.msra.mxu0 %v1678_v11  ;;  %1527 = vmatprep.subr.bf16.mxu1 %v1679_v14 }
  0x1e   : > { %1575 = vmatprep.subr.bf16.mxu0 %v1680_v15 }
  0x20   : > { %1528 = vmatpush3.bf16.msra.mxu1 %v1679_v14 }
  0x21   : > { %1576 = vmatpush3.bf16.msra.mxu0 %v1680_v15  ;;  %1529 = vmatprep.subr.bf16.mxu1 %v1681_v16 }
  0x22   : > { %1577 = vmatprep.subr.bf16.mxu0 %v1682_v17 }
  0x24   : > { %1530 = vmatpush3.bf16.msra.mxu1 %v1681_v16 }
  0x25   : > { %1578 = vmatpush3.bf16.msra.mxu0 %v1682_v17 }
  0x27   : > { %1532 = vmatmul.mubr.bf16.vlgmr.msra.gmra.mrb[0].mxu1 %v1685_v18 }
  0x28   : > { %1580 = vmatmul.mubr.bf16.vlgmr.msra.gmra.mrb[0].mxu0 %v1686_v19  ;;  %1535 = vmatprep.mubr.bf16.mxu1 %v1687_v20 }
  0x29   : > { %1583 = vmatprep.mubr.bf16.mxu0 %v1688_v21 }
  0x2f   : > { %1536 = vmatmul.mubr.bf16.gmra.mrb[4].mxu1 %v1689_v22 }
  0x30   : > { %1584 = vmatmul.mubr.bf16.gmra.mrb[4].mxu0 %v1690_v23  ;;  %1539 = vmatprep.mubr.bf16.mxu1 %v1691_v24 }
  0x31   : > { %1587 = vmatprep.mubr.bf16.mxu0 %v1692_v25 }
  0x37   : > { %1540 = vmatmul.mubr.bf16.gmra.mrb[8].mxu1 %v1693_v26 }
  0x38   : > { %1588 = vmatmul.mubr.bf16.gmra.mrb[8].mxu0 %v1694_v27  ;;  %1543 = vmatprep.mubr.bf16.mxu1 %v1695_v28 }
  0x39   : > { %1591 = vmatprep.mubr.bf16.mxu0 %v1696_v29 }
  0x3f   : > { %1544 = vmatmul.mubr.bf16.gmra.mrb[12].mxu1 %v1697_v30 }
  0x40   : > { %1592 = vmatmul.mubr.bf16.gmra.mrb[12].mxu0 %v1698_v31  ;;  %1547 = vmatprep.mubr.bf16.mxu1 %v1699_v32 }
  0x41   : > { %1595 = vmatprep.mubr.bf16.mxu0 %v1700_v33 }
  0x47   : > { %1548 = vmatmul.mubr.bf16.gmra.mrb[16].mxu1 %v1701_v34 }
  0x48   : > { %1596 = vmatmul.mubr.bf16.gmra.mrb[16].mxu0 %v1702_v35  ;;  %1551 = vmatprep.mubr.bf16.mxu1 %v1703_v36 }
  0x49   : > { %1599 = vmatprep.mubr.bf16.mxu0 %v1704_v37 }
  0x4f   : > { %1552 = vmatmul.mubr.bf16.gmra.mrb[20].mxu1 %v1705_v38 }
  0x50   : > { %1600 = vmatmul.mubr.bf16.gmra.mrb[20].mxu0 %v1706_v39  ;;  %1555 = vmatprep.mubr.bf16.mxu1 %v1707_v40 }
  0x51   : > { %1603 = vmatprep.mubr.bf16.mxu0 %v1708_v41 }
  0x57   : > { %1556 = vmatmul.mubr.bf16.gmra.mrb[24].mxu1 %v1709_v42 }
  0x58   : > { %1604 = vmatmul.mubr.bf16.gmra.mrb[24].mxu0 %v1710_v43  ;;  %1559 = vmatprep.mubr.bf16.mxu1 %v1711_v44 }
  0x59   : > { %1607 = vmatprep.mubr.bf16.mxu0 %v1712_v45 }
  0x5f   : > { %1560 = vmatmul.mubr.bf16.gmra.mrb[28].mxu1 %v1713_v46 }
  0x60   : > { %1608 = vmatmul.mubr.bf16.gmra.mrb[28].mxu0 %v1714_v47 }
  0xfa   : > { %v1533_v48 = vpop.f32.mrb[0].mxu1 }
  0xfb   : > { %v1581_v49 = vpop.f32.mrb[0].mxu0  ;;  %v643_v50 = vpop.f32.mrb[1].mxu1 }
  0xfc   : > { %v957_v51 = vadd.f32 %v1581_v49, %v1533_v48  ;;  %v948_v52 = vpop.f32.mrb[1].mxu0  ;;  %v1534_v53 = vpop.f32.mrb[2].mxu1 }
  0xfd   : > { %v949_v54 = vadd.f32 %v948_v52, %v643_v50  ;;  %v1582_v55 = vpop.f32.mrb[2].mxu0  ;;  %v646_v56 = vpop.f32.mrb[3].mxu1 }
  0xfe   : > { %1077 = vst [vmem:[%s1892_s7 + $0x10] sm:$0xff] %v957_v51  ;;  %v960_v57 = vadd.f32 %v1582_v55, %v1534_v53  ;;  %v951_v58 = vpop.f32.mrb[3].mxu0  ;;  %v1141_v0 = vmul.f32 %v957_v51, %v957_v51 }
  0xff   : > { %1075 = vst [vmem:[%s1892_s7] sm:$0xff] %v949_v54  ;;  %v952_v59 = vadd.f32 %v951_v58, %v646_v56  ;;  %v1139_v60 = vmul.f32 %v949_v54, %v949_v54 }
 0x100   : > { %1078 = vst [vmem:[%s1892_s7 + $0x18] sm:$0xff] %v960_v57  ;;  %v1142_v8 = vmul.f32 %v960_v57, %v960_v57 }
 0x101   : > { %1076 = vst [vmem:[%s1892_s7 + $0x8] sm:$0xff] %v952_v59  ;;  %v1107_v61 = vadd.f32 %v952_v59, %v949_v54  ;;  %v1140_v62 = vmul.f32 %v952_v59, %v952_v59 }
 0x102   : > { %v1537_v63 = vpop.f32.mrb[4].mxu1 }
 0x103   : > { %v1108_v1 = vadd.f32 %v1107_v61, %v957_v51  ;;  %v1171_v2 = vadd.f32 %v1140_v62, %v1139_v60  ;;  %v1585_v3 = vpop.f32.mrb[4].mxu0  ;;  %v659_v4 = vpop.f32.mrb[5].mxu1 }
 0x104   : > { %v973_v5 = vadd.f32 %v1585_v3, %v1537_v63  ;;  %v964_v6 = vpop.f32.mrb[5].mxu0  ;;  %v1538_v7 = vpop.f32.mrb[6].mxu1 }
 0x105   : > { %v1172_v9 = vadd.f32 %v1171_v2, %v1141_v0  ;;  %v965_v10 = vadd.f32 %v964_v6, %v659_v4  ;;  %v1109_v11 = vadd.f32 %v1108_v1, %v960_v57  ;;  %v1586_v12 = vpop.f32.mrb[6].mxu0  ;;  %v662_v13 = vpop.f32.mrb[7].mxu1 }
 0x106   : > { %1081 = vst [vmem:[%s1892_s7 + $0x30] sm:$0xff] %v973_v5  ;;  %v976_v14 = vadd.f32 %v1586_v12, %v1538_v7  ;;  %v967_v15 = vpop.f32.mrb[7].mxu0  ;;  %v1145_v24 = vmul.f32 %v973_v5, %v973_v5 }
 0x107   : > { %1079 = vst [vmem:[%s1892_s7 + $0x20] sm:$0xff] %v965_v10  ;;  %v1110_v16 = vadd.f32 %v1109_v11, %v965_v10  ;;  %v1143_v17 = vmul.f32 %v965_v10, %v965_v10  ;;  %v1173_v18 = vadd.f32 %v1172_v9, %v1142_v8  ;;  %v968_v19 = vadd.f32 %v967_v15, %v662_v13 }
 0x108   : > { %1082 = vst [vmem:[%s1892_s7 + $0x38] sm:$0xff] %v976_v14  ;;  %v1146_v32 = vmul.f32 %v976_v14, %v976_v14 }
 0x109   : > { %v1174_v20 = vadd.f32 %v1173_v18, %v1143_v17  ;;  %1080 = vst [vmem:[%s1892_s7 + $0x28] sm:$0xff] %v968_v19  ;;  %v1111_v21 = vadd.f32 %v1110_v16, %v968_v19  ;;  %v1144_v22 = vmul.f32 %v968_v19, %v968_v19 }
 0x10a   : > { %v1541_v23 = vpop.f32.mrb[8].mxu1 }
 0x10b   : > { %v1112_v25 = vadd.f32 %v1111_v21, %v973_v5  ;;  %v1175_v26 = vadd.f32 %v1174_v20, %v1144_v22  ;;  %v1589_v27 = vpop.f32.mrb[8].mxu0  ;;  %v675_v28 = vpop.f32.mrb[9].mxu1 }
 0x10c   : > { %v989_v29 = vadd.f32 %v1589_v27, %v1541_v23  ;;  %v980_v30 = vpop.f32.mrb[9].mxu0  ;;  %v1542_v31 = vpop.f32.mrb[10].mxu1 }
 0x10d   : > { %v1176_v33 = vadd.f32 %v1175_v26, %v1145_v24  ;;  %v981_v34 = vadd.f32 %v980_v30, %v675_v28  ;;  %v1113_v35 = vadd.f32 %v1112_v25, %v976_v14  ;;  %v1590_v36 = vpop.f32.mrb[10].mxu0  ;;  %v678_v37 = vpop.f32.mrb[11].mxu1 }
 0x10e   : > { %1085 = vst [vmem:[%s1892_s7 + $0x50] sm:$0xff] %v989_v29  ;;  %v992_v38 = vadd.f32 %v1590_v36, %v1542_v31  ;;  %v983_v39 = vpop.f32.mrb[11].mxu0  ;;  %v1149_v48 = vmul.f32 %v989_v29, %v989_v29 }
 0x10f   : > { %1083 = vst [vmem:[%s1892_s7 + $0x40] sm:$0xff] %v981_v34  ;;  %v1114_v40 = vadd.f32 %v1113_v35, %v981_v34  ;;  %v1147_v41 = vmul.f32 %v981_v34, %v981_v34  ;;  %v1177_v42 = vadd.f32 %v1176_v33, %v1146_v32  ;;  %v984_v43 = vadd.f32 %v983_v39, %v678_v37 }
 0x110   : > { %1086 = vst [vmem:[%s1892_s7 + $0x58] sm:$0xff] %v992_v38  ;;  %v1150_v56 = vmul.f32 %v992_v38, %v992_v38 }
 0x111   : > { %v1178_v44 = vadd.f32 %v1177_v42, %v1147_v41  ;;  %1084 = vst [vmem:[%s1892_s7 + $0x48] sm:$0xff] %v984_v43  ;;  %v1115_v45 = vadd.f32 %v1114_v40, %v984_v43  ;;  %v1148_v46 = vmul.f32 %v984_v43, %v984_v43 }
 0x112   : > { %v1545_v47 = vpop.f32.mrb[12].mxu1 }
 0x113   : > { %v1116_v49 = vadd.f32 %v1115_v45, %v989_v29  ;;  %v1179_v50 = vadd.f32 %v1178_v44, %v1148_v46  ;;  %v1593_v51 = vpop.f32.mrb[12].mxu0  ;;  %v691_v52 = vpop.f32.mrb[13].mxu1 }
 0x114   : > { %v1005_v53 = vadd.f32 %v1593_v51, %v1545_v47  ;;  %v996_v54 = vpop.f32.mrb[13].mxu0  ;;  %v1546_v55 = vpop.f32.mrb[14].mxu1 }
 0x115   : > { %v1180_v57 = vadd.f32 %v1179_v50, %v1149_v48  ;;  %v997_v58 = vadd.f32 %v996_v54, %v691_v52  ;;  %v1117_v59 = vadd.f32 %v1116_v49, %v992_v38  ;;  %v1594_v60 = vpop.f32.mrb[14].mxu0  ;;  %v694_v61 = vpop.f32.mrb[15].mxu1 }
 0x116   : > { %1089 = vst [vmem:[%s1892_s7 + $0x70] sm:$0xff] %v1005_v53  ;;  %v1008_v62 = vadd.f32 %v1594_v60, %v1546_v55  ;;  %v999_v63 = vpop.f32.mrb[15].mxu0  ;;  %v1153_v8 = vmul.f32 %v1005_v53, %v1005_v53 }
 0x117   : > { %1087 = vst [vmem:[%s1892_s7 + $0x60] sm:$0xff] %v997_v58  ;;  %v1118_v0 = vadd.f32 %v1117_v59, %v997_v58  ;;  %v1151_v1 = vmul.f32 %v997_v58, %v997_v58  ;;  %v1181_v2 = vadd.f32 %v1180_v57, %v1150_v56  ;;  %v1000_v3 = vadd.f32 %v999_v63, %v694_v61 }
 0x118   : > { %1090 = vst [vmem:[%s1892_s7 + $0x78] sm:$0xff] %v1008_v62  ;;  %v1154_v16 = vmul.f32 %v1008_v62, %v1008_v62 }
 0x119   : > { %v1182_v4 = vadd.f32 %v1181_v2, %v1151_v1  ;;  %1088 = vst [vmem:[%s1892_s7 + $0x68] sm:$0xff] %v1000_v3  ;;  %v1119_v5 = vadd.f32 %v1118_v0, %v1000_v3  ;;  %v1152_v6 = vmul.f32 %v1000_v3, %v1000_v3 }
 0x11a   : > { %v1549_v7 = vpop.f32.mrb[16].mxu1 }
 0x11b   : > { %v1120_v9 = vadd.f32 %v1119_v5, %v1005_v53  ;;  %v1183_v10 = vadd.f32 %v1182_v4, %v1152_v6  ;;  %v1597_v11 = vpop.f32.mrb[16].mxu0  ;;  %v707_v12 = vpop.f32.mrb[17].mxu1 }
 0x11c   : > { %v1021_v13 = vadd.f32 %v1597_v11, %v1549_v7  ;;  %v1012_v14 = vpop.f32.mrb[17].mxu0  ;;  %v1550_v15 = vpop.f32.mrb[18].mxu1 }
 0x11d   : > { %v1184_v17 = vadd.f32 %v1183_v10, %v1153_v8  ;;  %v1013_v18 = vadd.f32 %v1012_v14, %v707_v12  ;;  %v1121_v19 = vadd.f32 %v1120_v9, %v1008_v62  ;;  %v1598_v20 = vpop.f32.mrb[18].mxu0  ;;  %v710_v21 = vpop.f32.mrb[19].mxu1 }
 0x11e   : > { %1093 = vst [vmem:[%s1892_s7 + $0x90] sm:$0xff] %v1021_v13  ;;  %v1024_v22 = vadd.f32 %v1598_v20, %v1550_v15  ;;  %v1015_v23 = vpop.f32.mrb[19].mxu0  ;;  %v1157_v32 = vmul.f32 %v1021_v13, %v1021_v13 }
 0x11f   : > { %1091 = vst [vmem:[%s1892_s7 + $0x80] sm:$0xff] %v1013_v18  ;;  %v1122_v24 = vadd.f32 %v1121_v19, %v1013_v18  ;;  %v1155_v25 = vmul.f32 %v1013_v18, %v1013_v18  ;;  %v1185_v26 = vadd.f32 %v1184_v17, %v1154_v16  ;;  %v1016_v27 = vadd.f32 %v1015_v23, %v710_v21 }
 0x120   : > { %1094 = vst [vmem:[%s1892_s7 + $0x98] sm:$0xff] %v1024_v22  ;;  %v1158_v40 = vmul.f32 %v1024_v22, %v1024_v22 }
 0x121   : > { %v1186_v28 = vadd.f32 %v1185_v26, %v1155_v25  ;;  %1092 = vst [vmem:[%s1892_s7 + $0x88] sm:$0xff] %v1016_v27  ;;  %v1123_v29 = vadd.f32 %v1122_v24, %v1016_v27  ;;  %v1156_v30 = vmul.f32 %v1016_v27, %v1016_v27 }
 0x122   : > { %v1553_v31 = vpop.f32.mrb[20].mxu1 }
 0x123   : > { %v1124_v33 = vadd.f32 %v1123_v29, %v1021_v13  ;;  %v1187_v34 = vadd.f32 %v1186_v28, %v1156_v30  ;;  %v1601_v35 = vpop.f32.mrb[20].mxu0  ;;  %v723_v36 = vpop.f32.mrb[21].mxu1 }
 0x124   : > { %v1037_v37 = vadd.f32 %v1601_v35, %v1553_v31  ;;  %v1028_v38 = vpop.f32.mrb[21].mxu0  ;;  %v1554_v39 = vpop.f32.mrb[22].mxu1 }
 0x125   : > { %v1188_v41 = vadd.f32 %v1187_v34, %v1157_v32  ;;  %v1029_v42 = vadd.f32 %v1028_v38, %v723_v36  ;;  %v1125_v43 = vadd.f32 %v1124_v33, %v1024_v22  ;;  %v1602_v44 = vpop.f32.mrb[22].mxu0  ;;  %v726_v45 = vpop.f32.mrb[23].mxu1 }
 0x126   : > { %1097 = vst [vmem:[%s1892_s7 + $0xb0] sm:$0xff] %v1037_v37  ;;  %v1040_v46 = vadd.f32 %v1602_v44, %v1554_v39  ;;  %v1031_v47 = vpop.f32.mrb[23].mxu0  ;;  %v1161_v56 = vmul.f32 %v1037_v37, %v1037_v37 }
 0x127   : > { %1095 = vst [vmem:[%s1892_s7 + $0xa0] sm:$0xff] %v1029_v42  ;;  %v1126_v48 = vadd.f32 %v1125_v43, %v1029_v42  ;;  %v1159_v49 = vmul.f32 %v1029_v42, %v1029_v42  ;;  %v1189_v50 = vadd.f32 %v1188_v41, %v1158_v40  ;;  %v1032_v51 = vadd.f32 %v1031_v47, %v726_v45 }
 0x128   : > { %1098 = vst [vmem:[%s1892_s7 + $0xb8] sm:$0xff] %v1040_v46  ;;  %v1162_v0 = vmul.f32 %v1040_v46, %v1040_v46 }
 0x129   : > { %v1190_v52 = vadd.f32 %v1189_v50, %v1159_v49  ;;  %1096 = vst [vmem:[%s1892_s7 + $0xa8] sm:$0xff] %v1032_v51  ;;  %v1127_v53 = vadd.f32 %v1126_v48, %v1032_v51  ;;  %v1160_v54 = vmul.f32 %v1032_v51, %v1032_v51 }
 0x12a   : > { %v1557_v55 = vpop.f32.mrb[24].mxu1 }
 0x12b   : > { %v1128_v57 = vadd.f32 %v1127_v53, %v1037_v37  ;;  %v1191_v58 = vadd.f32 %v1190_v52, %v1160_v54  ;;  %v1605_v59 = vpop.f32.mrb[24].mxu0  ;;  %v739_v60 = vpop.f32.mrb[25].mxu1 }
 0x12c   : > { %v1053_v61 = vadd.f32 %v1605_v59, %v1557_v55  ;;  %v1044_v62 = vpop.f32.mrb[25].mxu0  ;;  %v1558_v63 = vpop.f32.mrb[26].mxu1 }
 0x12d   : > { %v1192_v1 = vadd.f32 %v1191_v58, %v1161_v56  ;;  %v1045_v2 = vadd.f32 %v1044_v62, %v739_v60  ;;  %v1129_v3 = vadd.f32 %v1128_v57, %v1040_v46  ;;  %v1606_v4 = vpop.f32.mrb[26].mxu0  ;;  %v742_v5 = vpop.f32.mrb[27].mxu1 }
 0x12e   : > { %1101 = vst [vmem:[%s1892_s7 + $0xd0] sm:$0xff] %v1053_v61  ;;  %v1056_v6 = vadd.f32 %v1606_v4, %v1558_v63  ;;  %v1047_v7 = vpop.f32.mrb[27].mxu0  ;;  %v1165_v16 = vmul.f32 %v1053_v61, %v1053_v61 }
 0x12f   : > { %1099 = vst [vmem:[%s1892_s7 + $0xc0] sm:$0xff] %v1045_v2  ;;  %v1130_v8 = vadd.f32 %v1129_v3, %v1045_v2  ;;  %v1163_v9 = vmul.f32 %v1045_v2, %v1045_v2  ;;  %v1193_v10 = vadd.f32 %v1192_v1, %v1162_v0  ;;  %v1048_v11 = vadd.f32 %v1047_v7, %v742_v5 }
 0x130   : > { %1102 = vst [vmem:[%s1892_s7 + $0xd8] sm:$0xff] %v1056_v6  ;;  %v1166_v24 = vmul.f32 %v1056_v6, %v1056_v6 }
 0x131   : > { %v1194_v12 = vadd.f32 %v1193_v10, %v1163_v9  ;;  %1100 = vst [vmem:[%s1892_s7 + $0xc8] sm:$0xff] %v1048_v11  ;;  %v1131_v13 = vadd.f32 %v1130_v8, %v1048_v11  ;;  %v1164_v14 = vmul.f32 %v1048_v11, %v1048_v11 }
 0x132   : > { %v1561_v15 = vpop.f32.mrb[28].mxu1 }
 0x133   : > { %v1132_v17 = vadd.f32 %v1131_v13, %v1053_v61  ;;  %v1195_v18 = vadd.f32 %v1194_v12, %v1164_v14  ;;  %v1609_v19 = vpop.f32.mrb[28].mxu0  ;;  %v755_v20 = vpop.f32.mrb[29].mxu1 }
 0x134   : > { %v1069_v21 = vadd.f32 %v1609_v19, %v1561_v15  ;;  %v1060_v22 = vpop.f32.mrb[29].mxu0  ;;  %v1562_v23 = vpop.f32.mrb[30].mxu1 }
 0x135   : > { %v1196_v25 = vadd.f32 %v1195_v18, %v1165_v16  ;;  %v1061_v26 = vadd.f32 %v1060_v22, %v755_v20  ;;  %v1133_v27 = vadd.f32 %v1132_v17, %v1056_v6  ;;  %v1610_v28 = vpop.f32.mrb[30].mxu0  ;;  %v758_v29 = vpop.f32.mrb[31].mxu1 }
 0x136   : > { %1105 = vst [vmem:[%s1892_s7 + $0xf0] sm:$0xff] %v1069_v21  ;;  %v1072_v30 = vadd.f32 %v1610_v28, %v1562_v23  ;;  %v1063_v31 = vpop.f32.mrb[31].mxu0  ;;  %v1169_v39 = vmul.f32 %v1069_v21, %v1069_v21 }
 0x137   : > { %1103 = vst [vmem:[%s1892_s7 + $0xe0] sm:$0xff] %v1061_v26  ;;  %v1134_v32 = vadd.f32 %v1133_v27, %v1061_v26  ;;  %v1167_v33 = vmul.f32 %v1061_v26, %v1061_v26  ;;  %v1197_v34 = vadd.f32 %v1196_v25, %v1166_v24  ;;  %v1064_v35 = vadd.f32 %v1063_v31, %v758_v29 }
 0x138   : > { %1106 = vst [vmem:[%s1892_s7 + $0xf8] sm:$0xff] %v1072_v30  ;;  %v1170_v42 = vmul.f32 %v1072_v30, %v1072_v30 }
 0x139   : > { %v1198_v36 = vadd.f32 %v1197_v34, %v1167_v33  ;;  %1104 = vst [vmem:[%s1892_s7 + $0xe8] sm:$0xff] %v1064_v35  ;;  %v1135_v37 = vadd.f32 %v1134_v32, %v1064_v35  ;;  %v1168_v38 = vmul.f32 %v1064_v35, %v1064_v35 }
 0x13b   : > { %v1136_v40 = vadd.f32 %v1135_v37, %v1069_v21  ;;  %v1199_v41 = vadd.f32 %v1198_v36, %v1168_v38 }
 0x13d   : > { %v1137_v43 = vadd.f32 %v1136_v40, %v1072_v30  ;;  %v1200_v44 = vadd.f32 %v1199_v41, %v1169_v39 }
 0x13f   : > { %1138 = vst [vmem:[%s360_s9] sm:$0xff] %v1137_v43  ;;  %v1201_v45 = vadd.f32 %v1200_v44, %v1170_v42 }
 0x141   : > { %1202 = vst [vmem:[%s367_s12] sm:$0xff] %v1201_v45 }
 0x142 PF: > { %s17_s23 = sadd.s32 1, %s1737_s23   ;;  %s1952_s21 = smov %s1733_s22 }
 0x143   : > { %p14_p6 = scmp.ge.s32.totalorder %s17_s23, 4   ;;  %s1953_s22 = smov %s1955_s24 }
 0x145   :  { %16 = sbr.rel (!%p14_p6) target bundleno = 2 (0x2), region = 99 }

// kernel: bottleneckcsp_forward.23
= control target key start
LH: loop header
LB: loop body
LE: loop exit
PB: predicated region body
PF: predicated region fallthrough
CT: control target
= control target key end

     0   :  { %s1146_s0 = inlined_call_operand.vmem [shape: f32[512,128], index: 0, kind: input, shape index: {}]   ;;  %s1147_s1 = inlined_call_operand.vmem [shape: f32[1,128], index: 1, kind: input, shape index: {}]   ;;  %s1148_s2 = inlined_call_operand.vmem [shape: f32[1,128], index: 2, kind: input, shape index: {}]   ;;  %s1149_s3 = inlined_call_operand.vmem [shape: f32[512,128], index: 3, kind: output, shape index: {}]  }
   0x1   :  { %v14_v0 = vld [vmem:[%s1146_s0] sm:$0xff]  ;;  %v15_v4 = vld [vmem:[%s1146_s0 + $0x8] sm:$0xff]  ;;  %v16_v5 = vld [vmem:[%s1146_s0 + $0x10] sm:$0xff] }
   0x2   :  { %v638_v1 = vld [vmem:[%s1147_s1] ss:$0 sm:$0xff]  ;;  %v17_v6 = vld [vmem:[%s1146_s0 + $0x18] sm:$0xff]  ;;  %v19_v11 = vld [vmem:[%s1146_s0 + $0x28] sm:$0xff] }
   0x3   :  { %v643_v2 = vld [vmem:[%s1148_s2] ss:$0 sm:$0xff]  ;;  %v85_v3 = vmul.f32 %v638_v1, %v14_v0  ;;  %v86_v7 = vmul.f32 %v638_v1, %v15_v4  ;;  %v87_v8 = vmul.f32 %v638_v1, %v16_v5  ;;  %v88_v9 = vmul.f32 %v638_v1, %v17_v6  ;;  %v20_v12 = vld [vmem:[%s1146_s0 + $0x30] sm:$0xff]  ;;  %v21_v17 = vld [vmem:[%s1146_s0 + $0x38] sm:$0xff] }
   0x4   :  { %v18_v10 = vld [vmem:[%s1146_s0 + $0x20] sm:$0xff]  ;;  %v90_v15 = vmul.f32 %v638_v1, %v19_v11  ;;  %v91_v16 = vmul.f32 %v638_v1, %v20_v12  ;;  %v92_v21 = vmul.f32 %v638_v1, %v21_v17  ;;  %v23_v51 = vld [vmem:[%s1146_s0 + $0x48] sm:$0xff]  ;;  %v24_v56 = vld [vmem:[%s1146_s0 + $0x50] sm:$0xff] }
   0x5   :  { %v156_v13 = vadd.f32 %v643_v2, %v85_v3  ;;  %v89_v14 = vmul.f32 %v638_v1, %v18_v10  ;;  %v157_v18 = vadd.f32 %v643_v2, %v86_v7  ;;  %v158_v19 = vadd.f32 %v643_v2, %v87_v8  ;;  %v22_v50 = vld [vmem:[%s1146_s0 + $0x40] sm:$0xff]  ;;  %v25_v57 = vld [vmem:[%s1146_s0 + $0x58] sm:$0xff]  ;;  %v27_v63 = vld [vmem:[%s1146_s0 + $0x68] sm:$0xff] }
   0x6   :  { %v159_v20 = vadd.f32 %v643_v2, %v88_v9  ;;  %v161_v24 = vadd.f32 %v643_v2, %v90_v15  ;;  %v162_v25 = vadd.f32 %v643_v2, %v91_v16  ;;  %v163_v29 = vadd.f32 %v643_v2, %v92_v21  ;;  %v26_v58 = vld [vmem:[%s1146_s0 + $0x60] sm:$0xff]  ;;  %v28_v0 = vld [vmem:[%s1146_s0 + $0x70] sm:$0xff]  ;;  %v29_v3 = vld [vmem:[%s1146_s0 + $0x78] sm:$0xff] }
   0x7   :  { %v220_v22 = vadd.f32 3.0, %v156_v13  ;;  %v160_v23 = vadd.f32 %v643_v2, %v89_v14  ;;  %v221_v26 = vadd.f32 3.0, %v157_v18  ;;  %v222_v27 = vadd.f32 3.0, %v158_v19 }
   0x8   :  { %v223_v28 = vadd.f32 3.0, %v159_v20  ;;  %v225_v32 = vadd.f32 3.0, %v161_v24  ;;  %v226_v33 = vadd.f32 3.0, %v162_v25  ;;  %v227_v37 = vadd.f32 3.0, %v163_v29 }
   0x9   :  { %v284_v30 = vmax.f32 %v220_v22, 0.0  ;;  %v224_v31 = vadd.f32 3.0, %v160_v23  ;;  %v285_v34 = vmax.f32 %v221_v26, 0.0  ;;  %v286_v35 = vmax.f32 %v222_v27, 0.0 }
   0xa   :  { %v287_v36 = vmax.f32 %v223_v28, 0.0  ;;  %v289_v40 = vmax.f32 %v225_v32, 0.0  ;;  %v290_v41 = vmax.f32 %v226_v33, 0.0  ;;  %v291_v45 = vmax.f32 %v227_v37, 0.0 }
   0xb   :  { %v348_v38 = vmin.f32 %v284_v30, 6.0  ;;  %v288_v39 = vmax.f32 %v224_v31, 0.0  ;;  %v349_v42 = vmin.f32 %v285_v34, 6.0  ;;  %v350_v43 = vmin.f32 %v286_v35, 6.0 }
   0xc   :  { %v351_v44 = vmin.f32 %v287_v36, 6.0  ;;  %v353_v48 = vmin.f32 %v289_v40, 6.0  ;;  %v354_v49 = vmin.f32 %v290_v41, 6.0  ;;  %v355_v55 = vmin.f32 %v291_v45, 6.0 }
   0xd   :  { %v412_v46 = vmul.f32 %v348_v38, %v156_v13  ;;  %v352_v47 = vmin.f32 %v288_v39, 6.0  ;;  %v413_v52 = vmul.f32 %v349_v42, %v157_v18  ;;  %v414_v53 = vmul.f32 %v350_v43, %v158_v19 }
   0xe   :  { %v415_v54 = vmul.f32 %v351_v44, %v159_v20  ;;  %v417_v61 = vmul.f32 %v353_v48, %v161_v24  ;;  %v418_v62 = vmul.f32 %v354_v49, %v162_v25  ;;  %v419_v7 = vmul.f32 %v355_v55, %v163_v29 }
   0xf   :  { %v476_v59 = vmul.f32 0.16666667, %v412_v46  ;;  %v416_v60 = vmul.f32 %v352_v47, %v160_v23  ;;  %v477_v4 = vmul.f32 0.16666667, %v413_v52  ;;  %v478_v5 = vmul.f32 0.16666667, %v414_v53 }
  0x10   :  { %v479_v6 = vmul.f32 0.16666667, %v415_v54  ;;  %v481_v9 = vmul.f32 0.16666667, %v417_v61  ;;  %v482_v10 = vmul.f32 0.16666667, %v418_v62  ;;  %v93_v11 = vmul.f32 %v638_v1, %v22_v50 }
  0x11   :  { %540 = vst [vmem:[%s1149_s3] sm:$0xff] %v476_v59  ;;  %v480_v8 = vmul.f32 0.16666667, %v416_v60  ;;  %541 = vst [vmem:[%s1149_s3 + $0x8] sm:$0xff] %v477_v4  ;;  %v483_v12 = vmul.f32 0.16666667, %v419_v7  ;;  %v94_v13 = vmul.f32 %v638_v1, %v23_v51  ;;  %v95_v14 = vmul.f32 %v638_v1, %v24_v56  ;;  %v30_v52 = vld [vmem:[%s1146_s0 + $0x80] sm:$0xff] }
  0x12   :  { %542 = vst [vmem:[%s1149_s3 + $0x10] sm:$0xff] %v478_v5  ;;  %543 = vst [vmem:[%s1149_s3 + $0x18] sm:$0xff] %v479_v6  ;;  %v96_v15 = vmul.f32 %v638_v1, %v25_v57  ;;  %v164_v16 = vadd.f32 %v643_v2, %v93_v11  ;;  %v97_v17 = vmul.f32 %v638_v1, %v26_v58  ;;  %v31_v53 = vld [vmem:[%s1146_s0 + $0x88] sm:$0xff]  ;;  %v32_v58 = vld [vmem:[%s1146_s0 + $0x90] sm:$0xff] }
  0x13   :  { %544 = vst [vmem:[%s1149_s3 + $0x20] sm:$0xff] %v480_v8  ;;  %545 = vst [vmem:[%s1149_s3 + $0x28] sm:$0xff] %v481_v9  ;;  %v98_v18 = vmul.f32 %v638_v1, %v27_v63  ;;  %v99_v19 = vmul.f32 %v638_v1, %v28_v0  ;;  %v165_v20 = vadd.f32 %v643_v2, %v94_v13  ;;  %v33_v59 = vld [vmem:[%s1146_s0 + $0x98] sm:$0xff]  ;;  %v34_v60 = vld [vmem:[%s1146_s0 + $0xa0] sm:$0xff] }
  0x14   :  { %546 = vst [vmem:[%s1149_s3 + $0x30] sm:$0xff] %v482_v10  ;;  %547 = vst [vmem:[%s1149_s3 + $0x38] sm:$0xff] %v483_v12  ;;  %v166_v21 = vadd.f32 %v643_v2, %v95_v14  ;;  %v167_v22 = vadd.f32 %v643_v2, %v96_v15  ;;  %v100_v23 = vmul.f32 %v638_v1, %v29_v3  ;;  %v228_v24 = vadd.f32 3.0, %v164_v16  ;;  %v35_v3 = vld [vmem:[%s1146_s0 + $0xa8] sm:$0xff]  ;;  %v36_v4 = vld [vmem:[%s1146_s0 + $0xb0] sm:$0xff] }
  0x15   :  { %v168_v25 = vadd.f32 %v643_v2, %v97_v17  ;;  %v169_v26 = vadd.f32 %v643_v2, %v98_v18  ;;  %v170_v27 = vadd.f32 %v643_v2, %v99_v19  ;;  %v229_v28 = vadd.f32 3.0, %v165_v20  ;;  %v37_v5 = vld [vmem:[%s1146_s0 + $0xb8] sm:$0xff] }
  0x16   :  { %v230_v29 = vadd.f32 3.0, %v166_v21  ;;  %v231_v30 = vadd.f32 3.0, %v167_v22  ;;  %v171_v31 = vadd.f32 %v643_v2, %v100_v23  ;;  %v292_v32 = vmax.f32 %v228_v24, 0.0 }
  0x17   :  { %v232_v33 = vadd.f32 3.0, %v168_v25  ;;  %v233_v34 = vadd.f32 3.0, %v169_v26  ;;  %v234_v35 = vadd.f32 3.0, %v170_v27  ;;  %v293_v36 = vmax.f32 %v229_v28, 0.0 }
  0x18   :  { %v294_v37 = vmax.f32 %v230_v29, 0.0  ;;  %v295_v38 = vmax.f32 %v231_v30, 0.0  ;;  %v235_v39 = vadd.f32 3.0, %v171_v31  ;;  %v356_v40 = vmin.f32 %v292_v32, 6.0 }
  0x19   :  { %v296_v41 = vmax.f32 %v232_v33, 0.0  ;;  %v297_v42 = vmax.f32 %v233_v34, 0.0  ;;  %v298_v43 = vmax.f32 %v234_v35, 0.0  ;;  %v357_v44 = vmin.f32 %v293_v36, 6.0 }
  0x1a   :  { %v358_v45 = vmin.f32 %v294_v37, 6.0  ;;  %v359_v46 = vmin.f32 %v295_v38, 6.0  ;;  %v299_v47 = vmax.f32 %v235_v39, 0.0  ;;  %v420_v48 = vmul.f32 %v356_v40, %v164_v16 }
  0x1b   :  { %v360_v49 = vmin.f32 %v296_v41, 6.0  ;;  %v361_v50 = vmin.f32 %v297_v42, 6.0  ;;  %v362_v51 = vmin.f32 %v298_v43, 6.0  ;;  %v421_v54 = vmul.f32 %v357_v44, %v165_v20 }
  0x1c   :  { %v422_v55 = vmul.f32 %v358_v45, %v166_v21  ;;  %v423_v56 = vmul.f32 %v359_v46, %v167_v22  ;;  %v363_v57 = vmin.f32 %v299_v47, 6.0  ;;  %v484_v61 = vmul.f32 0.16666667, %v420_v48 }
  0x1d   :  { %v424_v62 = vmul.f32 %v360_v49, %v168_v25  ;;  %v425_v63 = vmul.f32 %v361_v50, %v169_v26  ;;  %v426_v0 = vmul.f32 %v362_v51, %v170_v27  ;;  %v485_v6 = vmul.f32 0.16666667, %v421_v54  ;;  %v38_v54 = vld [vmem:[%s1146_s0 + $0xc0] sm:$0xff] }
  0x1e   :  { %v486_v7 = vmul.f32 0.16666667, %v422_v55  ;;  %v487_v8 = vmul.f32 0.16666667, %v423_v56  ;;  %v427_v9 = vmul.f32 %v363_v57, %v171_v31  ;;  %548 = vst [vmem:[%s1149_s3 + $0x40] sm:$0xff] %v484_v61  ;;  %v101_v13 = vmul.f32 %v638_v1, %v30_v52  ;;  %v39_v55 = vld [vmem:[%s1146_s0 + $0xc8] sm:$0xff] }
  0x1f   :  { %v488_v10 = vmul.f32 0.16666667, %v424_v62  ;;  %v489_v11 = vmul.f32 0.16666667, %v425_v63  ;;  %v490_v12 = vmul.f32 0.16666667, %v426_v0  ;;  %v102_v15 = vmul.f32 %v638_v1, %v31_v53 }
  0x20   :  { %549 = vst [vmem:[%s1149_s3 + $0x48] sm:$0xff] %v485_v6  ;;  %550 = vst [vmem:[%s1149_s3 + $0x50] sm:$0xff] %v486_v7  ;;  %v491_v14 = vmul.f32 0.16666667, %v427_v9  ;;  %v103_v16 = vmul.f32 %v638_v1, %v32_v58  ;;  %v104_v17 = vmul.f32 %v638_v1, %v33_v59  ;;  %v172_v18 = vadd.f32 %v643_v2, %v101_v13  ;;  %v41_v61 = vld [vmem:[%s1146_s0 + $0xd8] sm:$0xff]  ;;  %v42_v62 = vld [vmem:[%s1146_s0 + $0xe0] sm:$0xff] }
  0x21   :  { %551 = vst [vmem:[%s1149_s3 + $0x58] sm:$0xff] %v487_v8  ;;  %552 = vst [vmem:[%s1149_s3 + $0x60] sm:$0xff] %v488_v10  ;;  %v105_v19 = vmul.f32 %v638_v1, %v34_v60  ;;  %v106_v20 = vmul.f32 %v638_v1, %v35_v3  ;;  %v107_v21 = vmul.f32 %v638_v1, %v36_v4  ;;  %v40_v60 = vld [vmem:[%s1146_s0 + $0xd0] sm:$0xff]  ;;  %v45_v7 = vld [vmem:[%s1146_s0 + $0xf8] sm:$0xff] }
  0x22   :  { %553 = vst [vmem:[%s1149_s3 + $0x68] sm:$0xff] %v489_v11  ;;  %554 = vst [vmem:[%s1149_s3 + $0x70] sm:$0xff] %v490_v12  ;;  %v173_v22 = vadd.f32 %v643_v2, %v102_v15  ;;  %v174_v23 = vadd.f32 %v643_v2, %v103_v16  ;;  %v175_v24 = vadd.f32 %v643_v2, %v104_v17  ;;  %v236_v26 = vadd.f32 3.0, %v172_v18  ;;  %v44_v6 = vld [vmem:[%s1146_s0 + $0xf0] sm:$0xff] }
  0x23   :  { %555 = vst [vmem:[%s1149_s3 + $0x78] sm:$0xff] %v491_v14  ;;  %v108_v25 = vmul.f32 %v638_v1, %v37_v5  ;;  %v176_v27 = vadd.f32 %v643_v2, %v105_v19  ;;  %v177_v28 = vadd.f32 %v643_v2, %v106_v20  ;;  %v178_v29 = vadd.f32 %v643_v2, %v107_v21  ;;  %v43_v5 = vld [vmem:[%s1146_s0 + $0xe8] sm:$0xff] }
  0x24   :  { %v237_v30 = vadd.f32 3.0, %v173_v22  ;;  %v238_v31 = vadd.f32 3.0, %v174_v23  ;;  %v239_v32 = vadd.f32 3.0, %v175_v24  ;;  %v300_v34 = vmax.f32 %v236_v26, 0.0 }
  0x25   :  { %v179_v33 = vadd.f32 %v643_v2, %v108_v25  ;;  %v240_v35 = vadd.f32 3.0, %v176_v27  ;;  %v241_v36 = vadd.f32 3.0, %v177_v28  ;;  %v242_v37 = vadd.f32 3.0, %v178_v29 }
  0x26   :  { %v301_v38 = vmax.f32 %v237_v30, 0.0  ;;  %v302_v39 = vmax.f32 %v238_v31, 0.0  ;;  %v303_v40 = vmax.f32 %v239_v32, 0.0  ;;  %v364_v42 = vmin.f32 %v300_v34, 6.0 }
  0x27   :  { %v243_v41 = vadd.f32 3.0, %v179_v33  ;;  %v304_v43 = vmax.f32 %v240_v35, 0.0  ;;  %v305_v44 = vmax.f32 %v241_v36, 0.0  ;;  %v306_v45 = vmax.f32 %v242_v37, 0.0 }
  0x28   :  { %v365_v46 = vmin.f32 %v301_v38, 6.0  ;;  %v366_v47 = vmin.f32 %v302_v39, 6.0  ;;  %v367_v48 = vmin.f32 %v303_v40, 6.0  ;;  %v428_v50 = vmul.f32 %v364_v42, %v172_v18 }
  0x29   :  { %v307_v49 = vmax.f32 %v243_v41, 0.0  ;;  %v368_v51 = vmin.f32 %v304_v43, 6.0  ;;  %v369_v52 = vmin.f32 %v305_v44, 6.0  ;;  %v370_v53 = vmin.f32 %v306_v45, 6.0 }
  0x2a   :  { %v429_v56 = vmul.f32 %v365_v46, %v173_v22  ;;  %v430_v57 = vmul.f32 %v366_v47, %v174_v23  ;;  %v431_v58 = vmul.f32 %v367_v48, %v175_v24  ;;  %v492_v63 = vmul.f32 0.16666667, %v428_v50 }
  0x2b   :  { %v371_v59 = vmin.f32 %v307_v49, 6.0  ;;  %v432_v0 = vmul.f32 %v368_v51, %v176_v27  ;;  %v433_v3 = vmul.f32 %v369_v52, %v177_v28  ;;  %v434_v4 = vmul.f32 %v370_v53, %v178_v29 }
  0x2c   :  { %v493_v8 = vmul.f32 0.16666667, %v429_v56  ;;  %v494_v9 = vmul.f32 0.16666667, %v430_v57  ;;  %v495_v10 = vmul.f32 0.16666667, %v431_v58  ;;  %v109_v15 = vmul.f32 %v638_v1, %v38_v54 }
  0x2d   :  { %v435_v11 = vmul.f32 %v371_v59, %v179_v33  ;;  %556 = vst [vmem:[%s1149_s3 + $0x80] sm:$0xff] %v492_v63  ;;  %v496_v12 = vmul.f32 0.16666667, %v432_v0  ;;  %v497_v13 = vmul.f32 0.16666667, %v433_v3  ;;  %v110_v17 = vmul.f32 %v638_v1, %v39_v55  ;;  %v46_v56 = vld [vmem:[%s1146_s0 + $0x100] sm:$0xff] }
  0x2e   :  { %v498_v14 = vmul.f32 0.16666667, %v434_v4  ;;  %557 = vst [vmem:[%s1149_s3 + $0x88] sm:$0xff] %v493_v8  ;;  %558 = vst [vmem:[%s1149_s3 + $0x90] sm:$0xff] %v494_v9  ;;  %v111_v18 = vmul.f32 %v638_v1, %v40_v60  ;;  %v112_v19 = vmul.f32 %v638_v1, %v41_v61  ;;  %v180_v20 = vadd.f32 %v643_v2, %v109_v15  ;;  %v47_v57 = vld [vmem:[%s1146_s0 + $0x108] sm:$0xff]  ;;  %v49_v63 = vld [vmem:[%s1146_s0 + $0x118] sm:$0xff] }
  0x2f   :  { %559 = vst [vmem:[%s1149_s3 + $0x98] sm:$0xff] %v495_v10  ;;  %v499_v16 = vmul.f32 0.16666667, %v435_v11  ;;  %560 = vst [vmem:[%s1149_s3 + $0xa0] sm:$0xff] %v496_v12  ;;  %v113_v21 = vmul.f32 %v638_v1, %v42_v62  ;;  %v114_v22 = vmul.f32 %v638_v1, %v43_v5  ;;  %v115_v23 = vmul.f32 %v638_v1, %v44_v6  ;;  %v48_v62 = vld [vmem:[%s1146_s0 + $0x110] sm:$0xff]  ;;  %v50_v0 = vld [vmem:[%s1146_s0 + $0x120] sm:$0xff] }
  0x30   :  { %561 = vst [vmem:[%s1149_s3 + $0xa8] sm:$0xff] %v497_v13  ;;  %562 = vst [vmem:[%s1149_s3 + $0xb0] sm:$0xff] %v498_v14  ;;  %v181_v24 = vadd.f32 %v643_v2, %v110_v17  ;;  %v182_v25 = vadd.f32 %v643_v2, %v111_v18  ;;  %v183_v26 = vadd.f32 %v643_v2, %v112_v19  ;;  %v244_v28 = vadd.f32 3.0, %v180_v20  ;;  %v52_v8 = vld [vmem:[%s1146_s0 + $0x130] sm:$0xff]  ;;  %v53_v9 = vld [vmem:[%s1146_s0 + $0x138] sm:$0xff] }
  0x31   :  { %563 = vst [vmem:[%s1149_s3 + $0xb8] sm:$0xff] %v499_v16  ;;  %v116_v27 = vmul.f32 %v638_v1, %v45_v7  ;;  %v184_v29 = vadd.f32 %v643_v2, %v113_v21  ;;  %v185_v30 = vadd.f32 %v643_v2, %v114_v22  ;;  %v186_v31 = vadd.f32 %v643_v2, %v115_v23  ;;  %v51_v7 = vld [vmem:[%s1146_s0 + $0x128] sm:$0xff] }
  0x32   :  { %v245_v32 = vadd.f32 3.0, %v181_v24  ;;  %v246_v33 = vadd.f32 3.0, %v182_v25  ;;  %v247_v34 = vadd.f32 3.0, %v183_v26  ;;  %v308_v36 = vmax.f32 %v244_v28, 0.0 }
  0x33   :  { %v187_v35 = vadd.f32 %v643_v2, %v116_v27  ;;  %v248_v37 = vadd.f32 3.0, %v184_v29  ;;  %v249_v38 = vadd.f32 3.0, %v185_v30  ;;  %v250_v39 = vadd.f32 3.0, %v186_v31 }
  0x34   :  { %v309_v40 = vmax.f32 %v245_v32, 0.0  ;;  %v310_v41 = vmax.f32 %v246_v33, 0.0  ;;  %v311_v42 = vmax.f32 %v247_v34, 0.0  ;;  %v372_v44 = vmin.f32 %v308_v36, 6.0 }
  0x35   :  { %v251_v43 = vadd.f32 3.0, %v187_v35  ;;  %v312_v45 = vmax.f32 %v248_v37, 0.0  ;;  %v313_v46 = vmax.f32 %v249_v38, 0.0  ;;  %v314_v47 = vmax.f32 %v250_v39, 0.0 }
  0x36   :  { %v373_v48 = vmin.f32 %v309_v40, 6.0  ;;  %v374_v49 = vmin.f32 %v310_v41, 6.0  ;;  %v375_v50 = vmin.f32 %v311_v42, 6.0  ;;  %v436_v52 = vmul.f32 %v372_v44, %v180_v20 }
  0x37   :  { %v315_v51 = vmax.f32 %v251_v43, 0.0  ;;  %v376_v53 = vmin.f32 %v312_v45, 6.0  ;;  %v377_v54 = vmin.f32 %v313_v46, 6.0  ;;  %v378_v55 = vmin.f32 %v314_v47, 6.0 }
  0x38   :  { %v437_v58 = vmul.f32 %v373_v48, %v181_v24  ;;  %v438_v59 = vmul.f32 %v374_v49, %v182_v25  ;;  %v439_v60 = vmul.f32 %v375_v50, %v183_v26  ;;  %v500_v3 = vmul.f32 0.16666667, %v436_v52 }
  0x39   :  { %v379_v61 = vmin.f32 %v315_v51, 6.0  ;;  %v440_v4 = vmul.f32 %v376_v53, %v184_v29  ;;  %v441_v5 = vmul.f32 %v377_v54, %v185_v30  ;;  %v442_v6 = vmul.f32 %v378_v55, %v186_v31 }
  0x3a   :  { %v501_v10 = vmul.f32 0.16666667, %v437_v58  ;;  %v502_v11 = vmul.f32 0.16666667, %v438_v59  ;;  %v503_v12 = vmul.f32 0.16666667, %v439_v60  ;;  %v117_v17 = vmul.f32 %v638_v1, %v46_v56 }
  0x3b   :  { %v443_v13 = vmul.f32 %v379_v61, %v187_v35  ;;  %564 = vst [vmem:[%s1149_s3 + $0xc0] sm:$0xff] %v500_v3  ;;  %v504_v14 = vmul.f32 0.16666667, %v440_v4  ;;  %v505_v15 = vmul.f32 0.16666667, %v441_v5  ;;  %v118_v19 = vmul.f32 %v638_v1, %v47_v57  ;;  %v54_v58 = vld [vmem:[%s1146_s0 + $0x140] sm:$0xff] }
  0x3c   :  { %v506_v16 = vmul.f32 0.16666667, %v442_v6  ;;  %565 = vst [vmem:[%s1149_s3 + $0xc8] sm:$0xff] %v501_v10  ;;  %566 = vst [vmem:[%s1149_s3 + $0xd0] sm:$0xff] %v502_v11  ;;  %v119_v20 = vmul.f32 %v638_v1, %v48_v62  ;;  %v120_v21 = vmul.f32 %v638_v1, %v49_v63  ;;  %v188_v22 = vadd.f32 %v643_v2, %v117_v17  ;;  %v55_v59 = vld [vmem:[%s1146_s0 + $0x148] sm:$0xff]  ;;  %v57_v3 = vld [vmem:[%s1146_s0 + $0x158] sm:$0xff] }
  0x3d   :  { %567 = vst [vmem:[%s1149_s3 + $0xd8] sm:$0xff] %v503_v12  ;;  %v507_v18 = vmul.f32 0.16666667, %v443_v13  ;;  %568 = vst [vmem:[%s1149_s3 + $0xe0] sm:$0xff] %v504_v14  ;;  %v121_v23 = vmul.f32 %v638_v1, %v50_v0  ;;  %v122_v24 = vmul.f32 %v638_v1, %v51_v7  ;;  %v123_v25 = vmul.f32 %v638_v1, %v52_v8  ;;  %v56_v0 = vld [vmem:[%s1146_s0 + $0x150] sm:$0xff]  ;;  %v58_v4 = vld [vmem:[%s1146_s0 + $0x160] sm:$0xff] }
  0x3e   :  { %569 = vst [vmem:[%s1149_s3 + $0xe8] sm:$0xff] %v505_v15  ;;  %570 = vst [vmem:[%s1149_s3 + $0xf0] sm:$0xff] %v506_v16  ;;  %v189_v26 = vadd.f32 %v643_v2, %v118_v19  ;;  %v190_v27 = vadd.f32 %v643_v2, %v119_v20  ;;  %v191_v28 = vadd.f32 %v643_v2, %v120_v21  ;;  %v252_v30 = vadd.f32 3.0, %v188_v22  ;;  %v60_v10 = vld [vmem:[%s1146_s0 + $0x170] sm:$0xff]  ;;  %v61_v11 = vld [vmem:[%s1146_s0 + $0x178] sm:$0xff] }
  0x3f   :  { %571 = vst [vmem:[%s1149_s3 + $0xf8] sm:$0xff] %v507_v18  ;;  %v124_v29 = vmul.f32 %v638_v1, %v53_v9  ;;  %v192_v31 = vadd.f32 %v643_v2, %v121_v23  ;;  %v193_v32 = vadd.f32 %v643_v2, %v122_v24  ;;  %v194_v33 = vadd.f32 %v643_v2, %v123_v25  ;;  %v59_v9 = vld [vmem:[%s1146_s0 + $0x168] sm:$0xff] }
  0x40   :  { %v253_v34 = vadd.f32 3.0, %v189_v26  ;;  %v254_v35 = vadd.f32 3.0, %v190_v27  ;;  %v255_v36 = vadd.f32 3.0, %v191_v28  ;;  %v316_v38 = vmax.f32 %v252_v30, 0.0 }
  0x41   :  { %v195_v37 = vadd.f32 %v643_v2, %v124_v29  ;;  %v256_v39 = vadd.f32 3.0, %v192_v31  ;;  %v257_v40 = vadd.f32 3.0, %v193_v32  ;;  %v258_v41 = vadd.f32 3.0, %v194_v33 }
  0x42   :  { %v317_v42 = vmax.f32 %v253_v34, 0.0  ;;  %v318_v43 = vmax.f32 %v254_v35, 0.0  ;;  %v319_v44 = vmax.f32 %v255_v36, 0.0  ;;  %v380_v46 = vmin.f32 %v316_v38, 6.0 }
  0x43   :  { %v259_v45 = vadd.f32 3.0, %v195_v37  ;;  %v320_v47 = vmax.f32 %v256_v39, 0.0  ;;  %v321_v48 = vmax.f32 %v257_v40, 0.0  ;;  %v322_v49 = vmax.f32 %v258_v41, 0.0 }
  0x44   :  { %v381_v50 = vmin.f32 %v317_v42, 6.0  ;;  %v382_v51 = vmin.f32 %v318_v43, 6.0  ;;  %v383_v52 = vmin.f32 %v319_v44, 6.0  ;;  %v444_v54 = vmul.f32 %v380_v46, %v188_v22 }
  0x45   :  { %v323_v53 = vmax.f32 %v259_v45, 0.0  ;;  %v384_v55 = vmin.f32 %v320_v47, 6.0  ;;  %v385_v56 = vmin.f32 %v321_v48, 6.0  ;;  %v386_v57 = vmin.f32 %v322_v49, 6.0 }
  0x46   :  { %v445_v60 = vmul.f32 %v381_v50, %v189_v26  ;;  %v446_v61 = vmul.f32 %v382_v51, %v190_v27  ;;  %v447_v62 = vmul.f32 %v383_v52, %v191_v28  ;;  %v508_v5 = vmul.f32 0.16666667, %v444_v54 }
  0x47   :  { %v387_v63 = vmin.f32 %v323_v53, 6.0  ;;  %v448_v6 = vmul.f32 %v384_v55, %v192_v31  ;;  %v449_v7 = vmul.f32 %v385_v56, %v193_v32  ;;  %v450_v8 = vmul.f32 %v386_v57, %v194_v33 }
  0x48   :  { %v509_v12 = vmul.f32 0.16666667, %v445_v60  ;;  %v510_v13 = vmul.f32 0.16666667, %v446_v61  ;;  %v511_v14 = vmul.f32 0.16666667, %v447_v62  ;;  %v125_v19 = vmul.f32 %v638_v1, %v54_v58 }
  0x49   :  { %v451_v15 = vmul.f32 %v387_v63, %v195_v37  ;;  %572 = vst [vmem:[%s1149_s3 + $0x100] sm:$0xff] %v508_v5  ;;  %v512_v16 = vmul.f32 0.16666667, %v448_v6  ;;  %v513_v17 = vmul.f32 0.16666667, %v449_v7  ;;  %v126_v21 = vmul.f32 %v638_v1, %v55_v59  ;;  %v62_v60 = vld [vmem:[%s1146_s0 + $0x180] sm:$0xff] }
  0x4a   :  { %v514_v18 = vmul.f32 0.16666667, %v450_v8  ;;  %573 = vst [vmem:[%s1149_s3 + $0x108] sm:$0xff] %v509_v12  ;;  %574 = vst [vmem:[%s1149_s3 + $0x110] sm:$0xff] %v510_v13  ;;  %v127_v22 = vmul.f32 %v638_v1, %v56_v0  ;;  %v128_v23 = vmul.f32 %v638_v1, %v57_v3  ;;  %v196_v24 = vadd.f32 %v643_v2, %v125_v19  ;;  %v63_v61 = vld [vmem:[%s1146_s0 + $0x188] sm:$0xff]  ;;  %v65_v5 = vld [vmem:[%s1146_s0 + $0x198] sm:$0xff] }
  0x4b   :  { %575 = vst [vmem:[%s1149_s3 + $0x118] sm:$0xff] %v511_v14  ;;  %v515_v20 = vmul.f32 0.16666667, %v451_v15  ;;  %576 = vst [vmem:[%s1149_s3 + $0x120] sm:$0xff] %v512_v16  ;;  %v129_v25 = vmul.f32 %v638_v1, %v58_v4  ;;  %v130_v26 = vmul.f32 %v638_v1, %v59_v9  ;;  %v131_v27 = vmul.f32 %v638_v1, %v60_v10  ;;  %v64_v4 = vld [vmem:[%s1146_s0 + $0x190] sm:$0xff]  ;;  %v66_v6 = vld [vmem:[%s1146_s0 + $0x1a0] sm:$0xff] }
  0x4c   :  { %577 = vst [vmem:[%s1149_s3 + $0x128] sm:$0xff] %v513_v17  ;;  %578 = vst [vmem:[%s1149_s3 + $0x130] sm:$0xff] %v514_v18  ;;  %v197_v28 = vadd.f32 %v643_v2, %v126_v21  ;;  %v198_v29 = vadd.f32 %v643_v2, %v127_v22  ;;  %v199_v30 = vadd.f32 %v643_v2, %v128_v23  ;;  %v260_v32 = vadd.f32 3.0, %v196_v24  ;;  %v68_v12 = vld [vmem:[%s1146_s0 + $0x1b0] sm:$0xff]  ;;  %v69_v13 = vld [vmem:[%s1146_s0 + $0x1b8] sm:$0xff] }
  0x4d   :  { %579 = vst [vmem:[%s1149_s3 + $0x138] sm:$0xff] %v515_v20  ;;  %v132_v31 = vmul.f32 %v638_v1, %v61_v11  ;;  %v200_v33 = vadd.f32 %v643_v2, %v129_v25  ;;  %v201_v34 = vadd.f32 %v643_v2, %v130_v26  ;;  %v202_v35 = vadd.f32 %v643_v2, %v131_v27  ;;  %v67_v11 = vld [vmem:[%s1146_s0 + $0x1a8] sm:$0xff] }
  0x4e   :  { %v261_v36 = vadd.f32 3.0, %v197_v28  ;;  %v262_v37 = vadd.f32 3.0, %v198_v29  ;;  %v263_v38 = vadd.f32 3.0, %v199_v30  ;;  %v324_v40 = vmax.f32 %v260_v32, 0.0 }
  0x4f   :  { %v203_v39 = vadd.f32 %v643_v2, %v132_v31  ;;  %v264_v41 = vadd.f32 3.0, %v200_v33  ;;  %v265_v42 = vadd.f32 3.0, %v201_v34  ;;  %v266_v43 = vadd.f32 3.0, %v202_v35 }
  0x50   :  { %v325_v44 = vmax.f32 %v261_v36, 0.0  ;;  %v326_v45 = vmax.f32 %v262_v37, 0.0  ;;  %v327_v46 = vmax.f32 %v263_v38, 0.0  ;;  %v388_v48 = vmin.f32 %v324_v40, 6.0 }
  0x51   :  { %v267_v47 = vadd.f32 3.0, %v203_v39  ;;  %v328_v49 = vmax.f32 %v264_v41, 0.0  ;;  %v329_v50 = vmax.f32 %v265_v42, 0.0  ;;  %v330_v51 = vmax.f32 %v266_v43, 0.0 }
  0x52   :  { %v389_v52 = vmin.f32 %v325_v44, 6.0  ;;  %v390_v53 = vmin.f32 %v326_v45, 6.0  ;;  %v391_v54 = vmin.f32 %v327_v46, 6.0  ;;  %v452_v56 = vmul.f32 %v388_v48, %v196_v24 }
  0x53   :  { %v331_v55 = vmax.f32 %v267_v47, 0.0  ;;  %v392_v57 = vmin.f32 %v328_v49, 6.0  ;;  %v393_v58 = vmin.f32 %v329_v50, 6.0  ;;  %v394_v59 = vmin.f32 %v330_v51, 6.0 }
  0x54   :  { %v453_v62 = vmul.f32 %v389_v52, %v197_v28  ;;  %v454_v63 = vmul.f32 %v390_v53, %v198_v29  ;;  %v455_v0 = vmul.f32 %v391_v54, %v199_v30  ;;  %v516_v7 = vmul.f32 0.16666667, %v452_v56 }
  0x55   :  { %v395_v3 = vmin.f32 %v331_v55, 6.0  ;;  %v456_v8 = vmul.f32 %v392_v57, %v200_v33  ;;  %v457_v9 = vmul.f32 %v393_v58, %v201_v34  ;;  %v458_v10 = vmul.f32 %v394_v59, %v202_v35 }
  0x56   :  { %v517_v14 = vmul.f32 0.16666667, %v453_v62  ;;  %v518_v15 = vmul.f32 0.16666667, %v454_v63  ;;  %v519_v16 = vmul.f32 0.16666667, %v455_v0  ;;  %v133_v21 = vmul.f32 %v638_v1, %v62_v60 }
  0x57   :  { %v459_v17 = vmul.f32 %v395_v3, %v203_v39  ;;  %580 = vst [vmem:[%s1149_s3 + $0x140] sm:$0xff] %v516_v7  ;;  %v520_v18 = vmul.f32 0.16666667, %v456_v8  ;;  %v521_v19 = vmul.f32 0.16666667, %v457_v9  ;;  %v134_v23 = vmul.f32 %v638_v1, %v63_v61  ;;  %v70_v61 = vld [vmem:[%s1146_s0 + $0x1c0] sm:$0xff] }
  0x58   :  { %v522_v20 = vmul.f32 0.16666667, %v458_v10  ;;  %581 = vst [vmem:[%s1149_s3 + $0x148] sm:$0xff] %v517_v14  ;;  %582 = vst [vmem:[%s1149_s3 + $0x150] sm:$0xff] %v518_v15  ;;  %v135_v24 = vmul.f32 %v638_v1, %v64_v4  ;;  %v136_v25 = vmul.f32 %v638_v1, %v65_v5  ;;  %v204_v26 = vadd.f32 %v643_v2, %v133_v21  ;;  %v71_v62 = vld [vmem:[%s1146_s0 + $0x1c8] sm:$0xff]  ;;  %v72_v5 = vld [vmem:[%s1146_s0 + $0x1d0] sm:$0xff] }
  0x59   :  { %583 = vst [vmem:[%s1149_s3 + $0x158] sm:$0xff] %v519_v16  ;;  %v523_v22 = vmul.f32 0.16666667, %v459_v17  ;;  %584 = vst [vmem:[%s1149_s3 + $0x160] sm:$0xff] %v520_v18  ;;  %v137_v27 = vmul.f32 %v638_v1, %v66_v6  ;;  %v138_v28 = vmul.f32 %v638_v1, %v67_v11  ;;  %v139_v29 = vmul.f32 %v638_v1, %v68_v12  ;;  %v73_v6 = vld [vmem:[%s1146_s0 + $0x1d8] sm:$0xff]  ;;  %v74_v7 = vld [vmem:[%s1146_s0 + $0x1e0] sm:$0xff] }
  0x5a   :  { %585 = vst [vmem:[%s1149_s3 + $0x168] sm:$0xff] %v521_v19  ;;  %586 = vst [vmem:[%s1149_s3 + $0x170] sm:$0xff] %v522_v20  ;;  %v205_v30 = vadd.f32 %v643_v2, %v134_v23  ;;  %v206_v31 = vadd.f32 %v643_v2, %v135_v24  ;;  %v207_v32 = vadd.f32 %v643_v2, %v136_v25  ;;  %v268_v34 = vadd.f32 3.0, %v204_v26  ;;  %v75_v12 = vld [vmem:[%s1146_s0 + $0x1e8] sm:$0xff]  ;;  %v77_v14 = vld [vmem:[%s1146_s0 + $0x1f8] sm:$0xff] }
  0x5b   :  { %587 = vst [vmem:[%s1149_s3 + $0x178] sm:$0xff] %v523_v22  ;;  %v140_v33 = vmul.f32 %v638_v1, %v69_v13  ;;  %v208_v35 = vadd.f32 %v643_v2, %v137_v27  ;;  %v209_v36 = vadd.f32 %v643_v2, %v138_v28  ;;  %v210_v37 = vadd.f32 %v643_v2, %v139_v29  ;;  %v76_v13 = vld [vmem:[%s1146_s0 + $0x1f0] sm:$0xff]  ;;  %v610_v25 = vld [vmem:[%s1147_s1] ss:$0 sm:$0xff] }
  0x5c   :  { %v269_v38 = vadd.f32 3.0, %v205_v30  ;;  %v270_v39 = vadd.f32 3.0, %v206_v31  ;;  %v271_v40 = vadd.f32 3.0, %v207_v32  ;;  %v332_v42 = vmax.f32 %v268_v34, 0.0 }
  0x5d   :  { %v211_v41 = vadd.f32 %v643_v2, %v140_v33  ;;  %v272_v43 = vadd.f32 3.0, %v208_v35  ;;  %v273_v44 = vadd.f32 3.0, %v209_v36  ;;  %v274_v45 = vadd.f32 3.0, %v210_v37 }
  0x5e   :  { %v333_v46 = vmax.f32 %v269_v38, 0.0  ;;  %v334_v47 = vmax.f32 %v270_v39, 0.0  ;;  %v335_v48 = vmax.f32 %v271_v40, 0.0  ;;  %v396_v50 = vmin.f32 %v332_v42, 6.0 }
  0x5f   :  { %v275_v49 = vadd.f32 3.0, %v211_v41  ;;  %v336_v51 = vmax.f32 %v272_v43, 0.0  ;;  %v337_v52 = vmax.f32 %v273_v44, 0.0  ;;  %v338_v53 = vmax.f32 %v274_v45, 0.0 }
  0x60   :  { %v397_v54 = vmin.f32 %v333_v46, 6.0  ;;  %v398_v55 = vmin.f32 %v334_v47, 6.0  ;;  %v399_v56 = vmin.f32 %v335_v48, 6.0  ;;  %v460_v58 = vmul.f32 %v396_v50, %v204_v26 }
  0x61   :  { %v339_v57 = vmax.f32 %v275_v49, 0.0  ;;  %v400_v59 = vmin.f32 %v336_v51, 6.0  ;;  %v401_v60 = vmin.f32 %v337_v52, 6.0  ;;  %v402_v2 = vmin.f32 %v338_v53, 6.0 }
  0x62   :  { %v461_v63 = vmul.f32 %v397_v54, %v205_v30  ;;  %v462_v0 = vmul.f32 %v398_v55, %v206_v31  ;;  %v463_v3 = vmul.f32 %v399_v56, %v207_v32  ;;  %v524_v8 = vmul.f32 0.16666667, %v460_v58 }
  0x63   :  { %v403_v4 = vmin.f32 %v339_v57, 6.0  ;;  %v464_v9 = vmul.f32 %v400_v59, %v208_v35  ;;  %v465_v10 = vmul.f32 %v401_v60, %v209_v36  ;;  %v466_v11 = vmul.f32 %v402_v2, %v210_v37 }
  0x64   :  { %v525_v15 = vmul.f32 0.16666667, %v461_v63  ;;  %v526_v16 = vmul.f32 0.16666667, %v462_v0  ;;  %v527_v17 = vmul.f32 0.16666667, %v463_v3  ;;  %v141_v22 = vmul.f32 %v638_v1, %v70_v61 }
  0x65   :  { %v467_v18 = vmul.f32 %v403_v4, %v211_v41  ;;  %588 = vst [vmem:[%s1149_s3 + $0x180] sm:$0xff] %v524_v8  ;;  %v528_v19 = vmul.f32 0.16666667, %v464_v9  ;;  %v529_v20 = vmul.f32 0.16666667, %v465_v10  ;;  %v142_v24 = vmul.f32 %v638_v1, %v71_v62 }
  0x66   :  { %v530_v21 = vmul.f32 0.16666667, %v466_v11  ;;  %589 = vst [vmem:[%s1149_s3 + $0x188] sm:$0xff] %v525_v15  ;;  %590 = vst [vmem:[%s1149_s3 + $0x190] sm:$0xff] %v526_v16  ;;  %v143_v26 = vmul.f32 %v610_v25, %v72_v5  ;;  %v144_v27 = vmul.f32 %v610_v25, %v73_v6  ;;  %v611_v1 = vld [vmem:[%s1148_s2] ss:$0 sm:$0xff]  ;;  %v145_v29 = vmul.f32 %v610_v25, %v74_v7 }
  0x67   :  { %591 = vst [vmem:[%s1149_s3 + $0x198] sm:$0xff] %v527_v17  ;;  %v531_v23 = vmul.f32 0.16666667, %v467_v18  ;;  %592 = vst [vmem:[%s1149_s3 + $0x1a0] sm:$0xff] %v528_v19  ;;  %v212_v28 = vadd.f32 %v611_v1, %v141_v22  ;;  %v146_v30 = vmul.f32 %v610_v25, %v75_v12  ;;  %v147_v31 = vmul.f32 %v610_v25, %v76_v13 }
  0x68   :  { %593 = vst [vmem:[%s1149_s3 + $0x1a8] sm:$0xff] %v529_v20  ;;  %594 = vst [vmem:[%s1149_s3 + $0x1b0] sm:$0xff] %v530_v21  ;;  %v213_v32 = vadd.f32 %v611_v1, %v142_v24  ;;  %v214_v33 = vadd.f32 %v611_v1, %v143_v26  ;;  %v215_v34 = vadd.f32 %v611_v1, %v144_v27 }
  0x69   :  { %595 = vst [vmem:[%s1149_s3 + $0x1b8] sm:$0xff] %v531_v23  ;;  %v148_v35 = vmul.f32 %v610_v25, %v77_v14  ;;  %v276_v36 = vadd.f32 3.0, %v212_v28  ;;  %v216_v37 = vadd.f32 %v611_v1, %v145_v29  ;;  %v217_v38 = vadd.f32 %v611_v1, %v146_v30 }
  0x6a   :  { %v218_v39 = vadd.f32 %v611_v1, %v147_v31  ;;  %v277_v40 = vadd.f32 3.0, %v213_v32  ;;  %v278_v41 = vadd.f32 3.0, %v214_v33  ;;  %v279_v42 = vadd.f32 3.0, %v215_v34 }
  0x6b   :  { %v219_v43 = vadd.f32 %v611_v1, %v148_v35  ;;  %v340_v44 = vmax.f32 %v276_v36, 0.0  ;;  %v280_v45 = vadd.f32 3.0, %v216_v37  ;;  %v281_v46 = vadd.f32 3.0, %v217_v38 }
  0x6c   :  { %v282_v47 = vadd.f32 3.0, %v218_v39  ;;  %v341_v48 = vmax.f32 %v277_v40, 0.0  ;;  %v342_v49 = vmax.f32 %v278_v41, 0.0  ;;  %v343_v50 = vmax.f32 %v279_v42, 0.0 }
  0x6d   :  { %v283_v51 = vadd.f32 3.0, %v219_v43  ;;  %v404_v52 = vmin.f32 %v340_v44, 6.0  ;;  %v344_v53 = vmax.f32 %v280_v45, 0.0  ;;  %v345_v54 = vmax.f32 %v281_v46, 0.0 }
  0x6e   :  { %v346_v55 = vmax.f32 %v282_v47, 0.0  ;;  %v405_v56 = vmin.f32 %v341_v48, 6.0  ;;  %v406_v57 = vmin.f32 %v342_v49, 6.0  ;;  %v407_v58 = vmin.f32 %v343_v50, 6.0 }
  0x6f   :  { %v347_v59 = vmax.f32 %v283_v51, 0.0  ;;  %v468_v60 = vmul.f32 %v404_v52, %v212_v28  ;;  %v408_v2 = vmin.f32 %v344_v53, 6.0  ;;  %v409_v61 = vmin.f32 %v345_v54, 6.0 }
  0x70   :  { %v410_v62 = vmin.f32 %v346_v55, 6.0  ;;  %v469_v63 = vmul.f32 %v405_v56, %v213_v32  ;;  %v470_v0 = vmul.f32 %v406_v57, %v214_v33  ;;  %v471_v3 = vmul.f32 %v407_v58, %v215_v34 }
  0x71   :  { %v411_v4 = vmin.f32 %v347_v59, 6.0  ;;  %v532_v5 = vmul.f32 0.16666667, %v468_v60  ;;  %v472_v6 = vmul.f32 %v408_v2, %v216_v37  ;;  %v473_v7 = vmul.f32 %v409_v61, %v217_v38 }
  0x72   :  { %v474_v8 = vmul.f32 %v410_v62, %v218_v39  ;;  %v533_v9 = vmul.f32 0.16666667, %v469_v63  ;;  %v534_v10 = vmul.f32 0.16666667, %v470_v0  ;;  %v535_v11 = vmul.f32 0.16666667, %v471_v3 }
  0x73   :  { %v475_v12 = vmul.f32 %v411_v4, %v219_v43  ;;  %596 = vst [vmem:[%s1149_s3 + $0x1c0] sm:$0xff] %v532_v5  ;;  %v536_v13 = vmul.f32 0.16666667, %v472_v6  ;;  %v537_v14 = vmul.f32 0.16666667, %v473_v7 }
  0x74   :  { %v538_v15 = vmul.f32 0.16666667, %v474_v8  ;;  %597 = vst [vmem:[%s1149_s3 + $0x1c8] sm:$0xff] %v533_v9  ;;  %598 = vst [vmem:[%s1149_s3 + $0x1d0] sm:$0xff] %v534_v10 }
  0x75   :  { %599 = vst [vmem:[%s1149_s3 + $0x1d8] sm:$0xff] %v535_v11  ;;  %v539_v16 = vmul.f32 0.16666667, %v475_v12  ;;  %600 = vst [vmem:[%s1149_s3 + $0x1e0] sm:$0xff] %v536_v13 }
  0x76   :  { %601 = vst [vmem:[%s1149_s3 + $0x1e8] sm:$0xff] %v537_v14  ;;  %602 = vst [vmem:[%s1149_s3 + $0x1f0] sm:$0xff] %v538_v15 }
  0x77   :  { %603 = vst [vmem:[%s1149_s3 + $0x1f8] sm:$0xff] %v539_v16 }

</bundles_post_ra>
